<compile_context>
chip_gen: v6e
topology: v6e:2x2x1
jax: 0.10.0
libtpu: 0.0.40
codegen_flags: <defaults>
</compile_context>

<pallas_src>
import functools
import math

import jax
import jax.numpy as jnp
from jax import lax
from jax.experimental import pallas as pl
from jax.experimental.pallas import tpu as pltpu


def _vmem_limit_bytes():
    try:
        cap = pltpu.get_tpu_info().vmem_capacity_bytes
    except Exception:
        cap = 64 * 1024 * 1024
    return min(cap // 2, 64 * 1024 * 1024)


# ---------------------------------------------------------------------------
# One fused bidirectional LSTM layer:
#   grid=(T//TT,), "arbitrary" (sequential).  Per grid step:
#     1. build xcat [TT*B, 2*Dtot] in scratch: fwd streams at local time l in the
#        left half, bwd streams at local time TT-1-l in the right half,
#     2. one MXU matmul -> per-block input gates gx [TT*B, 8H] (+ bias) in scratch,
#     3. short unrolled serial loop over TT steps: one recurrent MXU matmul on the
#        merged [B,2H] state, one full-width tanh pass, one merged cell update,
#        per-step writes into the [TT,B,H] output blocks, mean accumulation.
# ---------------------------------------------------------------------------
def _bilstm_layer_kernel(*refs, n_streams, hidden, tt, bsz, inv_t, seq_dtype):
    nx = n_streams
    xf_refs = refs[:nx]                       # fwd-time blocks of the input streams
    xb_refs = refs[nx:2 * nx]                 # bwd-time blocks (reversed index map)
    wih_ref, b_ref, whh_ref = refs[2 * nx:2 * nx + 3]
    hf_ref, hb_ref, mean_ref = refs[2 * nx + 3:2 * nx + 6]
    xcat_s, gx_s, h_s, c_s = refs[2 * nx + 6:]

    bt = pl.program_id(0)
    nbt = pl.num_programs(0)
    h2 = 2 * hidden
    h8 = 8 * hidden

    @pl.when(bt == 0)
    def _init():
        h_s[...] = jnp.zeros_like(h_s)        # [hf | hb] merged state
        c_s[...] = jnp.zeros_like(c_s)        # [cf | cb]
        mean_ref[...] = jnp.zeros_like(mean_ref)

    # ---- block input projection (parallel over time, off the serial path) ----
    # xcat row l = [ fwd streams at local time l | bwd streams at local time tt-1-l ]
    off = 0
    for r in xf_refs:
        d = r.shape[-1]
        for l in range(tt):                               # static unroll
            xcat_s[l * bsz:(l + 1) * bsz, off:off + d] = r[l].astype(jnp.float32)
        off += d
    for r in xb_refs:
        d = r.shape[-1]
        for l in range(tt):                               # static unroll, reversed
            xcat_s[l * bsz:(l + 1) * bsz, off:off + d] = r[tt - 1 - l].astype(jnp.float32)
        off += d

    gx_s[...] = jnp.dot(xcat_s[...].astype(jnp.bfloat16), wih_ref[...],
                        preferred_element_type=jnp.float32) + b_ref[...]

    # tanh-gate (g) column mask for the gate-major interleaved layout
    col = lax.broadcasted_iota(jnp.int32, (1, h8), 1)
    g_mask = (col >= 4 * hidden) & (col < 6 * hidden)

    # ---- serial merged fwd+bwd recurrence over the TT timesteps of this block ----
    h = h_s[...]
    c = c_s[...]
    for s in range(tt):                                   # short static unroll
        gates = gx_s[s * bsz:(s + 1) * bsz, :] + jnp.dot(
            h.astype(jnp.bfloat16), whh_ref[...],
            preferred_element_type=jnp.float32)
        # single full-width EUP pass: sigmoid(x) = 0.5 * (tanh(x/2) + 1)
        th = jnp.tanh(jnp.where(g_mask, gates, 0.5 * gates))
        act = jnp.where(g_mask, th, 0.5 * th + 0.5)
        i_g = act[:, 0:h2]
        f_g = act[:, h2:2 * h2]
        g_g = act[:, 2 * h2:3 * h2]
        o_g = act[:, 3 * h2:4 * h2]
        c = f_g * c + i_g * g_g
        h = o_g * jnp.tanh(c)

        hf_ref[s] = h[:, :hidden].astype(seq_dtype)       # fwd output, local time s
        hb_ref[tt - 1 - s] = h[:, hidden:].astype(seq_dtype)  # bwd output
        mean_ref[...] += h                                 # fused time-mean accumulation

    h_s[...] = h
    c_s[...] = c

    @pl.when(bt == nbt - 1)
    def _finalize():
        mean_ref[...] = mean_ref[...] * inv_t


def _pick_tt(t_len, tt_max=8):
    """Largest divisor of t_len <= tt_max, preferring >= 2 grid steps."""
    divs = [d for d in range(1, tt_max + 1) if t_len % d == 0]
    for d in reversed(divs):
        if t_len // d >= 2:
            return d
    return divs[-1]


def pallas_bilstm_layer(streams, w_ih, b, w_hh, *, seq_dtype=jnp.bfloat16):
    """One bidirectional LSTM layer as a single pallas_call.

    streams: list of time-major [T,B,d_i] arrays whose lane-concat is the layer input
             (1 array for the first layer, previous layer's (hf, hb) afterwards).
    w_ih:    [2*sum(d_i), 8H] bf16 merged input weights (gate-major interleaved cols).
    b:       [1, 8H] f32 merged bias (b_ih + b_hh folded).
    w_hh:    [2H, 8H] bf16 block-diagonal recurrent weights.
    Returns (hf_seq [T,B,H] bf16, hb_seq [T,B,H] bf16, time_mean [B,2H] f32).
    """
    t_len, bsz, _ = streams[0].shape
    d_tot = sum(int(s.shape[-1]) for s in streams)
    hidden = w_hh.shape[0] // 2
    h2, h8 = 2 * hidden, 8 * hidden
    assert w_ih.shape[0] == 2 * d_tot, (w_ih.shape, d_tot)

    tt = _pick_tt(t_len)
    nb = t_len // tt

    fwd3 = lambda i: (i, 0, 0)
    rev3 = lambda i: (nb - 1 - i, 0, 0)
    const = lambda i: (0, 0)

    in_specs = (
        [pl.BlockSpec((tt, bsz, int(s.shape[-1])), fwd3) for s in streams]
        + [pl.BlockSpec((tt, bsz, int(s.shape[-1])), rev3) for s in streams]
        + [pl.BlockSpec((2 * d_tot, h8), const),      # W_ih (resident)
           pl.BlockSpec((1, h8), const),              # bias (resident)
           pl.BlockSpec((h2, h8), const)]             # W_hh (resident)
    )
    out_specs = [
        pl.BlockSpec((tt, bsz, hidden), fwd3),
        pl.BlockSpec((tt, bsz, hidden), rev3),
        pl.BlockSpec((bsz, h2), const),               # mean: VMEM-resident accumulator
    ]
    out_shape = [
        jax.ShapeDtypeStruct((t_len, bsz, hidden), seq_dtype),
        jax.ShapeDtypeStruct((t_len, bsz, hidden), seq_dtype),
        jax.ShapeDtypeStruct((bsz, h2), jnp.float32),
    ]
    scratch_shapes = [
        pltpu.VMEM((tt * bsz, 2 * d_tot), jnp.float32),   # xcat (block input, both dirs)
        pltpu.VMEM((tt * bsz, h8), jnp.float32),          # block input gates
        pltpu.VMEM((bsz, h2), jnp.float32),               # h state [hf | hb]
        pltpu.VMEM((bsz, h2), jnp.float32),               # c state [cf | cb]
    ]
    kernel = functools.partial(
        _bilstm_layer_kernel, n_streams=len(streams), hidden=hidden, tt=tt,
        bsz=bsz, inv_t=1.0 / t_len, seq_dtype=seq_dtype)

    hf, hb, mean = pl.pallas_call(
        kernel,
        grid=(nb,),
        in_specs=in_specs,
        out_specs=out_specs,
        out_shape=out_shape,
        scratch_shapes=scratch_shapes,
        compiler_params=pltpu.CompilerParams(
            dimension_semantics=("arbitrary",),       # recurrence carries across steps
            vmem_limit_bytes=_vmem_limit_bytes()),
    )(*streams, *streams, w_ih, b, w_hh)
    return hf, hb, mean


# ------------------------------- model glue --------------------------------
def _run_stack(streams, layers):
    mean = None
    for lp in layers:
        hf, hb, mean = pallas_bilstm_layer(streams, lp["w_ih"], lp["b"], lp["w_hh"])
        streams = [hf, hb]          # next layer consumes both directions, no concat
    return streams, mean


def bilstm_encoder_forward(params, x_ids):
    """x_ids: [B, T] int32 token ids -> [B, 1, 2*out_dim] (eval mode)."""
    # TODO(synk): embedding lookup is a ragged integer gather; kept in plain JAX.
    emd = jnp.take(params["embedding"], x_ids, axis=0)          # [B, T, E]
    x = jnp.transpose(emd, (1, 0, 2))                           # time-major [T, B, E]

    streams, _ = _run_stack([x], params["lstm1"])               # dropout1 = identity
    _, mean = _run_stack(streams, params["lstm2"])              # dropout2 = identity
    return mean[:, None, :]                                     # [B, 1, 2*out_dim]


# --------------------------- deterministic init -----------------------------
class _KeyGen:
    def __init__(self, key):
        self.key = key

    def __call__(self):
        self.key, sub = jax.random.split(self.key)
        return sub


def _interleave_gates(m_f, m_b, hidden):
    """[..., 4H] x2 -> [..., 8H], columns [i_f i_b f_f f_b g_f g_b o_f o_b]."""
    lead = m_f.shape[:-1]
    f = m_f.reshape(lead + (4, 1, hidden))
    b = m_b.reshape(lead + (4, 1, hidden))
    return jnp.concatenate([f, b], axis=-2).reshape(lead + (8 * hidden,))


def _make_layer(kg, d_in, hidden):
    k = 1.0 / math.sqrt(hidden)
    u = lambda shape: jax.random.uniform(kg(), shape, jnp.float32, -k, k)
    w_ih_f, w_ih_b = u((d_in, 4 * hidden)), u((d_in, 4 * hidden))
    w_hh_f, w_hh_b = u((hidden, 4 * hidden)), u((hidden, 4 * hidden))
    b_f = u((4 * hidden,)) + u((4 * hidden,))      # b_ih + b_hh folded
    b_b = u((4 * hidden,)) + u((4 * hidden,))
    zi, zh = jnp.zeros_like(w_ih_f), jnp.zeros_like(w_hh_f)
    # rows [0:d_in] drive only forward-gate columns, rows [d_in:2d_in] only backward
    w_ih = jnp.concatenate([_interleave_gates(w_ih_f, zi, hidden),
                            _interleave_gates(zi, w_ih_b, hidden)], axis=0)
    # block-diagonal recurrent weights on the merged [hf | hb] state
    w_hh = jnp.concatenate([_interleave_gates(w_hh_f, zh, hidden),
                            _interleave_gates(zh, w_hh_b, hidden)], axis=0)
    bias = _interleave_gates(b_f, b_b, hidden).reshape(1, 8 * hidden)
    return {"w_ih": w_ih.astype(jnp.bfloat16),      # pre-cast once (bf16 MXU feed)
            "b": bias.astype(jnp.float32),
            "w_hh": w_hh.astype(jnp.bfloat16)}


def init_params(key, vocab_size, embedding_dim, hidden_dim, out_dim, n_layers):
    kg = _KeyGen(key)

    def stack(d_in, hidden, n):
        layers, d = [], d_in
        for _ in range(n):
            layers.append(_make_layer(kg, d, hidden))
            d = 2 * hidden
        return layers

    return {
        "embedding": jax.random.normal(kg(), (vocab_size, embedding_dim), jnp.float32),
        "lstm1": stack(embedding_dim, hidden_dim * 2, n_layers),
        "lstm2": stack(hidden_dim * 4, out_dim, n_layers),   # input = bi lstm1 output
    }


# ---------------------------------- main ------------------------------------
if __name__ == "__main__":
    vocab_size, embedding_dim, hidden_dim, out_dim = 50, 32, 16, 32
    n_layers = 2              # dropout is identity in eval mode
    B, T = 2, 8

    key = jax.random.PRNGKey(0)
    kp, kx = jax.random.split(key)

    params = init_params(kp, vocab_size, embedding_dim, hidden_dim, out_dim, n_layers)
    x_ids = jax.random.randint(kx, (B, T), 0, vocab_size, dtype=jnp.int32)

    fwd = jax.jit(bilstm_encoder_forward)
    out = jax.block_until_ready(fwd(params, x_ids))

    assert out.shape == (B, 1, 2 * out_dim), out.shape
    assert bool(jnp.all(jnp.isfinite(out)))
    print("KERNEL_OK")
</pallas_src>

<mosaic_0001>
module attributes {stable_mosaic.version = 11 : i64} {
  func.func @_bilstm_layer_kernel(%arg0: i32, %arg1: memref<4x2x32xbf16, #tpu.memory_space<vmem>>, %arg2: memref<4x2x32xbf16, #tpu.memory_space<vmem>>, %arg3: memref<4x2x32xbf16, #tpu.memory_space<vmem>>, %arg4: memref<4x2x32xbf16, #tpu.memory_space<vmem>>, %arg5: memref<128x256xbf16, #tpu.memory_space<vmem>>, %arg6: memref<1x256xf32, #tpu.memory_space<vmem>>, %arg7: memref<64x256xbf16, #tpu.memory_space<vmem>>, %arg8: memref<4x2x32xbf16, #tpu.memory_space<vmem>>, %arg9: memref<4x2x32xbf16, #tpu.memory_space<vmem>>, %arg10: memref<2x64xf32, #tpu.memory_space<vmem>>, %arg11: memref<8x128xf32, #tpu.memory_space<vmem>>, %arg12: memref<8x256xf32, #tpu.memory_space<vmem>>, %arg13: memref<2x64xf32, #tpu.memory_space<vmem>>, %arg14: memref<2x64xf32, #tpu.memory_space<vmem>>) attributes {dimension_semantics = [#tpu.dimension_semantics<arbitrary>], iteration_bounds = array<i64: 2>, scalar_prefetch = 0 : i64, scratch_operands = 4 : i64, tpu.core_type = #tpu.core_type<tc>, window_params = [{transform_indices = @transform_0, window_bounds = array<i64: 4, 2, 32>}, {transform_indices = @transform_1, window_bounds = array<i64: 4, 2, 32>}, {transform_indices = @transform_2, window_bounds = array<i64: 4, 2, 32>}, {transform_indices = @transform_3, window_bounds = array<i64: 4, 2, 32>}, {pipeline_mode = #tpu.pipeline_mode<synchronous>, transform_indices = @transform_4, window_bounds = array<i64: 128, 256>}, {pipeline_mode = #tpu.pipeline_mode<synchronous>, transform_indices = @transform_5, window_bounds = array<i64: 1, 256>}, {pipeline_mode = #tpu.pipeline_mode<synchronous>, transform_indices = @transform_6, window_bounds = array<i64: 64, 256>}, {transform_indices = @transform_7, window_bounds = array<i64: 4, 2, 32>}, {transform_indices = @transform_8, window_bounds = array<i64: 4, 2, 32>}, {pipeline_mode = #tpu.pipeline_mode<synchronous>, transform_indices = @transform_9, window_bounds = array<i64: 2, 64>}]} {
    %c0_i32 = arith.constant 0 : i32
    %0 = arith.cmpi eq, %arg0, %c0_i32 : i32
    %1 = arith.extui %0 : i1 to i32
    %c0_i32_0 = arith.constant 0 : i32
    %2 = arith.cmpi ne, %1, %c0_i32_0 : i32
    scf.if %2 {
      %cst_161 = arith.constant 0.000000e+00 : f32
      %248 = vector.broadcast %cst_161 : f32 to vector<2x64xf32>
      %c0_162 = arith.constant 0 : index
      %c0_163 = arith.constant 0 : index
      %249 = vector.load %arg13[%c0_162, %c0_163] : memref<2x64xf32, #tpu.memory_space<vmem>>, vector<2x64xf32>
      tpu.vector_store %arg13[%c0_162, %c0_163], %248 {strides = array<i32>} : memref<2x64xf32, #tpu.memory_space<vmem>>, vector<2x64xf32>,
      %cst_164 = arith.constant 0.000000e+00 : f32
      %250 = vector.broadcast %cst_164 : f32 to vector<2x64xf32>
      %c0_165 = arith.constant 0 : index
      %c0_166 = arith.constant 0 : index
      %251 = vector.load %arg14[%c0_165, %c0_166] : memref<2x64xf32, #tpu.memory_space<vmem>>, vector<2x64xf32>
      tpu.vector_store %arg14[%c0_165, %c0_166], %250 {strides = array<i32>} : memref<2x64xf32, #tpu.memory_space<vmem>>, vector<2x64xf32>,
      %cst_167 = arith.constant 0.000000e+00 : f32
      %252 = vector.broadcast %cst_167 : f32 to vector<2x64xf32>
      %c0_168 = arith.constant 0 : index
      %c0_169 = arith.constant 0 : index
      %253 = vector.load %arg10[%c0_168, %c0_169] : memref<2x64xf32, #tpu.memory_space<vmem>>, vector<2x64xf32>
      tpu.vector_store %arg10[%c0_168, %c0_169], %252 {strides = array<i32>} : memref<2x64xf32, #tpu.memory_space<vmem>>, vector<2x64xf32>,
    } else {
    }
    %c0 = arith.constant 0 : index
    %c0_1 = arith.constant 0 : index
    %c0_2 = arith.constant 0 : index
    %3 = vector.load %arg1[%c0, %c0_1, %c0_2] : memref<4x2x32xbf16, #tpu.memory_space<vmem>>, vector<1x2x32xbf16>
    %4 = vector.shape_cast %3 : vector<1x2x32xbf16> to vector<2x32xbf16>
    %5 = arith.extf %4 : vector<2x32xbf16> to vector<2x32xf32>
    %c0_3 = arith.constant 0 : index
    %c0_4 = arith.constant 0 : index
    %6 = vector.load %arg11[%c0_3, %c0_4] : memref<8x128xf32, #tpu.memory_space<vmem>>, vector<2x32xf32>
    tpu.vector_store %arg11[%c0_3, %c0_4], %5 {strides = array<i32>} : memref<8x128xf32, #tpu.memory_space<vmem>>, vector<2x32xf32>,
    %c1 = arith.constant 1 : index
    %c0_5 = arith.constant 0 : index
    %c0_6 = arith.constant 0 : index
    %7 = vector.load %arg1[%c1, %c0_5, %c0_6] : memref<4x2x32xbf16, #tpu.memory_space<vmem>>, vector<1x2x32xbf16>
    %8 = vector.shape_cast %7 : vector<1x2x32xbf16> to vector<2x32xbf16>
    %9 = arith.extf %8 : vector<2x32xbf16> to vector<2x32xf32>
    %c2 = arith.constant 2 : index
    %c0_7 = arith.constant 0 : index
    %10 = vector.load %arg11[%c2, %c0_7] : memref<8x128xf32, #tpu.memory_space<vmem>>, vector<2x32xf32>
    tpu.vector_store %arg11[%c2, %c0_7], %9 {strides = array<i32>} : memref<8x128xf32, #tpu.memory_space<vmem>>, vector<2x32xf32>,
    %c2_8 = arith.constant 2 : index
    %c0_9 = arith.constant 0 : index
    %c0_10 = arith.constant 0 : index
    %11 = vector.load %arg1[%c2_8, %c0_9, %c0_10] : memref<4x2x32xbf16, #tpu.memory_space<vmem>>, vector<1x2x32xbf16>
    %12 = vector.shape_cast %11 : vector<1x2x32xbf16> to vector<2x32xbf16>
    %13 = arith.extf %12 : vector<2x32xbf16> to vector<2x32xf32>
    %c4 = arith.constant 4 : index
    %c0_11 = arith.constant 0 : index
    %14 = vector.load %arg11[%c4, %c0_11] : memref<8x128xf32, #tpu.memory_space<vmem>>, vector<2x32xf32>
    tpu.vector_store %arg11[%c4, %c0_11], %13 {strides = array<i32>} : memref<8x128xf32, #tpu.memory_space<vmem>>, vector<2x32xf32>,
    %c3 = arith.constant 3 : index
    %c0_12 = arith.constant 0 : index
    %c0_13 = arith.constant 0 : index
    %15 = vector.load %arg1[%c3, %c0_12, %c0_13] : memref<4x2x32xbf16, #tpu.memory_space<vmem>>, vector<1x2x32xbf16>
    %16 = vector.shape_cast %15 : vector<1x2x32xbf16> to vector<2x32xbf16>
    %17 = arith.extf %16 : vector<2x32xbf16> to vector<2x32xf32>
    %c6 = arith.constant 6 : index
    %c0_14 = arith.constant 0 : index
    %18 = vector.load %arg11[%c6, %c0_14] : memref<8x128xf32, #tpu.memory_space<vmem>>, vector<2x32xf32>
    tpu.vector_store %arg11[%c6, %c0_14], %17 {strides = array<i32>} : memref<8x128xf32, #tpu.memory_space<vmem>>, vector<2x32xf32>,
    %c0_15 = arith.constant 0 : index
    %c0_16 = arith.constant 0 : index
    %c0_17 = arith.constant 0 : index
    %19 = vector.load %arg2[%c0_15, %c0_16, %c0_17] : memref<4x2x32xbf16, #tpu.memory_space<vmem>>, vector<1x2x32xbf16>
    %20 = vector.shape_cast %19 : vector<1x2x32xbf16> to vector<2x32xbf16>
    %21 = arith.extf %20 : vector<2x32xbf16> to vector<2x32xf32>
    %c0_18 = arith.constant 0 : index
    %c32 = arith.constant 32 : index
    %22 = vector.load %arg11[%c0_18, %c32] : memref<8x128xf32, #tpu.memory_space<vmem>>, vector<2x32xf32>
    tpu.vector_store %arg11[%c0_18, %c32], %21 {strides = array<i32>} : memref<8x128xf32, #tpu.memory_space<vmem>>, vector<2x32xf32>,
    %c1_19 = arith.constant 1 : index
    %c0_20 = arith.constant 0 : index
    %c0_21 = arith.constant 0 : index
    %23 = vector.load %arg2[%c1_19, %c0_20, %c0_21] : memref<4x2x32xbf16, #tpu.memory_space<vmem>>, vector<1x2x32xbf16>
    %24 = vector.shape_cast %23 : vector<1x2x32xbf16> to vector<2x32xbf16>
    %25 = arith.extf %24 : vector<2x32xbf16> to vector<2x32xf32>
    %c2_22 = arith.constant 2 : index
    %c32_23 = arith.constant 32 : index
    %26 = vector.load %arg11[%c2_22, %c32_23] : memref<8x128xf32, #tpu.memory_space<vmem>>, vector<2x32xf32>
    tpu.vector_store %arg11[%c2_22, %c32_23], %25 {strides = array<i32>} : memref<8x128xf32, #tpu.memory_space<vmem>>, vector<2x32xf32>,
    %c2_24 = arith.constant 2 : index
    %c0_25 = arith.constant 0 : index
    %c0_26 = arith.constant 0 : index
    %27 = vector.load %arg2[%c2_24, %c0_25, %c0_26] : memref<4x2x32xbf16, #tpu.memory_space<vmem>>, vector<1x2x32xbf16>
    %28 = vector.shape_cast %27 : vector<1x2x32xbf16> to vector<2x32xbf16>
    %29 = arith.extf %28 : vector<2x32xbf16> to vector<2x32xf32>
    %c4_27 = arith.constant 4 : index
    %c32_28 = arith.constant 32 : index
    %30 = vector.load %arg11[%c4_27, %c32_28] : memref<8x128xf32, #tpu.memory_space<vmem>>, vector<2x32xf32>
    tpu.vector_store %arg11[%c4_27, %c32_28], %29 {strides = array<i32>} : memref<8x128xf32, #tpu.memory_space<vmem>>, vector<2x32xf32>,
    %c3_29 = arith.constant 3 : index
    %c0_30 = arith.constant 0 : index
    %c0_31 = arith.constant 0 : index
    %31 = vector.load %arg2[%c3_29, %c0_30, %c0_31] : memref<4x2x32xbf16, #tpu.memory_space<vmem>>, vector<1x2x32xbf16>
    %32 = vector.shape_cast %31 : vector<1x2x32xbf16> to vector<2x32xbf16>
    %33 = arith.extf %32 : vector<2x32xbf16> to vector<2x32xf32>
    %c6_32 = arith.constant 6 : index
    %c32_33 = arith.constant 32 : index
    %34 = vector.load %arg11[%c6_32, %c32_33] : memref<8x128xf32, #tpu.memory_space<vmem>>, vector<2x32xf32>
    tpu.vector_store %arg11[%c6_32, %c32_33], %33 {strides = array<i32>} : memref<8x128xf32, #tpu.memory_space<vmem>>, vector<2x32xf32>,
    %c3_34 = arith.constant 3 : index
    %c0_35 = arith.constant 0 : index
    %c0_36 = arith.constant 0 : index
    %35 = vector.load %arg3[%c3_34, %c0_35, %c0_36] : memref<4x2x32xbf16, #tpu.memory_space<vmem>>, vector<1x2x32xbf16>
    %36 = vector.shape_cast %35 : vector<1x2x32xbf16> to vector<2x32xbf16>
    %37 = arith.extf %36 : vector<2x32xbf16> to vector<2x32xf32>
    %c0_37 = arith.constant 0 : index
    %c64 = arith.constant 64 : index
    %38 = vector.load %arg11[%c0_37, %c64] : memref<8x128xf32, #tpu.memory_space<vmem>>, vector<2x32xf32>
    tpu.vector_store %arg11[%c0_37, %c64], %37 {strides = array<i32>} : memref<8x128xf32, #tpu.memory_space<vmem>>, vector<2x32xf32>,
    %c2_38 = arith.constant 2 : index
    %c0_39 = arith.constant 0 : index
    %c0_40 = arith.constant 0 : index
    %39 = vector.load %arg3[%c2_38, %c0_39, %c0_40] : memref<4x2x32xbf16, #tpu.memory_space<vmem>>, vector<1x2x32xbf16>
    %40 = vector.shape_cast %39 : vector<1x2x32xbf16> to vector<2x32xbf16>
    %41 = arith.extf %40 : vector<2x32xbf16> to vector<2x32xf32>
    %c2_41 = arith.constant 2 : index
    %c64_42 = arith.constant 64 : index
    %42 = vector.load %arg11[%c2_41, %c64_42] : memref<8x128xf32, #tpu.memory_space<vmem>>, vector<2x32xf32>
    tpu.vector_store %arg11[%c2_41, %c64_42], %41 {strides = array<i32>} : memref<8x128xf32, #tpu.memory_space<vmem>>, vector<2x32xf32>,
    %c1_43 = arith.constant 1 : index
    %c0_44 = arith.constant 0 : index
    %c0_45 = arith.constant 0 : index
    %43 = vector.load %arg3[%c1_43, %c0_44, %c0_45] : memref<4x2x32xbf16, #tpu.memory_space<vmem>>, vector<1x2x32xbf16>
    %44 = vector.shape_cast %43 : vector<1x2x32xbf16> to vector<2x32xbf16>
    %45 = arith.extf %44 : vector<2x32xbf16> to vector<2x32xf32>
    %c4_46 = arith.constant 4 : index
    %c64_47 = arith.constant 64 : index
    %46 = vector.load %arg11[%c4_46, %c64_47] : memref<8x128xf32, #tpu.memory_space<vmem>>, vector<2x32xf32>
    tpu.vector_store %arg11[%c4_46, %c64_47], %45 {strides = array<i32>} : memref<8x128xf32, #tpu.memory_space<vmem>>, vector<2x32xf32>,
    %c0_48 = arith.constant 0 : index
    %c0_49 = arith.constant 0 : index
    %c0_50 = arith.constant 0 : index
    %47 = vector.load %arg3[%c0_48, %c0_49, %c0_50] : memref<4x2x32xbf16, #tpu.memory_space<vmem>>, vector<1x2x32xbf16>
    %48 = vector.shape_cast %47 : vector<1x2x32xbf16> to vector<2x32xbf16>
    %49 = arith.extf %48 : vector<2x32xbf16> to vector<2x32xf32>
    %c6_51 = arith.constant 6 : index
    %c64_52 = arith.constant 64 : index
    %50 = vector.load %arg11[%c6_51, %c64_52] : memref<8x128xf32, #tpu.memory_space<vmem>>, vector<2x32xf32>
    tpu.vector_store %arg11[%c6_51, %c64_52], %49 {strides = array<i32>} : memref<8x128xf32, #tpu.memory_space<vmem>>, vector<2x32xf32>,
    %c3_53 = arith.constant 3 : index
    %c0_54 = arith.constant 0 : index
    %c0_55 = arith.constant 0 : index
    %51 = vector.load %arg4[%c3_53, %c0_54, %c0_55] : memref<4x2x32xbf16, #tpu.memory_space<vmem>>, vector<1x2x32xbf16>
    %52 = vector.shape_cast %51 : vector<1x2x32xbf16> to vector<2x32xbf16>
    %53 = arith.extf %52 : vector<2x32xbf16> to vector<2x32xf32>
    %c0_56 = arith.constant 0 : index
    %c96 = arith.constant 96 : index
    %54 = vector.load %arg11[%c0_56, %c96] : memref<8x128xf32, #tpu.memory_space<vmem>>, vector<2x32xf32>
    tpu.vector_store %arg11[%c0_56, %c96], %53 {strides = array<i32>} : memref<8x128xf32, #tpu.memory_space<vmem>>, vector<2x32xf32>,
    %c2_57 = arith.constant 2 : index
    %c0_58 = arith.constant 0 : index
    %c0_59 = arith.constant 0 : index
    %55 = vector.load %arg4[%c2_57, %c0_58, %c0_59] : memref<4x2x32xbf16, #tpu.memory_space<vmem>>, vector<1x2x32xbf16>
    %56 = vector.shape_cast %55 : vector<1x2x32xbf16> to vector<2x32xbf16>
    %57 = arith.extf %56 : vector<2x32xbf16> to vector<2x32xf32>
    %c2_60 = arith.constant 2 : index
    %c96_61 = arith.constant 96 : index
    %58 = vector.load %arg11[%c2_60, %c96_61] : memref<8x128xf32, #tpu.memory_space<vmem>>, vector<2x32xf32>
    tpu.vector_store %arg11[%c2_60, %c96_61], %57 {strides = array<i32>} : memref<8x128xf32, #tpu.memory_space<vmem>>, vector<2x32xf32>,
    %c1_62 = arith.constant 1 : index
    %c0_63 = arith.constant 0 : index
    %c0_64 = arith.constant 0 : index
    %59 = vector.load %arg4[%c1_62, %c0_63, %c0_64] : memref<4x2x32xbf16, #tpu.memory_space<vmem>>, vector<1x2x32xbf16>
    %60 = vector.shape_cast %59 : vector<1x2x32xbf16> to vector<2x32xbf16>
    %61 = arith.extf %60 : vector<2x32xbf16> to vector<2x32xf32>
    %c4_65 = arith.constant 4 : index
    %c96_66 = arith.constant 96 : index
    %62 = vector.load %arg11[%c4_65, %c96_66] : memref<8x128xf32, #tpu.memory_space<vmem>>, vector<2x32xf32>
    tpu.vector_store %arg11[%c4_65, %c96_66], %61 {strides = array<i32>} : memref<8x128xf32, #tpu.memory_space<vmem>>, vector<2x32xf32>,
    %c0_67 = arith.constant 0 : index
    %c0_68 = arith.constant 0 : index
    %c0_69 = arith.constant 0 : index
    %63 = vector.load %arg4[%c0_67, %c0_68, %c0_69] : memref<4x2x32xbf16, #tpu.memory_space<vmem>>, vector<1x2x32xbf16>
    %64 = vector.shape_cast %63 : vector<1x2x32xbf16> to vector<2x32xbf16>
    %65 = arith.extf %64 : vector<2x32xbf16> to vector<2x32xf32>
    %c6_70 = arith.constant 6 : index
    %c96_71 = arith.constant 96 : index
    %66 = vector.load %arg11[%c6_70, %c96_71] : memref<8x128xf32, #tpu.memory_space<vmem>>, vector<2x32xf32>
    tpu.vector_store %arg11[%c6_70, %c96_71], %65 {strides = array<i32>} : memref<8x128xf32, #tpu.memory_space<vmem>>, vector<2x32xf32>,
    %c0_72 = arith.constant 0 : index
    %c0_73 = arith.constant 0 : index
    %67 = vector.load %arg11[%c0_72, %c0_73] : memref<8x128xf32, #tpu.memory_space<vmem>>, vector<8x128xf32>
    %68 = arith.truncf %67 : vector<8x128xf32> to vector<8x128xbf16>
    %c0_74 = arith.constant 0 : index
    %c0_75 = arith.constant 0 : index
    %69 = vector.load %arg5[%c0_74, %c0_75] : memref<128x256xbf16, #tpu.memory_space<vmem>>, vector<128x256xbf16>
    %cst = arith.constant dense<0.000000e+00> : vector<8x256xf32>
    %70 = tpu.matmul %68, %69, %cst {dimension_numbers = #tpu.dot_dimension_numbers<[1], [0], [0], [1], [0, 0, 1, 1], [], []>} : vector<8x128xbf16>, vector<128x256xbf16>, vector<8x256xf32> -> vector<8x256xf32>
    %c0_76 = arith.constant 0 : index
    %c0_77 = arith.constant 0 : index
    %71 = vector.load %arg6[%c0_76, %c0_77] : memref<1x256xf32, #tpu.memory_space<vmem>>, vector<1x256xf32>
    %72 = vector.broadcast %71 : vector<1x256xf32> to vector<8x256xf32>
    %73 = arith.addf %70, %72 : vector<8x256xf32>
    %c0_78 = arith.constant 0 : index
    %c0_79 = arith.constant 0 : index
    %74 = vector.load %arg12[%c0_78, %c0_79] : memref<8x256xf32, #tpu.memory_space<vmem>>, vector<8x256xf32>
    tpu.vector_store %arg12[%c0_78, %c0_79], %73 {strides = array<i32>} : memref<8x256xf32, #tpu.memory_space<vmem>>, vector<8x256xf32>,
    %75 = tpu.iota {dimensions = array<i32: 1>} : vector<1x256xi32>
    %c128_i32 = arith.constant 128 : i32
    %76 = vector.broadcast %c128_i32 : i32 to vector<1x256xi32>
    %77 = arith.cmpi sge, %75, %76 : vector<1x256xi32>
    %c192_i32 = arith.constant 192 : i32
    %78 = vector.broadcast %c192_i32 : i32 to vector<1x256xi32>
    %79 = arith.cmpi slt, %75, %78 : vector<1x256xi32>
    %80 = arith.andi %77, %79 : vector<1x256xi1>
    %c0_80 = arith.constant 0 : index
    %c0_81 = arith.constant 0 : index
    %81 = vector.load %arg13[%c0_80, %c0_81] : memref<2x64xf32, #tpu.memory_space<vmem>>, vector<2x64xf32>
    %c0_82 = arith.constant 0 : index
    %c0_83 = arith.constant 0 : index
    %82 = vector.load %arg14[%c0_82, %c0_83] : memref<2x64xf32, #tpu.memory_space<vmem>>, vector<2x64xf32>
    %c0_84 = arith.constant 0 : index
    %c0_85 = arith.constant 0 : index
    %83 = vector.load %arg12[%c0_84, %c0_85] : memref<8x256xf32, #tpu.memory_space<vmem>>, vector<2x256xf32>
    %84 = arith.truncf %81 : vector<2x64xf32> to vector<2x64xbf16>
    %c0_86 = arith.constant 0 : index
    %c0_87 = arith.constant 0 : index
    %85 = vector.load %arg7[%c0_86, %c0_87] : memref<64x256xbf16, #tpu.memory_space<vmem>>, vector<64x256xbf16>
    %cst_88 = arith.constant dense<0.000000e+00> : vector<2x256xf32>
    %86 = tpu.matmul %84, %85, %cst_88 {dimension_numbers = #tpu.dot_dimension_numbers<[1], [0], [0], [1], [0, 0, 1, 1], [], []>} : vector<2x64xbf16>, vector<64x256xbf16>, vector<2x256xf32> -> vector<2x256xf32>
    %87 = arith.addf %83, %86 : vector<2x256xf32>
    %cst_89 = arith.constant 5.000000e-01 : f32
    %88 = vector.broadcast %cst_89 : f32 to vector<2x256xf32>
    %89 = arith.mulf %88, %87 : vector<2x256xf32>
    %90 = vector.shape_cast %80 : vector<1x256xi1> to vector<1x256xi1>
    %91 = vector.broadcast %90 : vector<1x256xi1> to vector<2x256xi1>
    %92 = arith.select %91, %87, %89 : vector<2x256xi1>, vector<2x256xf32>
    %93 = math.tanh %92 : vector<2x256xf32>
    %cst_90 = arith.constant 5.000000e-01 : f32
    %94 = vector.broadcast %cst_90 : f32 to vector<2x256xf32>
    %95 = arith.mulf %94, %93 : vector<2x256xf32>
    %cst_91 = arith.constant 5.000000e-01 : f32
    %96 = vector.broadcast %cst_91 : f32 to vector<2x256xf32>
    %97 = arith.addf %95, %96 : vector<2x256xf32>
    %98 = vector.shape_cast %80 : vector<1x256xi1> to vector<1x256xi1>
    %99 = vector.broadcast %98 : vector<1x256xi1> to vector<2x256xi1>
    %100 = arith.select %99, %93, %97 : vector<2x256xi1>, vector<2x256xf32>
    %101 = vector.extract_strided_slice %100 {offsets = [0, 0], sizes = [2, 64], strides = [1, 1]} : vector<2x256xf32> to vector<2x64xf32>
    %102 = vector.extract_strided_slice %100 {offsets = [0, 64], sizes = [2, 64], strides = [1, 1]} : vector<2x256xf32> to vector<2x64xf32>
    %103 = vector.extract_strided_slice %100 {offsets = [0, 128], sizes = [2, 64], strides = [1, 1]} : vector<2x256xf32> to vector<2x64xf32>
    %104 = vector.extract_strided_slice %100 {offsets = [0, 192], sizes = [2, 64], strides = [1, 1]} : vector<2x256xf32> to vector<2x64xf32>
    %105 = arith.mulf %102, %82 : vector<2x64xf32>
    %106 = arith.mulf %101, %103 : vector<2x64xf32>
    %107 = arith.addf %105, %106 : vector<2x64xf32>
    %108 = math.tanh %107 : vector<2x64xf32>
    %109 = arith.mulf %104, %108 : vector<2x64xf32>
    %110 = vector.extract_strided_slice %109 {offsets = [0, 0], sizes = [2, 32], strides = [1, 1]} : vector<2x64xf32> to vector<2x32xf32>
    %111 = arith.truncf %110 : vector<2x32xf32> to vector<2x32xbf16>
    %c0_92 = arith.constant 0 : index
    %c0_93 = arith.constant 0 : index
    %c0_94 = arith.constant 0 : index
    %112 = vector.load %arg8[%c0_92, %c0_93, %c0_94] : memref<4x2x32xbf16, #tpu.memory_space<vmem>>, vector<1x2x32xbf16>
    %113 = vector.shape_cast %112 : vector<1x2x32xbf16> to vector<2x32xbf16>
    %114 = vector.shape_cast %111 : vector<2x32xbf16> to vector<1x2x32xbf16>
    tpu.vector_store %arg8[%c0_92, %c0_93, %c0_94], %114 {strides = array<i32>} : memref<4x2x32xbf16, #tpu.memory_space<vmem>>, vector<1x2x32xbf16>,
    %115 = vector.extract_strided_slice %109 {offsets = [0, 32], sizes = [2, 32], strides = [1, 1]} : vector<2x64xf32> to vector<2x32xf32>
    %116 = arith.truncf %115 : vector<2x32xf32> to vector<2x32xbf16>
    %c3_95 = arith.constant 3 : index
    %c0_96 = arith.constant 0 : index
    %c0_97 = arith.constant 0 : index
    %117 = vector.load %arg9[%c3_95, %c0_96, %c0_97] : memref<4x2x32xbf16, #tpu.memory_space<vmem>>, vector<1x2x32xbf16>
    %118 = vector.shape_cast %117 : vector<1x2x32xbf16> to vector<2x32xbf16>
    %119 = vector.shape_cast %116 : vector<2x32xbf16> to vector<1x2x32xbf16>
    tpu.vector_store %arg9[%c3_95, %c0_96, %c0_97], %119 {strides = array<i32>} : memref<4x2x32xbf16, #tpu.memory_space<vmem>>, vector<1x2x32xbf16>,
    %c0_98 = arith.constant 0 : index
    %c0_99 = arith.constant 0 : index
    %120 = vector.load %arg10[%c0_98, %c0_99] : memref<2x64xf32, #tpu.memory_space<vmem>>, vector<2x64xf32>
    %121 = arith.addf %120, %109 : vector<2x64xf32>
    %c0_100 = arith.constant 0 : index
    %c0_101 = arith.constant 0 : index
    %122 = vector.load %arg10[%c0_100, %c0_101] : memref<2x64xf32, #tpu.memory_space<vmem>>, vector<2x64xf32>
    tpu.vector_store %arg10[%c0_100, %c0_101], %121 {strides = array<i32>} : memref<2x64xf32, #tpu.memory_space<vmem>>, vector<2x64xf32>,
    %c2_102 = arith.constant 2 : index
    %c0_103 = arith.constant 0 : index
    %123 = vector.load %arg12[%c2_102, %c0_103] : memref<8x256xf32, #tpu.memory_space<vmem>>, vector<2x256xf32>
    %124 = arith.truncf %109 : vector<2x64xf32> to vector<2x64xbf16>
    %c0_104 = arith.constant 0 : index
    %c0_105 = arith.constant 0 : index
    %125 = vector.load %arg7[%c0_104, %c0_105] : memref<64x256xbf16, #tpu.memory_space<vmem>>, vector<64x256xbf16>
    %cst_106 = arith.constant dense<0.000000e+00> : vector<2x256xf32>
    %126 = tpu.matmul %124, %125, %cst_106 {dimension_numbers = #tpu.dot_dimension_numbers<[1], [0], [0], [1], [0, 0, 1, 1], [], []>} : vector<2x64xbf16>, vector<64x256xbf16>, vector<2x256xf32> -> vector<2x256xf32>
    %127 = arith.addf %123, %126 : vector<2x256xf32>
    %cst_107 = arith.constant 5.000000e-01 : f32
    %128 = vector.broadcast %cst_107 : f32 to vector<2x256xf32>
    %129 = arith.mulf %128, %127 : vector<2x256xf32>
    %130 = vector.shape_cast %80 : vector<1x256xi1> to vector<1x256xi1>
    %131 = vector.broadcast %130 : vector<1x256xi1> to vector<2x256xi1>
    %132 = arith.select %131, %127, %129 : vector<2x256xi1>, vector<2x256xf32>
    %133 = math.tanh %132 : vector<2x256xf32>
    %cst_108 = arith.constant 5.000000e-01 : f32
    %134 = vector.broadcast %cst_108 : f32 to vector<2x256xf32>
    %135 = arith.mulf %134, %133 : vector<2x256xf32>
    %cst_109 = arith.constant 5.000000e-01 : f32
    %136 = vector.broadcast %cst_109 : f32 to vector<2x256xf32>
    %137 = arith.addf %135, %136 : vector<2x256xf32>
    %138 = vector.shape_cast %80 : vector<1x256xi1> to vector<1x256xi1>
    %139 = vector.broadcast %138 : vector<1x256xi1> to vector<2x256xi1>
    %140 = arith.select %139, %133, %137 : vector<2x256xi1>, vector<2x256xf32>
    %141 = vector.extract_strided_slice %140 {offsets = [0, 0], sizes = [2, 64], strides = [1, 1]} : vector<2x256xf32> to vector<2x64xf32>
    %142 = vector.extract_strided_slice %140 {offsets = [0, 64], sizes = [2, 64], strides = [1, 1]} : vector<2x256xf32> to vector<2x64xf32>
    %143 = vector.extract_strided_slice %140 {offsets = [0, 128], sizes = [2, 64], strides = [1, 1]} : vector<2x256xf32> to vector<2x64xf32>
    %144 = vector.extract_strided_slice %140 {offsets = [0, 192], sizes = [2, 64], strides = [1, 1]} : vector<2x256xf32> to vector<2x64xf32>
    %145 = arith.mulf %142, %107 : vector<2x64xf32>
    %146 = arith.mulf %141, %143 : vector<2x64xf32>
    %147 = arith.addf %145, %146 : vector<2x64xf32>
    %148 = math.tanh %147 : vector<2x64xf32>
    %149 = arith.mulf %144, %148 : vector<2x64xf32>
    %150 = vector.extract_strided_slice %149 {offsets = [0, 0], sizes = [2, 32], strides = [1, 1]} : vector<2x64xf32> to vector<2x32xf32>
    %151 = arith.truncf %150 : vector<2x32xf32> to vector<2x32xbf16>
    %c1_110 = arith.constant 1 : index
    %c0_111 = arith.constant 0 : index
    %c0_112 = arith.constant 0 : index
    %152 = vector.load %arg8[%c1_110, %c0_111, %c0_112] : memref<4x2x32xbf16, #tpu.memory_space<vmem>>, vector<1x2x32xbf16>
    %153 = vector.shape_cast %152 : vector<1x2x32xbf16> to vector<2x32xbf16>
    %154 = vector.shape_cast %151 : vector<2x32xbf16> to vector<1x2x32xbf16>
    tpu.vector_store %arg8[%c1_110, %c0_111, %c0_112], %154 {strides = array<i32>} : memref<4x2x32xbf16, #tpu.memory_space<vmem>>, vector<1x2x32xbf16>,
    %155 = vector.extract_strided_slice %149 {offsets = [0, 32], sizes = [2, 32], strides = [1, 1]} : vector<2x64xf32> to vector<2x32xf32>
    %156 = arith.truncf %155 : vector<2x32xf32> to vector<2x32xbf16>
    %c2_113 = arith.constant 2 : index
    %c0_114 = arith.constant 0 : index
    %c0_115 = arith.constant 0 : index
    %157 = vector.load %arg9[%c2_113, %c0_114, %c0_115] : memref<4x2x32xbf16, #tpu.memory_space<vmem>>, vector<1x2x32xbf16>
    %158 = vector.shape_cast %157 : vector<1x2x32xbf16> to vector<2x32xbf16>
    %159 = vector.shape_cast %156 : vector<2x32xbf16> to vector<1x2x32xbf16>
    tpu.vector_store %arg9[%c2_113, %c0_114, %c0_115], %159 {strides = array<i32>} : memref<4x2x32xbf16, #tpu.memory_space<vmem>>, vector<1x2x32xbf16>,
    %c0_116 = arith.constant 0 : index
    %c0_117 = arith.constant 0 : index
    %160 = vector.load %arg10[%c0_116, %c0_117] : memref<2x64xf32, #tpu.memory_space<vmem>>, vector<2x64xf32>
    %161 = arith.addf %160, %149 : vector<2x64xf32>
    %c0_118 = arith.constant 0 : index
    %c0_119 = arith.constant 0 : index
    %162 = vector.load %arg10[%c0_118, %c0_119] : memref<2x64xf32, #tpu.memory_space<vmem>>, vector<2x64xf32>
    tpu.vector_store %arg10[%c0_118, %c0_119], %161 {strides = array<i32>} : memref<2x64xf32, #tpu.memory_space<vmem>>, vector<2x64xf32>,
    %c4_120 = arith.constant 4 : index
    %c0_121 = arith.constant 0 : index
    %163 = vector.load %arg12[%c4_120, %c0_121] : memref<8x256xf32, #tpu.memory_space<vmem>>, vector<2x256xf32>
    %164 = arith.truncf %149 : vector<2x64xf32> to vector<2x64xbf16>
    %c0_122 = arith.constant 0 : index
    %c0_123 = arith.constant 0 : index
    %165 = vector.load %arg7[%c0_122, %c0_123] : memref<64x256xbf16, #tpu.memory_space<vmem>>, vector<64x256xbf16>
    %cst_124 = arith.constant dense<0.000000e+00> : vector<2x256xf32>
    %166 = tpu.matmul %164, %165, %cst_124 {dimension_numbers = #tpu.dot_dimension_numbers<[1], [0], [0], [1], [0, 0, 1, 1], [], []>} : vector<2x64xbf16>, vector<64x256xbf16>, vector<2x256xf32> -> vector<2x256xf32>
    %167 = arith.addf %163, %166 : vector<2x256xf32>
    %cst_125 = arith.constant 5.000000e-01 : f32
    %168 = vector.broadcast %cst_125 : f32 to vector<2x256xf32>
    %169 = arith.mulf %168, %167 : vector<2x256xf32>
    %170 = vector.shape_cast %80 : vector<1x256xi1> to vector<1x256xi1>
    %171 = vector.broadcast %170 : vector<1x256xi1> to vector<2x256xi1>
    %172 = arith.select %171, %167, %169 : vector<2x256xi1>, vector<2x256xf32>
    %173 = math.tanh %172 : vector<2x256xf32>
    %cst_126 = arith.constant 5.000000e-01 : f32
    %174 = vector.broadcast %cst_126 : f32 to vector<2x256xf32>
    %175 = arith.mulf %174, %173 : vector<2x256xf32>
    %cst_127 = arith.constant 5.000000e-01 : f32
    %176 = vector.broadcast %cst_127 : f32 to vector<2x256xf32>
    %177 = arith.addf %175, %176 : vector<2x256xf32>
    %178 = vector.shape_cast %80 : vector<1x256xi1> to vector<1x256xi1>
    %179 = vector.broadcast %178 : vector<1x256xi1> to vector<2x256xi1>
    %180 = arith.select %179, %173, %177 : vector<2x256xi1>, vector<2x256xf32>
    %181 = vector.extract_strided_slice %180 {offsets = [0, 0], sizes = [2, 64], strides = [1, 1]} : vector<2x256xf32> to vector<2x64xf32>
    %182 = vector.extract_strided_slice %180 {offsets = [0, 64], sizes = [2, 64], strides = [1, 1]} : vector<2x256xf32> to vector<2x64xf32>
    %183 = vector.extract_strided_slice %180 {offsets = [0, 128], sizes = [2, 64], strides = [1, 1]} : vector<2x256xf32> to vector<2x64xf32>
    %184 = vector.extract_strided_slice %180 {offsets = [0, 192], sizes = [2, 64], strides = [1, 1]} : vector<2x256xf32> to vector<2x64xf32>
    %185 = arith.mulf %182, %147 : vector<2x64xf32>
    %186 = arith.mulf %181, %183 : vector<2x64xf32>
    %187 = arith.addf %185, %186 : vector<2x64xf32>
    %188 = math.tanh %187 : vector<2x64xf32>
    %189 = arith.mulf %184, %188 : vector<2x64xf32>
    %190 = vector.extract_strided_slice %189 {offsets = [0, 0], sizes = [2, 32], strides = [1, 1]} : vector<2x64xf32> to vector<2x32xf32>
    %191 = arith.truncf %190 : vector<2x32xf32> to vector<2x32xbf16>
    %c2_128 = arith.constant 2 : index
    %c0_129 = arith.constant 0 : index
    %c0_130 = arith.constant 0 : index
    %192 = vector.load %arg8[%c2_128, %c0_129, %c0_130] : memref<4x2x32xbf16, #tpu.memory_space<vmem>>, vector<1x2x32xbf16>
    %193 = vector.shape_cast %192 : vector<1x2x32xbf16> to vector<2x32xbf16>
    %194 = vector.shape_cast %191 : vector<2x32xbf16> to vector<1x2x32xbf16>
    tpu.vector_store %arg8[%c2_128, %c0_129, %c0_130], %194 {strides = array<i32>} : memref<4x2x32xbf16, #tpu.memory_space<vmem>>, vector<1x2x32xbf16>,
    %195 = vector.extract_strided_slice %189 {offsets = [0, 32], sizes = [2, 32], strides = [1, 1]} : vector<2x64xf32> to vector<2x32xf32>
    %196 = arith.truncf %195 : vector<2x32xf32> to vector<2x32xbf16>
    %c1_131 = arith.constant 1 : index
    %c0_132 = arith.constant 0 : index
    %c0_133 = arith.constant 0 : index
    %197 = vector.load %arg9[%c1_131, %c0_132, %c0_133] : memref<4x2x32xbf16, #tpu.memory_space<vmem>>, vector<1x2x32xbf16>
    %198 = vector.shape_cast %197 : vector<1x2x32xbf16> to vector<2x32xbf16>
    %199 = vector.shape_cast %196 : vector<2x32xbf16> to vector<1x2x32xbf16>
    tpu.vector_store %arg9[%c1_131, %c0_132, %c0_133], %199 {strides = array<i32>} : memref<4x2x32xbf16, #tpu.memory_space<vmem>>, vector<1x2x32xbf16>,
    %c0_134 = arith.constant 0 : index
    %c0_135 = arith.constant 0 : index
    %200 = vector.load %arg10[%c0_134, %c0_135] : memref<2x64xf32, #tpu.memory_space<vmem>>, vector<2x64xf32>
    %201 = arith.addf %200, %189 : vector<2x64xf32>
    %c0_136 = arith.constant 0 : index
    %c0_137 = arith.constant 0 : index
    %202 = vector.load %arg10[%c0_136, %c0_137] : memref<2x64xf32, #tpu.memory_space<vmem>>, vector<2x64xf32>
    tpu.vector_store %arg10[%c0_136, %c0_137], %201 {strides = array<i32>} : memref<2x64xf32, #tpu.memory_space<vmem>>, vector<2x64xf32>,
    %c6_138 = arith.constant 6 : index
    %c0_139 = arith.constant 0 : index
    %203 = vector.load %arg12[%c6_138, %c0_139] : memref<8x256xf32, #tpu.memory_space<vmem>>, vector<2x256xf32>
    %204 = arith.truncf %189 : vector<2x64xf32> to vector<2x64xbf16>
    %c0_140 = arith.constant 0 : index
    %c0_141 = arith.constant 0 : index
    %205 = vector.load %arg7[%c0_140, %c0_141] : memref<64x256xbf16, #tpu.memory_space<vmem>>, vector<64x256xbf16>
    %cst_142 = arith.constant dense<0.000000e+00> : vector<2x256xf32>
    %206 = tpu.matmul %204, %205, %cst_142 {dimension_numbers = #tpu.dot_dimension_numbers<[1], [0], [0], [1], [0, 0, 1, 1], [], []>} : vector<2x64xbf16>, vector<64x256xbf16>, vector<2x256xf32> -> vector<2x256xf32>
    %207 = arith.addf %203, %206 : vector<2x256xf32>
    %cst_143 = arith.constant 5.000000e-01 : f32
    %208 = vector.broadcast %cst_143 : f32 to vector<2x256xf32>
    %209 = arith.mulf %208, %207 : vector<2x256xf32>
    %210 = vector.shape_cast %80 : vector<1x256xi1> to vector<1x256xi1>
    %211 = vector.broadcast %210 : vector<1x256xi1> to vector<2x256xi1>
    %212 = arith.select %211, %207, %209 : vector<2x256xi1>, vector<2x256xf32>
    %213 = math.tanh %212 : vector<2x256xf32>
    %cst_144 = arith.constant 5.000000e-01 : f32
    %214 = vector.broadcast %cst_144 : f32 to vector<2x256xf32>
    %215 = arith.mulf %214, %213 : vector<2x256xf32>
    %cst_145 = arith.constant 5.000000e-01 : f32
    %216 = vector.broadcast %cst_145 : f32 to vector<2x256xf32>
    %217 = arith.addf %215, %216 : vector<2x256xf32>
    %218 = vector.shape_cast %80 : vector<1x256xi1> to vector<1x256xi1>
    %219 = vector.broadcast %218 : vector<1x256xi1> to vector<2x256xi1>
    %220 = arith.select %219, %213, %217 : vector<2x256xi1>, vector<2x256xf32>
    %221 = vector.extract_strided_slice %220 {offsets = [0, 0], sizes = [2, 64], strides = [1, 1]} : vector<2x256xf32> to vector<2x64xf32>
    %222 = vector.extract_strided_slice %220 {offsets = [0, 64], sizes = [2, 64], strides = [1, 1]} : vector<2x256xf32> to vector<2x64xf32>
    %223 = vector.extract_strided_slice %220 {offsets = [0, 128], sizes = [2, 64], strides = [1, 1]} : vector<2x256xf32> to vector<2x64xf32>
    %224 = vector.extract_strided_slice %220 {offsets = [0, 192], sizes = [2, 64], strides = [1, 1]} : vector<2x256xf32> to vector<2x64xf32>
    %225 = arith.mulf %222, %187 : vector<2x64xf32>
    %226 = arith.mulf %221, %223 : vector<2x64xf32>
    %227 = arith.addf %225, %226 : vector<2x64xf32>
    %228 = math.tanh %227 : vector<2x64xf32>
    %229 = arith.mulf %224, %228 : vector<2x64xf32>
    %230 = vector.extract_strided_slice %229 {offsets = [0, 0], sizes = [2, 32], strides = [1, 1]} : vector<2x64xf32> to vector<2x32xf32>
    %231 = arith.truncf %230 : vector<2x32xf32> to vector<2x32xbf16>
    %c3_146 = arith.constant 3 : index
    %c0_147 = arith.constant 0 : index
    %c0_148 = arith.constant 0 : index
    %232 = vector.load %arg8[%c3_146, %c0_147, %c0_148] : memref<4x2x32xbf16, #tpu.memory_space<vmem>>, vector<1x2x32xbf16>
    %233 = vector.shape_cast %232 : vector<1x2x32xbf16> to vector<2x32xbf16>
    %234 = vector.shape_cast %231 : vector<2x32xbf16> to vector<1x2x32xbf16>
    tpu.vector_store %arg8[%c3_146, %c0_147, %c0_148], %234 {strides = array<i32>} : memref<4x2x32xbf16, #tpu.memory_space<vmem>>, vector<1x2x32xbf16>,
    %235 = vector.extract_strided_slice %229 {offsets = [0, 32], sizes = [2, 32], strides = [1, 1]} : vector<2x64xf32> to vector<2x32xf32>
    %236 = arith.truncf %235 : vector<2x32xf32> to vector<2x32xbf16>
    %c0_149 = arith.constant 0 : index
    %c0_150 = arith.constant 0 : index
    %c0_151 = arith.constant 0 : index
    %237 = vector.load %arg9[%c0_149, %c0_150, %c0_151] : memref<4x2x32xbf16, #tpu.memory_space<vmem>>, vector<1x2x32xbf16>
    %238 = vector.shape_cast %237 : vector<1x2x32xbf16> to vector<2x32xbf16>
    %239 = vector.shape_cast %236 : vector<2x32xbf16> to vector<1x2x32xbf16>
    tpu.vector_store %arg9[%c0_149, %c0_150, %c0_151], %239 {strides = array<i32>} : memref<4x2x32xbf16, #tpu.memory_space<vmem>>, vector<1x2x32xbf16>,
    %c0_152 = arith.constant 0 : index
    %c0_153 = arith.constant 0 : index
    %240 = vector.load %arg10[%c0_152, %c0_153] : memref<2x64xf32, #tpu.memory_space<vmem>>, vector<2x64xf32>
    %241 = arith.addf %240, %229 : vector<2x64xf32>
    %c0_154 = arith.constant 0 : index
    %c0_155 = arith.constant 0 : index
    %242 = vector.load %arg10[%c0_154, %c0_155] : memref<2x64xf32, #tpu.memory_space<vmem>>, vector<2x64xf32>
    tpu.vector_store %arg10[%c0_154, %c0_155], %241 {strides = array<i32>} : memref<2x64xf32, #tpu.memory_space<vmem>>, vector<2x64xf32>,
    %c0_156 = arith.constant 0 : index
    %c0_157 = arith.constant 0 : index
    %243 = vector.load %arg13[%c0_156, %c0_157] : memref<2x64xf32, #tpu.memory_space<vmem>>, vector<2x64xf32>
    tpu.vector_store %arg13[%c0_156, %c0_157], %229 {strides = array<i32>} : memref<2x64xf32, #tpu.memory_space<vmem>>, vector<2x64xf32>,
    %c0_158 = arith.constant 0 : index
    %c0_159 = arith.constant 0 : index
    %244 = vector.load %arg14[%c0_158, %c0_159] : memref<2x64xf32, #tpu.memory_space<vmem>>, vector<2x64xf32>
    tpu.vector_store %arg14[%c0_158, %c0_159], %227 {strides = array<i32>} : memref<2x64xf32, #tpu.memory_space<vmem>>, vector<2x64xf32>,
    %c1_i32 = arith.constant 1 : i32
    %245 = arith.cmpi eq, %arg0, %c1_i32 : i32
    %246 = arith.extui %245 : i1 to i32
    %c0_i32_160 = arith.constant 0 : i32
    %247 = arith.cmpi ne, %246, %c0_i32_160 : i32
    scf.if %247 {
      %c0_161 = arith.constant 0 : index
      %c0_162 = arith.constant 0 : index
      %248 = vector.load %arg10[%c0_161, %c0_162] : memref<2x64xf32, #tpu.memory_space<vmem>>, vector<2x64xf32>
      %cst_163 = arith.constant 1.250000e-01 : f32
      %249 = vector.broadcast %cst_163 : f32 to vector<2x64xf32>
      %250 = arith.mulf %248, %249 : vector<2x64xf32>
      %c0_164 = arith.constant 0 : index
      %c0_165 = arith.constant 0 : index
      %251 = vector.load %arg10[%c0_164, %c0_165] : memref<2x64xf32, #tpu.memory_space<vmem>>, vector<2x64xf32>
      tpu.vector_store %arg10[%c0_164, %c0_165], %250 {strides = array<i32>} : memref<2x64xf32, #tpu.memory_space<vmem>>, vector<2x64xf32>,
    } else {
    }
    return
  }
  func.func @transform_0(%arg0: i32) -> (i32, i32, i32) {
    %c0_i32 = arith.constant 0 : i32
    %c0_i32_0 = arith.constant 0 : i32
    %c0_i32_1 = arith.constant 0 : i32
    return %arg0, %c0_i32, %c0_i32_0 : i32, i32, i32
  }
  func.func @transform_1(%arg0: i32) -> (i32, i32, i32) {
    %c0_i32 = arith.constant 0 : i32
    %c0_i32_0 = arith.constant 0 : i32
    %c0_i32_1 = arith.constant 0 : i32
    return %arg0, %c0_i32, %c0_i32_0 : i32, i32, i32
  }
  func.func @transform_2(%arg0: i32) -> (i32, i32, i32) {
    %c1_i32 = arith.constant 1 : i32
    %0 = arith.subi %c1_i32, %arg0 : i32
    %c0_i32 = arith.constant 0 : i32
    %c0_i32_0 = arith.constant 0 : i32
    %c0_i32_1 = arith.constant 0 : i32
    return %0, %c0_i32, %c0_i32_0 : i32, i32, i32
  }
  func.func @transform_3(%arg0: i32) -> (i32, i32, i32) {
    %c1_i32 = arith.constant 1 : i32
    %0 = arith.subi %c1_i32, %arg0 : i32
    %c0_i32 = arith.constant 0 : i32
    %c0_i32_0 = arith.constant 0 : i32
    %c0_i32_1 = arith.constant 0 : i32
    return %0, %c0_i32, %c0_i32_0 : i32, i32, i32
  }
  func.func @transform_4(%arg0: i32) -> (i32, i32) {
    %c0_i32 = arith.constant 0 : i32
    %c0_i32_0 = arith.constant 0 : i32
    %c0_i32_1 = arith.constant 0 : i32
    return %c0_i32, %c0_i32_0 : i32, i32
  }
  func.func @transform_5(%arg0: i32) -> (i32, i32) {
    %c0_i32 = arith.constant 0 : i32
    %c0_i32_0 = arith.constant 0 : i32
    %c0_i32_1 = arith.constant 0 : i32
    return %c0_i32, %c0_i32_0 : i32, i32
  }
  func.func @transform_6(%arg0: i32) -> (i32, i32) {
    %c0_i32 = arith.constant 0 : i32
    %c0_i32_0 = arith.constant 0 : i32
    %c0_i32_1 = arith.constant 0 : i32
    return %c0_i32, %c0_i32_0 : i32, i32
  }
  func.func @transform_7(%arg0: i32) -> (i32, i32, i32) {
    %c0_i32 = arith.constant 0 : i32
    %c0_i32_0 = arith.constant 0 : i32
    %c0_i32_1 = arith.constant 0 : i32
    return %arg0, %c0_i32, %c0_i32_0 : i32, i32, i32
  }
  func.func @transform_8(%arg0: i32) -> (i32, i32, i32) {
    %c1_i32 = arith.constant 1 : i32
    %0 = arith.subi %c1_i32, %arg0 : i32
    %c0_i32 = arith.constant 0 : i32
    %c0_i32_0 = arith.constant 0 : i32
    %c0_i32_1 = arith.constant 0 : i32
    return %0, %c0_i32, %c0_i32_0 : i32, i32, i32
  }
  func.func @transform_9(%arg0: i32) -> (i32, i32) {
    %c0_i32 = arith.constant 0 : i32
    %c0_i32_0 = arith.constant 0 : i32
    %c0_i32_1 = arith.constant 0 : i32
    return %c0_i32, %c0_i32_0 : i32, i32
  }
}

module attributes {stable_mosaic.version = 11 : i64} {
  func.func @_bilstm_layer_kernel(%arg0: i32, %arg1: memref<4x2x32xbf16, #tpu.memory_space<vmem>>, %arg2: memref<4x2x32xbf16, #tpu.memory_space<vmem>>, %arg3: memref<4x2x32xbf16, #tpu.memory_space<vmem>>, %arg4: memref<4x2x32xbf16, #tpu.memory_space<vmem>>, %arg5: memref<128x256xbf16, #tpu.memory_space<vmem>>, %arg6: memref<1x256xf32, #tpu.memory_space<vmem>>, %arg7: memref<64x256xbf16, #tpu.memory_space<vmem>>, %arg8: memref<4x2x32xbf16, #tpu.memory_space<vmem>>, %arg9: memref<4x2x32xbf16, #tpu.memory_space<vmem>>, %arg10: memref<2x64xf32, #tpu.memory_space<vmem>>, %arg11: memref<8x128xf32, #tpu.memory_space<vmem>>, %arg12: memref<8x256xf32, #tpu.memory_space<vmem>>, %arg13: memref<2x64xf32, #tpu.memory_space<vmem>>, %arg14: memref<2x64xf32, #tpu.memory_space<vmem>>) attributes {dimension_semantics = [#tpu.dimension_semantics<arbitrary>], iteration_bounds = array<i64: 2>, scalar_prefetch = 0 : i64, scratch_operands = 4 : i64, tpu.core_type = #tpu.core_type<tc>, window_params = [{transform_indices = @transform_0, window_bounds = array<i64: 4, 2, 32>}, {transform_indices = @transform_1, window_bounds = array<i64: 4, 2, 32>}, {transform_indices = @transform_2, window_bounds = array<i64: 4, 2, 32>}, {transform_indices = @transform_3, window_bounds = array<i64: 4, 2, 32>}, {pipeline_mode = #tpu.pipeline_mode<synchronous>, transform_indices = @transform_4, window_bounds = array<i64: 128, 256>}, {pipeline_mode = #tpu.pipeline_mode<synchronous>, transform_indices = @transform_5, window_bounds = array<i64: 1, 256>}, {pipeline_mode = #tpu.pipeline_mode<synchronous>, transform_indices = @transform_6, window_bounds = array<i64: 64, 256>}, {transform_indices = @transform_7, window_bounds = array<i64: 4, 2, 32>}, {transform_indices = @transform_8, window_bounds = array<i64: 4, 2, 32>}, {pipeline_mode = #tpu.pipeline_mode<synchronous>, transform_indices = @transform_9, window_bounds = array<i64: 2, 64>}]} {
    %c0_i32 = arith.constant 0 : i32
    %0 = arith.cmpi eq, %arg0, %c0_i32 : i32
    %1 = arith.extui %0 : i1 to i32
    %c0_i32_0 = arith.constant 0 : i32
    %2 = arith.cmpi ne, %1, %c0_i32_0 : i32
    scf.if %2 {
      %cst_161 = arith.constant 0.000000e+00 : f32
      %248 = vector.broadcast %cst_161 : f32 to vector<2x64xf32>
      %c0_162 = arith.constant 0 : index
      %c0_163 = arith.constant 0 : index
      %249 = vector.load %arg13[%c0_162, %c0_163] : memref<2x64xf32, #tpu.memory_space<vmem>>, vector<2x64xf32>
      tpu.vector_store %arg13[%c0_162, %c0_163], %248 {strides = array<i32>} : memref<2x64xf32, #tpu.memory_space<vmem>>, vector<2x64xf32>,
      %cst_164 = arith.constant 0.000000e+00 : f32
      %250 = vector.broadcast %cst_164 : f32 to vector<2x64xf32>
      %c0_165 = arith.constant 0 : index
      %c0_166 = arith.constant 0 : index
      %251 = vector.load %arg14[%c0_165, %c0_166] : memref<2x64xf32, #tpu.memory_space<vmem>>, vector<2x64xf32>
      tpu.vector_store %arg14[%c0_165, %c0_166], %250 {strides = array<i32>} : memref<2x64xf32, #tpu.memory_space<vmem>>, vector<2x64xf32>,
      %cst_167 = arith.constant 0.000000e+00 : f32
      %252 = vector.broadcast %cst_167 : f32 to vector<2x64xf32>
      %c0_168 = arith.constant 0 : index
      %c0_169 = arith.constant 0 : index
      %253 = vector.load %arg10[%c0_168, %c0_169] : memref<2x64xf32, #tpu.memory_space<vmem>>, vector<2x64xf32>
      tpu.vector_store %arg10[%c0_168, %c0_169], %252 {strides = array<i32>} : memref<2x64xf32, #tpu.memory_space<vmem>>, vector<2x64xf32>,
    } else {
    }
    %c0 = arith.constant 0 : index
    %c0_1 = arith.constant 0 : index
    %c0_2 = arith.constant 0 : index
    %3 = vector.load %arg1[%c0, %c0_1, %c0_2] : memref<4x2x32xbf16, #tpu.memory_space<vmem>>, vector<1x2x32xbf16>
    %4 = vector.shape_cast %3 : vector<1x2x32xbf16> to vector<2x32xbf16>
    %5 = arith.extf %4 : vector<2x32xbf16> to vector<2x32xf32>
    %c0_3 = arith.constant 0 : index
    %c0_4 = arith.constant 0 : index
    %6 = vector.load %arg11[%c0_3, %c0_4] : memref<8x128xf32, #tpu.memory_space<vmem>>, vector<2x32xf32>
    tpu.vector_store %arg11[%c0_3, %c0_4], %5 {strides = array<i32>} : memref<8x128xf32, #tpu.memory_space<vmem>>, vector<2x32xf32>,
    %c1 = arith.constant 1 : index
    %c0_5 = arith.constant 0 : index
    %c0_6 = arith.constant 0 : index
    %7 = vector.load %arg1[%c1, %c0_5, %c0_6] : memref<4x2x32xbf16, #tpu.memory_space<vmem>>, vector<1x2x32xbf16>
    %8 = vector.shape_cast %7 : vector<1x2x32xbf16> to vector<2x32xbf16>
    %9 = arith.extf %8 : vector<2x32xbf16> to vector<2x32xf32>
    %c2 = arith.constant 2 : index
    %c0_7 = arith.constant 0 : index
    %10 = vector.load %arg11[%c2, %c0_7] : memref<8x128xf32, #tpu.memory_space<vmem>>, vector<2x32xf32>
    tpu.vector_store %arg11[%c2, %c0_7], %9 {strides = array<i32>} : memref<8x128xf32, #tpu.memory_space<vmem>>, vector<2x32xf32>,
    %c2_8 = arith.constant 2 : index
    %c0_9 = arith.constant 0 : index
    %c0_10 = arith.constant 0 : index
    %11 = vector.load %arg1[%c2_8, %c0_9, %c0_10] : memref<4x2x32xbf16, #tpu.memory_space<vmem>>, vector<1x2x32xbf16>
    %12 = vector.shape_cast %11 : vector<1x2x32xbf16> to vector<2x32xbf16>
    %13 = arith.extf %12 : vector<2x32xbf16> to vector<2x32xf32>
    %c4 = arith.constant 4 : index
    %c0_11 = arith.constant 0 : index
    %14 = vector.load %arg11[%c4, %c0_11] : memref<8x128xf32, #tpu.memory_space<vmem>>, vector<2x32xf32>
    tpu.vector_store %arg11[%c4, %c0_11], %13 {strides = array<i32>} : memref<8x128xf32, #tpu.memory_space<vmem>>, vector<2x32xf32>,
    %c3 = arith.constant 3 : index
    %c0_12 = arith.constant 0 : index
    %c0_13 = arith.constant 0 : index
    %15 = vector.load %arg1[%c3, %c0_12, %c0_13] : memref<4x2x32xbf16, #tpu.memory_space<vmem>>, vector<1x2x32xbf16>
    %16 = vector.shape_cast %15 : vector<1x2x32xbf16> to vector<2x32xbf16>
    %17 = arith.extf %16 : vector<2x32xbf16> to vector<2x32xf32>
    %c6 = arith.constant 6 : index
    %c0_14 = arith.constant 0 : index
    %18 = vector.load %arg11[%c6, %c0_14] : memref<8x128xf32, #tpu.memory_space<vmem>>, vector<2x32xf32>
    tpu.vector_store %arg11[%c6, %c0_14], %17 {strides = array<i32>} : memref<8x128xf32, #tpu.memory_space<vmem>>, vector<2x32xf32>,
    %c0_15 = arith.constant 0 : index
    %c0_16 = arith.constant 0 : index
    %c0_17 = arith.constant 0 : index
    %19 = vector.load %arg2[%c0_15, %c0_16, %c0_17] : memref<4x2x32xbf16, #tpu.memory_space<vmem>>, vector<1x2x32xbf16>
    %20 = vector.shape_cast %19 : vector<1x2x32xbf16> to vector<2x32xbf16>
    %21 = arith.extf %20 : vector<2x32xbf16> to vector<2x32xf32>
    %c0_18 = arith.constant 0 : index
    %c32 = arith.constant 32 : index
    %22 = vector.load %arg11[%c0_18, %c32] : memref<8x128xf32, #tpu.memory_space<vmem>>, vector<2x32xf32>
    tpu.vector_store %arg11[%c0_18, %c32], %21 {strides = array<i32>} : memref<8x128xf32, #tpu.memory_space<vmem>>, vector<2x32xf32>,
    %c1_19 = arith.constant 1 : index
    %c0_20 = arith.constant 0 : index
    %c0_21 = arith.constant 0 : index
    %23 = vector.load %arg2[%c1_19, %c0_20, %c0_21] : memref<4x2x32xbf16, #tpu.memory_space<vmem>>, vector<1x2x32xbf16>
    %24 = vector.shape_cast %23 : vector<1x2x32xbf16> to vector<2x32xbf16>
    %25 = arith.extf %24 : vector<2x32xbf16> to vector<2x32xf32>
    %c2_22 = arith.constant 2 : index
    %c32_23 = arith.constant 32 : index
    %26 = vector.load %arg11[%c2_22, %c32_23] : memref<8x128xf32, #tpu.memory_space<vmem>>, vector<2x32xf32>
    tpu.vector_store %arg11[%c2_22, %c32_23], %25 {strides = array<i32>} : memref<8x128xf32, #tpu.memory_space<vmem>>, vector<2x32xf32>,
    %c2_24 = arith.constant 2 : index
    %c0_25 = arith.constant 0 : index
    %c0_26 = arith.constant 0 : index
    %27 = vector.load %arg2[%c2_24, %c0_25, %c0_26] : memref<4x2x32xbf16, #tpu.memory_space<vmem>>, vector<1x2x32xbf16>
    %28 = vector.shape_cast %27 : vector<1x2x32xbf16> to vector<2x32xbf16>
    %29 = arith.extf %28 : vector<2x32xbf16> to vector<2x32xf32>
    %c4_27 = arith.constant 4 : index
    %c32_28 = arith.constant 32 : index
    %30 = vector.load %arg11[%c4_27, %c32_28] : memref<8x128xf32, #tpu.memory_space<vmem>>, vector<2x32xf32>
    tpu.vector_store %arg11[%c4_27, %c32_28], %29 {strides = array<i32>} : memref<8x128xf32, #tpu.memory_space<vmem>>, vector<2x32xf32>,
    %c3_29 = arith.constant 3 : index
    %c0_30 = arith.constant 0 : index
    %c0_31 = arith.constant 0 : index
    %31 = vector.load %arg2[%c3_29, %c0_30, %c0_31] : memref<4x2x32xbf16, #tpu.memory_space<vmem>>, vector<1x2x32xbf16>
    %32 = vector.shape_cast %31 : vector<1x2x32xbf16> to vector<2x32xbf16>
    %33 = arith.extf %32 : vector<2x32xbf16> to vector<2x32xf32>
    %c6_32 = arith.constant 6 : index
    %c32_33 = arith.constant 32 : index
    %34 = vector.load %arg11[%c6_32, %c32_33] : memref<8x128xf32, #tpu.memory_space<vmem>>, vector<2x32xf32>
    tpu.vector_store %arg11[%c6_32, %c32_33], %33 {strides = array<i32>} : memref<8x128xf32, #tpu.memory_space<vmem>>, vector<2x32xf32>,
    %c3_34 = arith.constant 3 : index
    %c0_35 = arith.constant 0 : index
    %c0_36 = arith.constant 0 : index
    %35 = vector.load %arg3[%c3_34, %c0_35, %c0_36] : memref<4x2x32xbf16, #tpu.memory_space<vmem>>, vector<1x2x32xbf16>
    %36 = vector.shape_cast %35 : vector<1x2x32xbf16> to vector<2x32xbf16>
    %37 = arith.extf %36 : vector<2x32xbf16> to vector<2x32xf32>
    %c0_37 = arith.constant 0 : index
    %c64 = arith.constant 64 : index
    %38 = vector.load %arg11[%c0_37, %c64] : memref<8x128xf32, #tpu.memory_space<vmem>>, vector<2x32xf32>
    tpu.vector_store %arg11[%c0_37, %c64], %37 {strides = array<i32>} : memref<8x128xf32, #tpu.memory_space<vmem>>, vector<2x32xf32>,
    %c2_38 = arith.constant 2 : index
    %c0_39 = arith.constant 0 : index
    %c0_40 = arith.constant 0 : index
    %39 = vector.load %arg3[%c2_38, %c0_39, %c0_40] : memref<4x2x32xbf16, #tpu.memory_space<vmem>>, vector<1x2x32xbf16>
    %40 = vector.shape_cast %39 : vector<1x2x32xbf16> to vector<2x32xbf16>
    %41 = arith.extf %40 : vector<2x32xbf16> to vector<2x32xf32>
    %c2_41 = arith.constant 2 : index
    %c64_42 = arith.constant 64 : index
    %42 = vector.load %arg11[%c2_41, %c64_42] : memref<8x128xf32, #tpu.memory_space<vmem>>, vector<2x32xf32>
    tpu.vector_store %arg11[%c2_41, %c64_42], %41 {strides = array<i32>} : memref<8x128xf32, #tpu.memory_space<vmem>>, vector<2x32xf32>,
    %c1_43 = arith.constant 1 : index
    %c0_44 = arith.constant 0 : index
    %c0_45 = arith.constant 0 : index
    %43 = vector.load %arg3[%c1_43, %c0_44, %c0_45] : memref<4x2x32xbf16, #tpu.memory_space<vmem>>, vector<1x2x32xbf16>
    %44 = vector.shape_cast %43 : vector<1x2x32xbf16> to vector<2x32xbf16>
    %45 = arith.extf %44 : vector<2x32xbf16> to vector<2x32xf32>
    %c4_46 = arith.constant 4 : index
    %c64_47 = arith.constant 64 : index
    %46 = vector.load %arg11[%c4_46, %c64_47] : memref<8x128xf32, #tpu.memory_space<vmem>>, vector<2x32xf32>
    tpu.vector_store %arg11[%c4_46, %c64_47], %45 {strides = array<i32>} : memref<8x128xf32, #tpu.memory_space<vmem>>, vector<2x32xf32>,
    %c0_48 = arith.constant 0 : index
    %c0_49 = arith.constant 0 : index
    %c0_50 = arith.constant 0 : index
    %47 = vector.load %arg3[%c0_48, %c0_49, %c0_50] : memref<4x2x32xbf16, #tpu.memory_space<vmem>>, vector<1x2x32xbf16>
    %48 = vector.shape_cast %47 : vector<1x2x32xbf16> to vector<2x32xbf16>
    %49 = arith.extf %48 : vector<2x32xbf16> to vector<2x32xf32>
    %c6_51 = arith.constant 6 : index
    %c64_52 = arith.constant 64 : index
    %50 = vector.load %arg11[%c6_51, %c64_52] : memref<8x128xf32, #tpu.memory_space<vmem>>, vector<2x32xf32>
    tpu.vector_store %arg11[%c6_51, %c64_52], %49 {strides = array<i32>} : memref<8x128xf32, #tpu.memory_space<vmem>>, vector<2x32xf32>,
    %c3_53 = arith.constant 3 : index
    %c0_54 = arith.constant 0 : index
    %c0_55 = arith.constant 0 : index
    %51 = vector.load %arg4[%c3_53, %c0_54, %c0_55] : memref<4x2x32xbf16, #tpu.memory_space<vmem>>, vector<1x2x32xbf16>
    %52 = vector.shape_cast %51 : vector<1x2x32xbf16> to vector<2x32xbf16>
    %53 = arith.extf %52 : vector<2x32xbf16> to vector<2x32xf32>
    %c0_56 = arith.constant 0 : index
    %c96 = arith.constant 96 : index
    %54 = vector.load %arg11[%c0_56, %c96] : memref<8x128xf32, #tpu.memory_space<vmem>>, vector<2x32xf32>
    tpu.vector_store %arg11[%c0_56, %c96], %53 {strides = array<i32>} : memref<8x128xf32, #tpu.memory_space<vmem>>, vector<2x32xf32>,
    %c2_57 = arith.constant 2 : index
    %c0_58 = arith.constant 0 : index
    %c0_59 = arith.constant 0 : index
    %55 = vector.load %arg4[%c2_57, %c0_58, %c0_59] : memref<4x2x32xbf16, #tpu.memory_space<vmem>>, vector<1x2x32xbf16>
    %56 = vector.shape_cast %55 : vector<1x2x32xbf16> to vector<2x32xbf16>
    %57 = arith.extf %56 : vector<2x32xbf16> to vector<2x32xf32>
    %c2_60 = arith.constant 2 : index
    %c96_61 = arith.constant 96 : index
    %58 = vector.load %arg11[%c2_60, %c96_61] : memref<8x128xf32, #tpu.memory_space<vmem>>, vector<2x32xf32>
    tpu.vector_store %arg11[%c2_60, %c96_61], %57 {strides = array<i32>} : memref<8x128xf32, #tpu.memory_space<vmem>>, vector<2x32xf32>,
    %c1_62 = arith.constant 1 : index
    %c0_63 = arith.constant 0 : index
    %c0_64 = arith.constant 0 : index
    %59 = vector.load %arg4[%c1_62, %c0_63, %c0_64] : memref<4x2x32xbf16, #tpu.memory_space<vmem>>, vector<1x2x32xbf16>
    %60 = vector.shape_cast %59 : vector<1x2x32xbf16> to vector<2x32xbf16>
    %61 = arith.extf %60 : vector<2x32xbf16> to vector<2x32xf32>
    %c4_65 = arith.constant 4 : index
    %c96_66 = arith.constant 96 : index
    %62 = vector.load %arg11[%c4_65, %c96_66] : memref<8x128xf32, #tpu.memory_space<vmem>>, vector<2x32xf32>
    tpu.vector_store %arg11[%c4_65, %c96_66], %61 {strides = array<i32>} : memref<8x128xf32, #tpu.memory_space<vmem>>, vector<2x32xf32>,
    %c0_67 = arith.constant 0 : index
    %c0_68 = arith.constant 0 : index
    %c0_69 = arith.constant 0 : index
    %63 = vector.load %arg4[%c0_67, %c0_68, %c0_69] : memref<4x2x32xbf16, #tpu.memory_space<vmem>>, vector<1x2x32xbf16>
    %64 = vector.shape_cast %63 : vector<1x2x32xbf16> to vector<2x32xbf16>
    %65 = arith.extf %64 : vector<2x32xbf16> to vector<2x32xf32>
    %c6_70 = arith.constant 6 : index
    %c96_71 = arith.constant 96 : index
    %66 = vector.load %arg11[%c6_70, %c96_71] : memref<8x128xf32, #tpu.memory_space<vmem>>, vector<2x32xf32>
    tpu.vector_store %arg11[%c6_70, %c96_71], %65 {strides = array<i32>} : memref<8x128xf32, #tpu.memory_space<vmem>>, vector<2x32xf32>,
    %c0_72 = arith.constant 0 : index
    %c0_73 = arith.constant 0 : index
    %67 = vector.load %arg11[%c0_72, %c0_73] : memref<8x128xf32, #tpu.memory_space<vmem>>, vector<8x128xf32>
    %68 = arith.truncf %67 : vector<8x128xf32> to vector<8x128xbf16>
    %c0_74 = arith.constant 0 : index
    %c0_75 = arith.constant 0 : index
    %69 = vector.load %arg5[%c0_74, %c0_75] : memref<128x256xbf16, #tpu.memory_space<vmem>>, vector<128x256xbf16>
    %cst = arith.constant dense<0.000000e+00> : vector<8x256xf32>
    %70 = tpu.matmul %68, %69, %cst {dimension_numbers = #tpu.dot_dimension_numbers<[1], [0], [0], [1], [0, 0, 1, 1], [], []>} : vector<8x128xbf16>, vector<128x256xbf16>, vector<8x256xf32> -> vector<8x256xf32>
    %c0_76 = arith.constant 0 : index
    %c0_77 = arith.constant 0 : index
    %71 = vector.load %arg6[%c0_76, %c0_77] : memref<1x256xf32, #tpu.memory_space<vmem>>, vector<1x256xf32>
    %72 = vector.broadcast %71 : vector<1x256xf32> to vector<8x256xf32>
    %73 = arith.addf %70, %72 : vector<8x256xf32>
    %c0_78 = arith.constant 0 : index
    %c0_79 = arith.constant 0 : index
    %74 = vector.load %arg12[%c0_78, %c0_79] : memref<8x256xf32, #tpu.memory_space<vmem>>, vector<8x256xf32>
    tpu.vector_store %arg12[%c0_78, %c0_79], %73 {strides = array<i32>} : memref<8x256xf32, #tpu.memory_space<vmem>>, vector<8x256xf32>,
    %75 = tpu.iota {dimensions = array<i32: 1>} : vector<1x256xi32>
    %c128_i32 = arith.constant 128 : i32
    %76 = vector.broadcast %c128_i32 : i32 to vector<1x256xi32>
    %77 = arith.cmpi sge, %75, %76 : vector<1x256xi32>
    %c192_i32 = arith.constant 192 : i32
    %78 = vector.broadcast %c192_i32 : i32 to vector<1x256xi32>
    %79 = arith.cmpi slt, %75, %78 : vector<1x256xi32>
    %80 = arith.andi %77, %79 : vector<1x256xi1>
    %c0_80 = arith.constant 0 : index
    %c0_81 = arith.constant 0 : index
    %81 = vector.load %arg13[%c0_80, %c0_81] : memref<2x64xf32, #tpu.memory_space<vmem>>, vector<2x64xf32>
    %c0_82 = arith.constant 0 : index
    %c0_83 = arith.constant 0 : index
    %82 = vector.load %arg14[%c0_82, %c0_83] : memref<2x64xf32, #tpu.memory_space<vmem>>, vector<2x64xf32>
    %c0_84 = arith.constant 0 : index
    %c0_85 = arith.constant 0 : index
    %83 = vector.load %arg12[%c0_84, %c0_85] : memref<8x256xf32, #tpu.memory_space<vmem>>, vector<2x256xf32>
    %84 = arith.truncf %81 : vector<2x64xf32> to vector<2x64xbf16>
    %c0_86 = arith.constant 0 : index
    %c0_87 = arith.constant 0 : index
    %85 = vector.load %arg7[%c0_86, %c0_87] : memref<64x256xbf16, #tpu.memory_space<vmem>>, vector<64x256xbf16>
    %cst_88 = arith.constant dense<0.000000e+00> : vector<2x256xf32>
    %86 = tpu.matmul %84, %85, %cst_88 {dimension_numbers = #tpu.dot_dimension_numbers<[1], [0], [0], [1], [0, 0, 1, 1], [], []>} : vector<2x64xbf16>, vector<64x256xbf16>, vector<2x256xf32> -> vector<2x256xf32>
    %87 = arith.addf %83, %86 : vector<2x256xf32>
    %cst_89 = arith.constant 5.000000e-01 : f32
    %88 = vector.broadcast %cst_89 : f32 to vector<2x256xf32>
    %89 = arith.mulf %88, %87 : vector<2x256xf32>
    %90 = vector.shape_cast %80 : vector<1x256xi1> to vector<1x256xi1>
    %91 = vector.broadcast %90 : vector<1x256xi1> to vector<2x256xi1>
    %92 = arith.select %91, %87, %89 : vector<2x256xi1>, vector<2x256xf32>
    %93 = math.tanh %92 : vector<2x256xf32>
    %cst_90 = arith.constant 5.000000e-01 : f32
    %94 = vector.broadcast %cst_90 : f32 to vector<2x256xf32>
    %95 = arith.mulf %94, %93 : vector<2x256xf32>
    %cst_91 = arith.constant 5.000000e-01 : f32
    %96 = vector.broadcast %cst_91 : f32 to vector<2x256xf32>
    %97 = arith.addf %95, %96 : vector<2x256xf32>
    %98 = vector.shape_cast %80 : vector<1x256xi1> to vector<1x256xi1>
    %99 = vector.broadcast %98 : vector<1x256xi1> to vector<2x256xi1>
    %100 = arith.select %99, %93, %97 : vector<2x256xi1>, vector<2x256xf32>
    %101 = vector.extract_strided_slice %100 {offsets = [0, 0], sizes = [2, 64], strides = [1, 1]} : vector<2x256xf32> to vector<2x64xf32>
    %102 = vector.extract_strided_slice %100 {offsets = [0, 64], sizes = [2, 64], strides = [1, 1]} : vector<2x256xf32> to vector<2x64xf32>
    %103 = vector.extract_strided_slice %100 {offsets = [0, 128], sizes = [2, 64], strides = [1, 1]} : vector<2x256xf32> to vector<2x64xf32>
    %104 = vector.extract_strided_slice %100 {offsets = [0, 192], sizes = [2, 64], strides = [1, 1]} : vector<2x256xf32> to vector<2x64xf32>
    %105 = arith.mulf %102, %82 : vector<2x64xf32>
    %106 = arith.mulf %101, %103 : vector<2x64xf32>
    %107 = arith.addf %105, %106 : vector<2x64xf32>
    %108 = math.tanh %107 : vector<2x64xf32>
    %109 = arith.mulf %104, %108 : vector<2x64xf32>
    %110 = vector.extract_strided_slice %109 {offsets = [0, 0], sizes = [2, 32], strides = [1, 1]} : vector<2x64xf32> to vector<2x32xf32>
    %111 = arith.truncf %110 : vector<2x32xf32> to vector<2x32xbf16>
    %c0_92 = arith.constant 0 : index
    %c0_93 = arith.constant 0 : index
    %c0_94 = arith.constant 0 : index
    %112 = vector.load %arg8[%c0_92, %c0_93, %c0_94] : memref<4x2x32xbf16, #tpu.memory_space<vmem>>, vector<1x2x32xbf16>
    %113 = vector.shape_cast %112 : vector<1x2x32xbf16> to vector<2x32xbf16>
    %114 = vector.shape_cast %111 : vector<2x32xbf16> to vector<1x2x32xbf16>
    tpu.vector_store %arg8[%c0_92, %c0_93, %c0_94], %114 {strides = array<i32>} : memref<4x2x32xbf16, #tpu.memory_space<vmem>>, vector<1x2x32xbf16>,
    %115 = vector.extract_strided_slice %109 {offsets = [0, 32], sizes = [2, 32], strides = [1, 1]} : vector<2x64xf32> to vector<2x32xf32>
    %116 = arith.truncf %115 : vector<2x32xf32> to vector<2x32xbf16>
    %c3_95 = arith.constant 3 : index
    %c0_96 = arith.constant 0 : index
    %c0_97 = arith.constant 0 : index
    %117 = vector.load %arg9[%c3_95, %c0_96, %c0_97] : memref<4x2x32xbf16, #tpu.memory_space<vmem>>, vector<1x2x32xbf16>
    %118 = vector.shape_cast %117 : vector<1x2x32xbf16> to vector<2x32xbf16>
    %119 = vector.shape_cast %116 : vector<2x32xbf16> to vector<1x2x32xbf16>
    tpu.vector_store %arg9[%c3_95, %c0_96, %c0_97], %119 {strides = array<i32>} : memref<4x2x32xbf16, #tpu.memory_space<vmem>>, vector<1x2x32xbf16>,
    %c0_98 = arith.constant 0 : index
    %c0_99 = arith.constant 0 : index
    %120 = vector.load %arg10[%c0_98, %c0_99] : memref<2x64xf32, #tpu.memory_space<vmem>>, vector<2x64xf32>
    %121 = arith.addf %120, %109 : vector<2x64xf32>
    %c0_100 = arith.constant 0 : index
    %c0_101 = arith.constant 0 : index
    %122 = vector.load %arg10[%c0_100, %c0_101] : memref<2x64xf32, #tpu.memory_space<vmem>>, vector<2x64xf32>
    tpu.vector_store %arg10[%c0_100, %c0_101], %121 {strides = array<i32>} : memref<2x64xf32, #tpu.memory_space<vmem>>, vector<2x64xf32>,
    %c2_102 = arith.constant 2 : index
    %c0_103 = arith.constant 0 : index
    %123 = vector.load %arg12[%c2_102, %c0_103] : memref<8x256xf32, #tpu.memory_space<vmem>>, vector<2x256xf32>
    %124 = arith.truncf %109 : vector<2x64xf32> to vector<2x64xbf16>
    %c0_104 = arith.constant 0 : index
    %c0_105 = arith.constant 0 : index
    %125 = vector.load %arg7[%c0_104, %c0_105] : memref<64x256xbf16, #tpu.memory_space<vmem>>, vector<64x256xbf16>
    %cst_106 = arith.constant dense<0.000000e+00> : vector<2x256xf32>
    %126 = tpu.matmul %124, %125, %cst_106 {dimension_numbers = #tpu.dot_dimension_numbers<[1], [0], [0], [1], [0, 0, 1, 1], [], []>} : vector<2x64xbf16>, vector<64x256xbf16>, vector<2x256xf32> -> vector<2x256xf32>
    %127 = arith.addf %123, %126 : vector<2x256xf32>
    %cst_107 = arith.constant 5.000000e-01 : f32
    %128 = vector.broadcast %cst_107 : f32 to vector<2x256xf32>
    %129 = arith.mulf %128, %127 : vector<2x256xf32>
    %130 = vector.shape_cast %80 : vector<1x256xi1> to vector<1x256xi1>
    %131 = vector.broadcast %130 : vector<1x256xi1> to vector<2x256xi1>
    %132 = arith.select %131, %127, %129 : vector<2x256xi1>, vector<2x256xf32>
    %133 = math.tanh %132 : vector<2x256xf32>
    %cst_108 = arith.constant 5.000000e-01 : f32
    %134 = vector.broadcast %cst_108 : f32 to vector<2x256xf32>
    %135 = arith.mulf %134, %133 : vector<2x256xf32>
    %cst_109 = arith.constant 5.000000e-01 : f32
    %136 = vector.broadcast %cst_109 : f32 to vector<2x256xf32>
    %137 = arith.addf %135, %136 : vector<2x256xf32>
    %138 = vector.shape_cast %80 : vector<1x256xi1> to vector<1x256xi1>
    %139 = vector.broadcast %138 : vector<1x256xi1> to vector<2x256xi1>
    %140 = arith.select %139, %133, %137 : vector<2x256xi1>, vector<2x256xf32>
    %141 = vector.extract_strided_slice %140 {offsets = [0, 0], sizes = [2, 64], strides = [1, 1]} : vector<2x256xf32> to vector<2x64xf32>
    %142 = vector.extract_strided_slice %140 {offsets = [0, 64], sizes = [2, 64], strides = [1, 1]} : vector<2x256xf32> to vector<2x64xf32>
    %143 = vector.extract_strided_slice %140 {offsets = [0, 128], sizes = [2, 64], strides = [1, 1]} : vector<2x256xf32> to vector<2x64xf32>
    %144 = vector.extract_strided_slice %140 {offsets = [0, 192], sizes = [2, 64], strides = [1, 1]} : vector<2x256xf32> to vector<2x64xf32>
    %145 = arith.mulf %142, %107 : vector<2x64xf32>
    %146 = arith.mulf %141, %143 : vector<2x64xf32>
    %147 = arith.addf %145, %146 : vector<2x64xf32>
    %148 = math.tanh %147 : vector<2x64xf32>
    %149 = arith.mulf %144, %148 : vector<2x64xf32>
    %150 = vector.extract_strided_slice %149 {offsets = [0, 0], sizes = [2, 32], strides = [1, 1]} : vector<2x64xf32> to vector<2x32xf32>
    %151 = arith.truncf %150 : vector<2x32xf32> to vector<2x32xbf16>
    %c1_110 = arith.constant 1 : index
    %c0_111 = arith.constant 0 : index
    %c0_112 = arith.constant 0 : index
    %152 = vector.load %arg8[%c1_110, %c0_111, %c0_112] : memref<4x2x32xbf16, #tpu.memory_space<vmem>>, vector<1x2x32xbf16>
    %153 = vector.shape_cast %152 : vector<1x2x32xbf16> to vector<2x32xbf16>
    %154 = vector.shape_cast %151 : vector<2x32xbf16> to vector<1x2x32xbf16>
    tpu.vector_store %arg8[%c1_110, %c0_111, %c0_112], %154 {strides = array<i32>} : memref<4x2x32xbf16, #tpu.memory_space<vmem>>, vector<1x2x32xbf16>,
    %155 = vector.extract_strided_slice %149 {offsets = [0, 32], sizes = [2, 32], strides = [1, 1]} : vector<2x64xf32> to vector<2x32xf32>
    %156 = arith.truncf %155 : vector<2x32xf32> to vector<2x32xbf16>
    %c2_113 = arith.constant 2 : index
    %c0_114 = arith.constant 0 : index
    %c0_115 = arith.constant 0 : index
    %157 = vector.load %arg9[%c2_113, %c0_114, %c0_115] : memref<4x2x32xbf16, #tpu.memory_space<vmem>>, vector<1x2x32xbf16>
    %158 = vector.shape_cast %157 : vector<1x2x32xbf16> to vector<2x32xbf16>
    %159 = vector.shape_cast %156 : vector<2x32xbf16> to vector<1x2x32xbf16>
    tpu.vector_store %arg9[%c2_113, %c0_114, %c0_115], %159 {strides = array<i32>} : memref<4x2x32xbf16, #tpu.memory_space<vmem>>, vector<1x2x32xbf16>,
    %c0_116 = arith.constant 0 : index
    %c0_117 = arith.constant 0 : index
    %160 = vector.load %arg10[%c0_116, %c0_117] : memref<2x64xf32, #tpu.memory_space<vmem>>, vector<2x64xf32>
    %161 = arith.addf %160, %149 : vector<2x64xf32>
    %c0_118 = arith.constant 0 : index
    %c0_119 = arith.constant 0 : index
    %162 = vector.load %arg10[%c0_118, %c0_119] : memref<2x64xf32, #tpu.memory_space<vmem>>, vector<2x64xf32>
    tpu.vector_store %arg10[%c0_118, %c0_119], %161 {strides = array<i32>} : memref<2x64xf32, #tpu.memory_space<vmem>>, vector<2x64xf32>,
    %c4_120 = arith.constant 4 : index
    %c0_121 = arith.constant 0 : index
    %163 = vector.load %arg12[%c4_120, %c0_121] : memref<8x256xf32, #tpu.memory_space<vmem>>, vector<2x256xf32>
    %164 = arith.truncf %149 : vector<2x64xf32> to vector<2x64xbf16>
    %c0_122 = arith.constant 0 : index
    %c0_123 = arith.constant 0 : index
    %165 = vector.load %arg7[%c0_122, %c0_123] : memref<64x256xbf16, #tpu.memory_space<vmem>>, vector<64x256xbf16>
    %cst_124 = arith.constant dense<0.000000e+00> : vector<2x256xf32>
    %166 = tpu.matmul %164, %165, %cst_124 {dimension_numbers = #tpu.dot_dimension_numbers<[1], [0], [0], [1], [0, 0, 1, 1], [], []>} : vector<2x64xbf16>, vector<64x256xbf16>, vector<2x256xf32> -> vector<2x256xf32>
    %167 = arith.addf %163, %166 : vector<2x256xf32>
    %cst_125 = arith.constant 5.000000e-01 : f32
    %168 = vector.broadcast %cst_125 : f32 to vector<2x256xf32>
    %169 = arith.mulf %168, %167 : vector<2x256xf32>
    %170 = vector.shape_cast %80 : vector<1x256xi1> to vector<1x256xi1>
    %171 = vector.broadcast %170 : vector<1x256xi1> to vector<2x256xi1>
    %172 = arith.select %171, %167, %169 : vector<2x256xi1>, vector<2x256xf32>
    %173 = math.tanh %172 : vector<2x256xf32>
    %cst_126 = arith.constant 5.000000e-01 : f32
    %174 = vector.broadcast %cst_126 : f32 to vector<2x256xf32>
    %175 = arith.mulf %174, %173 : vector<2x256xf32>
    %cst_127 = arith.constant 5.000000e-01 : f32
    %176 = vector.broadcast %cst_127 : f32 to vector<2x256xf32>
    %177 = arith.addf %175, %176 : vector<2x256xf32>
    %178 = vector.shape_cast %80 : vector<1x256xi1> to vector<1x256xi1>
    %179 = vector.broadcast %178 : vector<1x256xi1> to vector<2x256xi1>
    %180 = arith.select %179, %173, %177 : vector<2x256xi1>, vector<2x256xf32>
    %181 = vector.extract_strided_slice %180 {offsets = [0, 0], sizes = [2, 64], strides = [1, 1]} : vector<2x256xf32> to vector<2x64xf32>
    %182 = vector.extract_strided_slice %180 {offsets = [0, 64], sizes = [2, 64], strides = [1, 1]} : vector<2x256xf32> to vector<2x64xf32>
    %183 = vector.extract_strided_slice %180 {offsets = [0, 128], sizes = [2, 64], strides = [1, 1]} : vector<2x256xf32> to vector<2x64xf32>
    %184 = vector.extract_strided_slice %180 {offsets = [0, 192], sizes = [2, 64], strides = [1, 1]} : vector<2x256xf32> to vector<2x64xf32>
    %185 = arith.mulf %182, %147 : vector<2x64xf32>
    %186 = arith.mulf %181, %183 : vector<2x64xf32>
    %187 = arith.addf %185, %186 : vector<2x64xf32>
    %188 = math.tanh %187 : vector<2x64xf32>
    %189 = arith.mulf %184, %188 : vector<2x64xf32>
    %190 = vector.extract_strided_slice %189 {offsets = [0, 0], sizes = [2, 32], strides = [1, 1]} : vector<2x64xf32> to vector<2x32xf32>
    %191 = arith.truncf %190 : vector<2x32xf32> to vector<2x32xbf16>
    %c2_128 = arith.constant 2 : index
    %c0_129 = arith.constant 0 : index
    %c0_130 = arith.constant 0 : index
    %192 = vector.load %arg8[%c2_128, %c0_129, %c0_130] : memref<4x2x32xbf16, #tpu.memory_space<vmem>>, vector<1x2x32xbf16>
    %193 = vector.shape_cast %192 : vector<1x2x32xbf16> to vector<2x32xbf16>
    %194 = vector.shape_cast %191 : vector<2x32xbf16> to vector<1x2x32xbf16>
    tpu.vector_store %arg8[%c2_128, %c0_129, %c0_130], %194 {strides = array<i32>} : memref<4x2x32xbf16, #tpu.memory_space<vmem>>, vector<1x2x32xbf16>,
    %195 = vector.extract_strided_slice %189 {offsets = [0, 32], sizes = [2, 32], strides = [1, 1]} : vector<2x64xf32> to vector<2x32xf32>
    %196 = arith.truncf %195 : vector<2x32xf32> to vector<2x32xbf16>
    %c1_131 = arith.constant 1 : index
    %c0_132 = arith.constant 0 : index
    %c0_133 = arith.constant 0 : index
    %197 = vector.load %arg9[%c1_131, %c0_132, %c0_133] : memref<4x2x32xbf16, #tpu.memory_space<vmem>>, vector<1x2x32xbf16>
    %198 = vector.shape_cast %197 : vector<1x2x32xbf16> to vector<2x32xbf16>
    %199 = vector.shape_cast %196 : vector<2x32xbf16> to vector<1x2x32xbf16>
    tpu.vector_store %arg9[%c1_131, %c0_132, %c0_133], %199 {strides = array<i32>} : memref<4x2x32xbf16, #tpu.memory_space<vmem>>, vector<1x2x32xbf16>,
    %c0_134 = arith.constant 0 : index
    %c0_135 = arith.constant 0 : index
    %200 = vector.load %arg10[%c0_134, %c0_135] : memref<2x64xf32, #tpu.memory_space<vmem>>, vector<2x64xf32>
    %201 = arith.addf %200, %189 : vector<2x64xf32>
    %c0_136 = arith.constant 0 : index
    %c0_137 = arith.constant 0 : index
    %202 = vector.load %arg10[%c0_136, %c0_137] : memref<2x64xf32, #tpu.memory_space<vmem>>, vector<2x64xf32>
    tpu.vector_store %arg10[%c0_136, %c0_137], %201 {strides = array<i32>} : memref<2x64xf32, #tpu.memory_space<vmem>>, vector<2x64xf32>,
    %c6_138 = arith.constant 6 : index
    %c0_139 = arith.constant 0 : index
    %203 = vector.load %arg12[%c6_138, %c0_139] : memref<8x256xf32, #tpu.memory_space<vmem>>, vector<2x256xf32>
    %204 = arith.truncf %189 : vector<2x64xf32> to vector<2x64xbf16>
    %c0_140 = arith.constant 0 : index
    %c0_141 = arith.constant 0 : index
    %205 = vector.load %arg7[%c0_140, %c0_141] : memref<64x256xbf16, #tpu.memory_space<vmem>>, vector<64x256xbf16>
    %cst_142 = arith.constant dense<0.000000e+00> : vector<2x256xf32>
    %206 = tpu.matmul %204, %205, %cst_142 {dimension_numbers = #tpu.dot_dimension_numbers<[1], [0], [0], [1], [0, 0, 1, 1], [], []>} : vector<2x64xbf16>, vector<64x256xbf16>, vector<2x256xf32> -> vector<2x256xf32>
    %207 = arith.addf %203, %206 : vector<2x256xf32>
    %cst_143 = arith.constant 5.000000e-01 : f32
    %208 = vector.broadcast %cst_143 : f32 to vector<2x256xf32>
    %209 = arith.mulf %208, %207 : vector<2x256xf32>
    %210 = vector.shape_cast %80 : vector<1x256xi1> to vector<1x256xi1>
    %211 = vector.broadcast %210 : vector<1x256xi1> to vector<2x256xi1>
    %212 = arith.select %211, %207, %209 : vector<2x256xi1>, vector<2x256xf32>
    %213 = math.tanh %212 : vector<2x256xf32>
    %cst_144 = arith.constant 5.000000e-01 : f32
    %214 = vector.broadcast %cst_144 : f32 to vector<2x256xf32>
    %215 = arith.mulf %214, %213 : vector<2x256xf32>
    %cst_145 = arith.constant 5.000000e-01 : f32
    %216 = vector.broadcast %cst_145 : f32 to vector<2x256xf32>
    %217 = arith.addf %215, %216 : vector<2x256xf32>
    %218 = vector.shape_cast %80 : vector<1x256xi1> to vector<1x256xi1>
    %219 = vector.broadcast %218 : vector<1x256xi1> to vector<2x256xi1>
    %220 = arith.select %219, %213, %217 : vector<2x256xi1>, vector<2x256xf32>
    %221 = vector.extract_strided_slice %220 {offsets = [0, 0], sizes = [2, 64], strides = [1, 1]} : vector<2x256xf32> to vector<2x64xf32>
    %222 = vector.extract_strided_slice %220 {offsets = [0, 64], sizes = [2, 64], strides = [1, 1]} : vector<2x256xf32> to vector<2x64xf32>
    %223 = vector.extract_strided_slice %220 {offsets = [0, 128], sizes = [2, 64], strides = [1, 1]} : vector<2x256xf32> to vector<2x64xf32>
    %224 = vector.extract_strided_slice %220 {offsets = [0, 192], sizes = [2, 64], strides = [1, 1]} : vector<2x256xf32> to vector<2x64xf32>
    %225 = arith.mulf %222, %187 : vector<2x64xf32>
    %226 = arith.mulf %221, %223 : vector<2x64xf32>
    %227 = arith.addf %225, %226 : vector<2x64xf32>
    %228 = math.tanh %227 : vector<2x64xf32>
    %229 = arith.mulf %224, %228 : vector<2x64xf32>
    %230 = vector.extract_strided_slice %229 {offsets = [0, 0], sizes = [2, 32], strides = [1, 1]} : vector<2x64xf32> to vector<2x32xf32>
    %231 = arith.truncf %230 : vector<2x32xf32> to vector<2x32xbf16>
    %c3_146 = arith.constant 3 : index
    %c0_147 = arith.constant 0 : index
    %c0_148 = arith.constant 0 : index
    %232 = vector.load %arg8[%c3_146, %c0_147, %c0_148] : memref<4x2x32xbf16, #tpu.memory_space<vmem>>, vector<1x2x32xbf16>
    %233 = vector.shape_cast %232 : vector<1x2x32xbf16> to vector<2x32xbf16>
    %234 = vector.shape_cast %231 : vector<2x32xbf16> to vector<1x2x32xbf16>
    tpu.vector_store %arg8[%c3_146, %c0_147, %c0_148], %234 {strides = array<i32>} : memref<4x2x32xbf16, #tpu.memory_space<vmem>>, vector<1x2x32xbf16>,
    %235 = vector.extract_strided_slice %229 {offsets = [0, 32], sizes = [2, 32], strides = [1, 1]} : vector<2x64xf32> to vector<2x32xf32>
    %236 = arith.truncf %235 : vector<2x32xf32> to vector<2x32xbf16>
    %c0_149 = arith.constant 0 : index
    %c0_150 = arith.constant 0 : index
    %c0_151 = arith.constant 0 : index
    %237 = vector.load %arg9[%c0_149, %c0_150, %c0_151] : memref<4x2x32xbf16, #tpu.memory_space<vmem>>, vector<1x2x32xbf16>
    %238 = vector.shape_cast %237 : vector<1x2x32xbf16> to vector<2x32xbf16>
    %239 = vector.shape_cast %236 : vector<2x32xbf16> to vector<1x2x32xbf16>
    tpu.vector_store %arg9[%c0_149, %c0_150, %c0_151], %239 {strides = array<i32>} : memref<4x2x32xbf16, #tpu.memory_space<vmem>>, vector<1x2x32xbf16>,
    %c0_152 = arith.constant 0 : index
    %c0_153 = arith.constant 0 : index
    %240 = vector.load %arg10[%c0_152, %c0_153] : memref<2x64xf32, #tpu.memory_space<vmem>>, vector<2x64xf32>
    %241 = arith.addf %240, %229 : vector<2x64xf32>
    %c0_154 = arith.constant 0 : index
    %c0_155 = arith.constant 0 : index
    %242 = vector.load %arg10[%c0_154, %c0_155] : memref<2x64xf32, #tpu.memory_space<vmem>>, vector<2x64xf32>
    tpu.vector_store %arg10[%c0_154, %c0_155], %241 {strides = array<i32>} : memref<2x64xf32, #tpu.memory_space<vmem>>, vector<2x64xf32>,
    %c0_156 = arith.constant 0 : index
    %c0_157 = arith.constant 0 : index
    %243 = vector.load %arg13[%c0_156, %c0_157] : memref<2x64xf32, #tpu.memory_space<vmem>>, vector<2x64xf32>
    tpu.vector_store %arg13[%c0_156, %c0_157], %229 {strides = array<i32>} : memref<2x64xf32, #tpu.memory_space<vmem>>, vector<2x64xf32>,
    %c0_158 = arith.constant 0 : index
    %c0_159 = arith.constant 0 : index
    %244 = vector.load %arg14[%c0_158, %c0_159] : memref<2x64xf32, #tpu.memory_space<vmem>>, vector<2x64xf32>
    tpu.vector_store %arg14[%c0_158, %c0_159], %227 {strides = array<i32>} : memref<2x64xf32, #tpu.memory_space<vmem>>, vector<2x64xf32>,
    %c1_i32 = arith.constant 1 : i32
    %245 = arith.cmpi eq, %arg0, %c1_i32 : i32
    %246 = arith.extui %245 : i1 to i32
    %c0_i32_160 = arith.constant 0 : i32
    %247 = arith.cmpi ne, %246, %c0_i32_160 : i32
    scf.if %247 {
      %c0_161 = arith.constant 0 : index
      %c0_162 = arith.constant 0 : index
      %248 = vector.load %arg10[%c0_161, %c0_162] : memref<2x64xf32, #tpu.memory_space<vmem>>, vector<2x64xf32>
      %cst_163 = arith.constant 1.250000e-01 : f32
      %249 = vector.broadcast %cst_163 : f32 to vector<2x64xf32>
      %250 = arith.mulf %248, %249 : vector<2x64xf32>
      %c0_164 = arith.constant 0 : index
      %c0_165 = arith.constant 0 : index
      %251 = vector.load %arg10[%c0_164, %c0_165] : memref<2x64xf32, #tpu.memory_space<vmem>>, vector<2x64xf32>
      tpu.vector_store %arg10[%c0_164, %c0_165], %250 {strides = array<i32>} : memref<2x64xf32, #tpu.memory_space<vmem>>, vector<2x64xf32>,
    } else {
    }
    return
  }
  func.func @transform_0(%arg0: i32) -> (i32, i32, i32) {
    %c0_i32 = arith.constant 0 : i32
    %c0_i32_0 = arith.constant 0 : i32
    %c0_i32_1 = arith.constant 0 : i32
    return %arg0, %c0_i32, %c0_i32_0 : i32, i32, i32
  }
  func.func @transform_1(%arg0: i32) -> (i32, i32, i32) {
    %c0_i32 = arith.constant 0 : i32
    %c0_i32_0 = arith.constant 0 : i32
    %c0_i32_1 = arith.constant 0 : i32
    return %arg0, %c0_i32, %c0_i32_0 : i32, i32, i32
  }
  func.func @transform_2(%arg0: i32) -> (i32, i32, i32) {
    %c1_i32 = arith.constant 1 : i32
    %0 = arith.subi %c1_i32, %arg0 : i32
    %c0_i32 = arith.constant 0 : i32
    %c0_i32_0 = arith.constant 0 : i32
    %c0_i32_1 = arith.constant 0 : i32
    return %0, %c0_i32, %c0_i32_0 : i32, i32, i32
  }
  func.func @transform_3(%arg0: i32) -> (i32, i32, i32) {
    %c1_i32 = arith.constant 1 : i32
    %0 = arith.subi %c1_i32, %arg0 : i32
    %c0_i32 = arith.constant 0 : i32
    %c0_i32_0 = arith.constant 0 : i32
    %c0_i32_1 = arith.constant 0 : i32
    return %0, %c0_i32, %c0_i32_0 : i32, i32, i32
  }
  func.func @transform_4(%arg0: i32) -> (i32, i32) {
    %c0_i32 = arith.constant 0 : i32
    %c0_i32_0 = arith.constant 0 : i32
    %c0_i32_1 = arith.constant 0 : i32
    return %c0_i32, %c0_i32_0 : i32, i32
  }
  func.func @transform_5(%arg0: i32) -> (i32, i32) {
    %c0_i32 = arith.constant 0 : i32
    %c0_i32_0 = arith.constant 0 : i32
    %c0_i32_1 = arith.constant 0 : i32
    return %c0_i32, %c0_i32_0 : i32, i32
  }
  func.func @transform_6(%arg0: i32) -> (i32, i32) {
    %c0_i32 = arith.constant 0 : i32
    %c0_i32_0 = arith.constant 0 : i32
    %c0_i32_1 = arith.constant 0 : i32
    return %c0_i32, %c0_i32_0 : i32, i32
  }
  func.func @transform_7(%arg0: i32) -> (i32, i32, i32) {
    %c0_i32 = arith.constant 0 : i32
    %c0_i32_0 = arith.constant 0 : i32
    %c0_i32_1 = arith.constant 0 : i32
    return %arg0, %c0_i32, %c0_i32_0 : i32, i32, i32
  }
  func.func @transform_8(%arg0: i32) -> (i32, i32, i32) {
    %c1_i32 = arith.constant 1 : i32
    %0 = arith.subi %c1_i32, %arg0 : i32
    %c0_i32 = arith.constant 0 : i32
    %c0_i32_0 = arith.constant 0 : i32
    %c0_i32_1 = arith.constant 0 : i32
    return %0, %c0_i32, %c0_i32_0 : i32, i32, i32
  }
  func.func @transform_9(%arg0: i32) -> (i32, i32) {
    %c0_i32 = arith.constant 0 : i32
    %c0_i32_0 = arith.constant 0 : i32
    %c0_i32_1 = arith.constant 0 : i32
    return %c0_i32, %c0_i32_0 : i32, i32
  }
}

module attributes {stable_mosaic.version = 11 : i64} {
  func.func @_bilstm_layer_kernel(%arg0: i32, %arg1: memref<4x2x32xf32, #tpu.memory_space<vmem>>, %arg2: memref<4x2x32xf32, #tpu.memory_space<vmem>>, %arg3: memref<64x256xbf16, #tpu.memory_space<vmem>>, %arg4: memref<1x256xf32, #tpu.memory_space<vmem>>, %arg5: memref<64x256xbf16, #tpu.memory_space<vmem>>, %arg6: memref<4x2x32xbf16, #tpu.memory_space<vmem>>, %arg7: memref<4x2x32xbf16, #tpu.memory_space<vmem>>, %arg8: memref<2x64xf32, #tpu.memory_space<vmem>>, %arg9: memref<8x64xf32, #tpu.memory_space<vmem>>, %arg10: memref<8x256xf32, #tpu.memory_space<vmem>>, %arg11: memref<2x64xf32, #tpu.memory_space<vmem>>, %arg12: memref<2x64xf32, #tpu.memory_space<vmem>>) attributes {dimension_semantics = [#tpu.dimension_semantics<arbitrary>], iteration_bounds = array<i64: 2>, scalar_prefetch = 0 : i64, scratch_operands = 4 : i64, tpu.core_type = #tpu.core_type<tc>, window_params = [{transform_indices = @transform_0, window_bounds = array<i64: 4, 2, 32>}, {transform_indices = @transform_1, window_bounds = array<i64: 4, 2, 32>}, {pipeline_mode = #tpu.pipeline_mode<synchronous>, transform_indices = @transform_2, window_bounds = array<i64: 64, 256>}, {pipeline_mode = #tpu.pipeline_mode<synchronous>, transform_indices = @transform_3, window_bounds = array<i64: 1, 256>}, {pipeline_mode = #tpu.pipeline_mode<synchronous>, transform_indices = @transform_4, window_bounds = array<i64: 64, 256>}, {transform_indices = @transform_5, window_bounds = array<i64: 4, 2, 32>}, {transform_indices = @transform_6, window_bounds = array<i64: 4, 2, 32>}, {pipeline_mode = #tpu.pipeline_mode<synchronous>, transform_indices = @transform_7, window_bounds = array<i64: 2, 64>}]} {
    %c0_i32 = arith.constant 0 : i32
    %0 = arith.cmpi eq, %arg0, %c0_i32 : i32
    %1 = arith.extui %0 : i1 to i32
    %c0_i32_0 = arith.constant 0 : i32
    %2 = arith.cmpi ne, %1, %c0_i32_0 : i32
    scf.if %2 {
      %cst_123 = arith.constant 0.000000e+00 : f32
      %208 = vector.broadcast %cst_123 : f32 to vector<2x64xf32>
      %c0_124 = arith.constant 0 : index
      %c0_125 = arith.constant 0 : index
      %209 = vector.load %arg11[%c0_124, %c0_125] : memref<2x64xf32, #tpu.memory_space<vmem>>, vector<2x64xf32>
      tpu.vector_store %arg11[%c0_124, %c0_125], %208 {strides = array<i32>} : memref<2x64xf32, #tpu.memory_space<vmem>>, vector<2x64xf32>,
      %cst_126 = arith.constant 0.000000e+00 : f32
      %210 = vector.broadcast %cst_126 : f32 to vector<2x64xf32>
      %c0_127 = arith.constant 0 : index
      %c0_128 = arith.constant 0 : index
      %211 = vector.load %arg12[%c0_127, %c0_128] : memref<2x64xf32, #tpu.memory_space<vmem>>, vector<2x64xf32>
      tpu.vector_store %arg12[%c0_127, %c0_128], %210 {strides = array<i32>} : memref<2x64xf32, #tpu.memory_space<vmem>>, vector<2x64xf32>,
      %cst_129 = arith.constant 0.000000e+00 : f32
      %212 = vector.broadcast %cst_129 : f32 to vector<2x64xf32>
      %c0_130 = arith.constant 0 : index
      %c0_131 = arith.constant 0 : index
      %213 = vector.load %arg8[%c0_130, %c0_131] : memref<2x64xf32, #tpu.memory_space<vmem>>, vector<2x64xf32>
      tpu.vector_store %arg8[%c0_130, %c0_131], %212 {strides = array<i32>} : memref<2x64xf32, #tpu.memory_space<vmem>>, vector<2x64xf32>,
    } else {
    }
    %c0 = arith.constant 0 : index
    %c0_1 = arith.constant 0 : index
    %c0_2 = arith.constant 0 : index
    %3 = vector.load %arg1[%c0, %c0_1, %c0_2] : memref<4x2x32xf32, #tpu.memory_space<vmem>>, vector<1x2x32xf32>
    %4 = vector.shape_cast %3 : vector<1x2x32xf32> to vector<2x32xf32>
    %c0_3 = arith.constant 0 : index
    %c0_4 = arith.constant 0 : index
    %5 = vector.load %arg9[%c0_3, %c0_4] : memref<8x64xf32, #tpu.memory_space<vmem>>, vector<2x32xf32>
    tpu.vector_store %arg9[%c0_3, %c0_4], %4 {strides = array<i32>} : memref<8x64xf32, #tpu.memory_space<vmem>>, vector<2x32xf32>,
    %c1 = arith.constant 1 : index
    %c0_5 = arith.constant 0 : index
    %c0_6 = arith.constant 0 : index
    %6 = vector.load %arg1[%c1, %c0_5, %c0_6] : memref<4x2x32xf32, #tpu.memory_space<vmem>>, vector<1x2x32xf32>
    %7 = vector.shape_cast %6 : vector<1x2x32xf32> to vector<2x32xf32>
    %c2 = arith.constant 2 : index
    %c0_7 = arith.constant 0 : index
    %8 = vector.load %arg9[%c2, %c0_7] : memref<8x64xf32, #tpu.memory_space<vmem>>, vector<2x32xf32>
    tpu.vector_store %arg9[%c2, %c0_7], %7 {strides = array<i32>} : memref<8x64xf32, #tpu.memory_space<vmem>>, vector<2x32xf32>,
    %c2_8 = arith.constant 2 : index
    %c0_9 = arith.constant 0 : index
    %c0_10 = arith.constant 0 : index
    %9 = vector.load %arg1[%c2_8, %c0_9, %c0_10] : memref<4x2x32xf32, #tpu.memory_space<vmem>>, vector<1x2x32xf32>
    %10 = vector.shape_cast %9 : vector<1x2x32xf32> to vector<2x32xf32>
    %c4 = arith.constant 4 : index
    %c0_11 = arith.constant 0 : index
    %11 = vector.load %arg9[%c4, %c0_11] : memref<8x64xf32, #tpu.memory_space<vmem>>, vector<2x32xf32>
    tpu.vector_store %arg9[%c4, %c0_11], %10 {strides = array<i32>} : memref<8x64xf32, #tpu.memory_space<vmem>>, vector<2x32xf32>,
    %c3 = arith.constant 3 : index
    %c0_12 = arith.constant 0 : index
    %c0_13 = arith.constant 0 : index
    %12 = vector.load %arg1[%c3, %c0_12, %c0_13] : memref<4x2x32xf32, #tpu.memory_space<vmem>>, vector<1x2x32xf32>
    %13 = vector.shape_cast %12 : vector<1x2x32xf32> to vector<2x32xf32>
    %c6 = arith.constant 6 : index
    %c0_14 = arith.constant 0 : index
    %14 = vector.load %arg9[%c6, %c0_14] : memref<8x64xf32, #tpu.memory_space<vmem>>, vector<2x32xf32>
    tpu.vector_store %arg9[%c6, %c0_14], %13 {strides = array<i32>} : memref<8x64xf32, #tpu.memory_space<vmem>>, vector<2x32xf32>,
    %c3_15 = arith.constant 3 : index
    %c0_16 = arith.constant 0 : index
    %c0_17 = arith.constant 0 : index
    %15 = vector.load %arg2[%c3_15, %c0_16, %c0_17] : memref<4x2x32xf32, #tpu.memory_space<vmem>>, vector<1x2x32xf32>
    %16 = vector.shape_cast %15 : vector<1x2x32xf32> to vector<2x32xf32>
    %c0_18 = arith.constant 0 : index
    %c32 = arith.constant 32 : index
    %17 = vector.load %arg9[%c0_18, %c32] : memref<8x64xf32, #tpu.memory_space<vmem>>, vector<2x32xf32>
    tpu.vector_store %arg9[%c0_18, %c32], %16 {strides = array<i32>} : memref<8x64xf32, #tpu.memory_space<vmem>>, vector<2x32xf32>,
    %c2_19 = arith.constant 2 : index
    %c0_20 = arith.constant 0 : index
    %c0_21 = arith.constant 0 : index
    %18 = vector.load %arg2[%c2_19, %c0_20, %c0_21] : memref<4x2x32xf32, #tpu.memory_space<vmem>>, vector<1x2x32xf32>
    %19 = vector.shape_cast %18 : vector<1x2x32xf32> to vector<2x32xf32>
    %c2_22 = arith.constant 2 : index
    %c32_23 = arith.constant 32 : index
    %20 = vector.load %arg9[%c2_22, %c32_23] : memref<8x64xf32, #tpu.memory_space<vmem>>, vector<2x32xf32>
    tpu.vector_store %arg9[%c2_22, %c32_23], %19 {strides = array<i32>} : memref<8x64xf32, #tpu.memory_space<vmem>>, vector<2x32xf32>,
    %c1_24 = arith.constant 1 : index
    %c0_25 = arith.constant 0 : index
    %c0_26 = arith.constant 0 : index
    %21 = vector.load %arg2[%c1_24, %c0_25, %c0_26] : memref<4x2x32xf32, #tpu.memory_space<vmem>>, vector<1x2x32xf32>
    %22 = vector.shape_cast %21 : vector<1x2x32xf32> to vector<2x32xf32>
    %c4_27 = arith.constant 4 : index
    %c32_28 = arith.constant 32 : index
    %23 = vector.load %arg9[%c4_27, %c32_28] : memref<8x64xf32, #tpu.memory_space<vmem>>, vector<2x32xf32>
    tpu.vector_store %arg9[%c4_27, %c32_28], %22 {strides = array<i32>} : memref<8x64xf32, #tpu.memory_space<vmem>>, vector<2x32xf32>,
    %c0_29 = arith.constant 0 : index
    %c0_30 = arith.constant 0 : index
    %c0_31 = arith.constant 0 : index
    %24 = vector.load %arg2[%c0_29, %c0_30, %c0_31] : memref<4x2x32xf32, #tpu.memory_space<vmem>>, vector<1x2x32xf32>
    %25 = vector.shape_cast %24 : vector<1x2x32xf32> to vector<2x32xf32>
    %c6_32 = arith.constant 6 : index
    %c32_33 = arith.constant 32 : index
    %26 = vector.load %arg9[%c6_32, %c32_33] : memref<8x64xf32, #tpu.memory_space<vmem>>, vector<2x32xf32>
    tpu.vector_store %arg9[%c6_32, %c32_33], %25 {strides = array<i32>} : memref<8x64xf32, #tpu.memory_space<vmem>>, vector<2x32xf32>,
    %c0_34 = arith.constant 0 : index
    %c0_35 = arith.constant 0 : index
    %27 = vector.load %arg9[%c0_34, %c0_35] : memref<8x64xf32, #tpu.memory_space<vmem>>, vector<8x64xf32>
    %28 = arith.truncf %27 : vector<8x64xf32> to vector<8x64xbf16>
    %c0_36 = arith.constant 0 : index
    %c0_37 = arith.constant 0 : index
    %29 = vector.load %arg3[%c0_36, %c0_37] : memref<64x256xbf16, #tpu.memory_space<vmem>>, vector<64x256xbf16>
    %cst = arith.constant dense<0.000000e+00> : vector<8x256xf32>
    %30 = tpu.matmul %28, %29, %cst {dimension_numbers = #tpu.dot_dimension_numbers<[1], [0], [0], [1], [0, 0, 1, 1], [], []>} : vector<8x64xbf16>, vector<64x256xbf16>, vector<8x256xf32> -> vector<8x256xf32>
    %c0_38 = arith.constant 0 : index
    %c0_39 = arith.constant 0 : index
    %31 = vector.load %arg4[%c0_38, %c0_39] : memref<1x256xf32, #tpu.memory_space<vmem>>, vector<1x256xf32>
    %32 = vector.broadcast %31 : vector<1x256xf32> to vector<8x256xf32>
    %33 = arith.addf %30, %32 : vector<8x256xf32>
    %c0_40 = arith.constant 0 : index
    %c0_41 = arith.constant 0 : index
    %34 = vector.load %arg10[%c0_40, %c0_41] : memref<8x256xf32, #tpu.memory_space<vmem>>, vector<8x256xf32>
    tpu.vector_store %arg10[%c0_40, %c0_41], %33 {strides = array<i32>} : memref<8x256xf32, #tpu.memory_space<vmem>>, vector<8x256xf32>,
    %35 = tpu.iota {dimensions = array<i32: 1>} : vector<1x256xi32>
    %c128_i32 = arith.constant 128 : i32
    %36 = vector.broadcast %c128_i32 : i32 to vector<1x256xi32>
    %37 = arith.cmpi sge, %35, %36 : vector<1x256xi32>
    %c192_i32 = arith.constant 192 : i32
    %38 = vector.broadcast %c192_i32 : i32 to vector<1x256xi32>
    %39 = arith.cmpi slt, %35, %38 : vector<1x256xi32>
    %40 = arith.andi %37, %39 : vector<1x256xi1>
    %c0_42 = arith.constant 0 : index
    %c0_43 = arith.constant 0 : index
    %41 = vector.load %arg11[%c0_42, %c0_43] : memref<2x64xf32, #tpu.memory_space<vmem>>, vector<2x64xf32>
    %c0_44 = arith.constant 0 : index
    %c0_45 = arith.constant 0 : index
    %42 = vector.load %arg12[%c0_44, %c0_45] : memref<2x64xf32, #tpu.memory_space<vmem>>, vector<2x64xf32>
    %c0_46 = arith.constant 0 : index
    %c0_47 = arith.constant 0 : index
    %43 = vector.load %arg10[%c0_46, %c0_47] : memref<8x256xf32, #tpu.memory_space<vmem>>, vector<2x256xf32>
    %44 = arith.truncf %41 : vector<2x64xf32> to vector<2x64xbf16>
    %c0_48 = arith.constant 0 : index
    %c0_49 = arith.constant 0 : index
    %45 = vector.load %arg5[%c0_48, %c0_49] : memref<64x256xbf16, #tpu.memory_space<vmem>>, vector<64x256xbf16>
    %cst_50 = arith.constant dense<0.000000e+00> : vector<2x256xf32>
    %46 = tpu.matmul %44, %45, %cst_50 {dimension_numbers = #tpu.dot_dimension_numbers<[1], [0], [0], [1], [0, 0, 1, 1], [], []>} : vector<2x64xbf16>, vector<64x256xbf16>, vector<2x256xf32> -> vector<2x256xf32>
    %47 = arith.addf %43, %46 : vector<2x256xf32>
    %cst_51 = arith.constant 5.000000e-01 : f32
    %48 = vector.broadcast %cst_51 : f32 to vector<2x256xf32>
    %49 = arith.mulf %48, %47 : vector<2x256xf32>
    %50 = vector.shape_cast %40 : vector<1x256xi1> to vector<1x256xi1>
    %51 = vector.broadcast %50 : vector<1x256xi1> to vector<2x256xi1>
    %52 = arith.select %51, %47, %49 : vector<2x256xi1>, vector<2x256xf32>
    %53 = math.tanh %52 : vector<2x256xf32>
    %cst_52 = arith.constant 5.000000e-01 : f32
    %54 = vector.broadcast %cst_52 : f32 to vector<2x256xf32>
    %55 = arith.mulf %54, %53 : vector<2x256xf32>
    %cst_53 = arith.constant 5.000000e-01 : f32
    %56 = vector.broadcast %cst_53 : f32 to vector<2x256xf32>
    %57 = arith.addf %55, %56 : vector<2x256xf32>
    %58 = vector.shape_cast %40 : vector<1x256xi1> to vector<1x256xi1>
    %59 = vector.broadcast %58 : vector<1x256xi1> to vector<2x256xi1>
    %60 = arith.select %59, %53, %57 : vector<2x256xi1>, vector<2x256xf32>
    %61 = vector.extract_strided_slice %60 {offsets = [0, 0], sizes = [2, 64], strides = [1, 1]} : vector<2x256xf32> to vector<2x64xf32>
    %62 = vector.extract_strided_slice %60 {offsets = [0, 64], sizes = [2, 64], strides = [1, 1]} : vector<2x256xf32> to vector<2x64xf32>
    %63 = vector.extract_strided_slice %60 {offsets = [0, 128], sizes = [2, 64], strides = [1, 1]} : vector<2x256xf32> to vector<2x64xf32>
    %64 = vector.extract_strided_slice %60 {offsets = [0, 192], sizes = [2, 64], strides = [1, 1]} : vector<2x256xf32> to vector<2x64xf32>
    %65 = arith.mulf %62, %42 : vector<2x64xf32>
    %66 = arith.mulf %61, %63 : vector<2x64xf32>
    %67 = arith.addf %65, %66 : vector<2x64xf32>
    %68 = math.tanh %67 : vector<2x64xf32>
    %69 = arith.mulf %64, %68 : vector<2x64xf32>
    %70 = vector.extract_strided_slice %69 {offsets = [0, 0], sizes = [2, 32], strides = [1, 1]} : vector<2x64xf32> to vector<2x32xf32>
    %71 = arith.truncf %70 : vector<2x32xf32> to vector<2x32xbf16>
    %c0_54 = arith.constant 0 : index
    %c0_55 = arith.constant 0 : index
    %c0_56 = arith.constant 0 : index
    %72 = vector.load %arg6[%c0_54, %c0_55, %c0_56] : memref<4x2x32xbf16, #tpu.memory_space<vmem>>, vector<1x2x32xbf16>
    %73 = vector.shape_cast %72 : vector<1x2x32xbf16> to vector<2x32xbf16>
    %74 = vector.shape_cast %71 : vector<2x32xbf16> to vector<1x2x32xbf16>
    tpu.vector_store %arg6[%c0_54, %c0_55, %c0_56], %74 {strides = array<i32>} : memref<4x2x32xbf16, #tpu.memory_space<vmem>>, vector<1x2x32xbf16>,
    %75 = vector.extract_strided_slice %69 {offsets = [0, 32], sizes = [2, 32], strides = [1, 1]} : vector<2x64xf32> to vector<2x32xf32>
    %76 = arith.truncf %75 : vector<2x32xf32> to vector<2x32xbf16>
    %c3_57 = arith.constant 3 : index
    %c0_58 = arith.constant 0 : index
    %c0_59 = arith.constant 0 : index
    %77 = vector.load %arg7[%c3_57, %c0_58, %c0_59] : memref<4x2x32xbf16, #tpu.memory_space<vmem>>, vector<1x2x32xbf16>
    %78 = vector.shape_cast %77 : vector<1x2x32xbf16> to vector<2x32xbf16>
    %79 = vector.shape_cast %76 : vector<2x32xbf16> to vector<1x2x32xbf16>
    tpu.vector_store %arg7[%c3_57, %c0_58, %c0_59], %79 {strides = array<i32>} : memref<4x2x32xbf16, #tpu.memory_space<vmem>>, vector<1x2x32xbf16>,
    %c0_60 = arith.constant 0 : index
    %c0_61 = arith.constant 0 : index
    %80 = vector.load %arg8[%c0_60, %c0_61] : memref<2x64xf32, #tpu.memory_space<vmem>>, vector<2x64xf32>
    %81 = arith.addf %80, %69 : vector<2x64xf32>
    %c0_62 = arith.constant 0 : index
    %c0_63 = arith.constant 0 : index
    %82 = vector.load %arg8[%c0_62, %c0_63] : memref<2x64xf32, #tpu.memory_space<vmem>>, vector<2x64xf32>
    tpu.vector_store %arg8[%c0_62, %c0_63], %81 {strides = array<i32>} : memref<2x64xf32, #tpu.memory_space<vmem>>, vector<2x64xf32>,
    %c2_64 = arith.constant 2 : index
    %c0_65 = arith.constant 0 : index
    %83 = vector.load %arg10[%c2_64, %c0_65] : memref<8x256xf32, #tpu.memory_space<vmem>>, vector<2x256xf32>
    %84 = arith.truncf %69 : vector<2x64xf32> to vector<2x64xbf16>
    %c0_66 = arith.constant 0 : index
    %c0_67 = arith.constant 0 : index
    %85 = vector.load %arg5[%c0_66, %c0_67] : memref<64x256xbf16, #tpu.memory_space<vmem>>, vector<64x256xbf16>
    %cst_68 = arith.constant dense<0.000000e+00> : vector<2x256xf32>
    %86 = tpu.matmul %84, %85, %cst_68 {dimension_numbers = #tpu.dot_dimension_numbers<[1], [0], [0], [1], [0, 0, 1, 1], [], []>} : vector<2x64xbf16>, vector<64x256xbf16>, vector<2x256xf32> -> vector<2x256xf32>
    %87 = arith.addf %83, %86 : vector<2x256xf32>
    %cst_69 = arith.constant 5.000000e-01 : f32
    %88 = vector.broadcast %cst_69 : f32 to vector<2x256xf32>
    %89 = arith.mulf %88, %87 : vector<2x256xf32>
    %90 = vector.shape_cast %40 : vector<1x256xi1> to vector<1x256xi1>
    %91 = vector.broadcast %90 : vector<1x256xi1> to vector<2x256xi1>
    %92 = arith.select %91, %87, %89 : vector<2x256xi1>, vector<2x256xf32>
    %93 = math.tanh %92 : vector<2x256xf32>
    %cst_70 = arith.constant 5.000000e-01 : f32
    %94 = vector.broadcast %cst_70 : f32 to vector<2x256xf32>
    %95 = arith.mulf %94, %93 : vector<2x256xf32>
    %cst_71 = arith.constant 5.000000e-01 : f32
    %96 = vector.broadcast %cst_71 : f32 to vector<2x256xf32>
    %97 = arith.addf %95, %96 : vector<2x256xf32>
    %98 = vector.shape_cast %40 : vector<1x256xi1> to vector<1x256xi1>
    %99 = vector.broadcast %98 : vector<1x256xi1> to vector<2x256xi1>
    %100 = arith.select %99, %93, %97 : vector<2x256xi1>, vector<2x256xf32>
    %101 = vector.extract_strided_slice %100 {offsets = [0, 0], sizes = [2, 64], strides = [1, 1]} : vector<2x256xf32> to vector<2x64xf32>
    %102 = vector.extract_strided_slice %100 {offsets = [0, 64], sizes = [2, 64], strides = [1, 1]} : vector<2x256xf32> to vector<2x64xf32>
    %103 = vector.extract_strided_slice %100 {offsets = [0, 128], sizes = [2, 64], strides = [1, 1]} : vector<2x256xf32> to vector<2x64xf32>
    %104 = vector.extract_strided_slice %100 {offsets = [0, 192], sizes = [2, 64], strides = [1, 1]} : vector<2x256xf32> to vector<2x64xf32>
    %105 = arith.mulf %102, %67 : vector<2x64xf32>
    %106 = arith.mulf %101, %103 : vector<2x64xf32>
    %107 = arith.addf %105, %106 : vector<2x64xf32>
    %108 = math.tanh %107 : vector<2x64xf32>
    %109 = arith.mulf %104, %108 : vector<2x64xf32>
    %110 = vector.extract_strided_slice %109 {offsets = [0, 0], sizes = [2, 32], strides = [1, 1]} : vector<2x64xf32> to vector<2x32xf32>
    %111 = arith.truncf %110 : vector<2x32xf32> to vector<2x32xbf16>
    %c1_72 = arith.constant 1 : index
    %c0_73 = arith.constant 0 : index
    %c0_74 = arith.constant 0 : index
    %112 = vector.load %arg6[%c1_72, %c0_73, %c0_74] : memref<4x2x32xbf16, #tpu.memory_space<vmem>>, vector<1x2x32xbf16>
    %113 = vector.shape_cast %112 : vector<1x2x32xbf16> to vector<2x32xbf16>
    %114 = vector.shape_cast %111 : vector<2x32xbf16> to vector<1x2x32xbf16>
    tpu.vector_store %arg6[%c1_72, %c0_73, %c0_74], %114 {strides = array<i32>} : memref<4x2x32xbf16, #tpu.memory_space<vmem>>, vector<1x2x32xbf16>,
    %115 = vector.extract_strided_slice %109 {offsets = [0, 32], sizes = [2, 32], strides = [1, 1]} : vector<2x64xf32> to vector<2x32xf32>
    %116 = arith.truncf %115 : vector<2x32xf32> to vector<2x32xbf16>
    %c2_75 = arith.constant 2 : index
    %c0_76 = arith.constant 0 : index
    %c0_77 = arith.constant 0 : index
    %117 = vector.load %arg7[%c2_75, %c0_76, %c0_77] : memref<4x2x32xbf16, #tpu.memory_space<vmem>>, vector<1x2x32xbf16>
    %118 = vector.shape_cast %117 : vector<1x2x32xbf16> to vector<2x32xbf16>
    %119 = vector.shape_cast %116 : vector<2x32xbf16> to vector<1x2x32xbf16>
    tpu.vector_store %arg7[%c2_75, %c0_76, %c0_77], %119 {strides = array<i32>} : memref<4x2x32xbf16, #tpu.memory_space<vmem>>, vector<1x2x32xbf16>,
    %c0_78 = arith.constant 0 : index
    %c0_79 = arith.constant 0 : index
    %120 = vector.load %arg8[%c0_78, %c0_79] : memref<2x64xf32, #tpu.memory_space<vmem>>, vector<2x64xf32>
    %121 = arith.addf %120, %109 : vector<2x64xf32>
    %c0_80 = arith.constant 0 : index
    %c0_81 = arith.constant 0 : index
    %122 = vector.load %arg8[%c0_80, %c0_81] : memref<2x64xf32, #tpu.memory_space<vmem>>, vector<2x64xf32>
    tpu.vector_store %arg8[%c0_80, %c0_81], %121 {strides = array<i32>} : memref<2x64xf32, #tpu.memory_space<vmem>>, vector<2x64xf32>,
    %c4_82 = arith.constant 4 : index
    %c0_83 = arith.constant 0 : index
    %123 = vector.load %arg10[%c4_82, %c0_83] : memref<8x256xf32, #tpu.memory_space<vmem>>, vector<2x256xf32>
    %124 = arith.truncf %109 : vector<2x64xf32> to vector<2x64xbf16>
    %c0_84 = arith.constant 0 : index
    %c0_85 = arith.constant 0 : index
    %125 = vector.load %arg5[%c0_84, %c0_85] : memref<64x256xbf16, #tpu.memory_space<vmem>>, vector<64x256xbf16>
    %cst_86 = arith.constant dense<0.000000e+00> : vector<2x256xf32>
    %126 = tpu.matmul %124, %125, %cst_86 {dimension_numbers = #tpu.dot_dimension_numbers<[1], [0], [0], [1], [0, 0, 1, 1], [], []>} : vector<2x64xbf16>, vector<64x256xbf16>, vector<2x256xf32> -> vector<2x256xf32>
    %127 = arith.addf %123, %126 : vector<2x256xf32>
    %cst_87 = arith.constant 5.000000e-01 : f32
    %128 = vector.broadcast %cst_87 : f32 to vector<2x256xf32>
    %129 = arith.mulf %128, %127 : vector<2x256xf32>
    %130 = vector.shape_cast %40 : vector<1x256xi1> to vector<1x256xi1>
    %131 = vector.broadcast %130 : vector<1x256xi1> to vector<2x256xi1>
    %132 = arith.select %131, %127, %129 : vector<2x256xi1>, vector<2x256xf32>
    %133 = math.tanh %132 : vector<2x256xf32>
    %cst_88 = arith.constant 5.000000e-01 : f32
    %134 = vector.broadcast %cst_88 : f32 to vector<2x256xf32>
    %135 = arith.mulf %134, %133 : vector<2x256xf32>
    %cst_89 = arith.constant 5.000000e-01 : f32
    %136 = vector.broadcast %cst_89 : f32 to vector<2x256xf32>
    %137 = arith.addf %135, %136 : vector<2x256xf32>
    %138 = vector.shape_cast %40 : vector<1x256xi1> to vector<1x256xi1>
    %139 = vector.broadcast %138 : vector<1x256xi1> to vector<2x256xi1>
    %140 = arith.select %139, %133, %137 : vector<2x256xi1>, vector<2x256xf32>
    %141 = vector.extract_strided_slice %140 {offsets = [0, 0], sizes = [2, 64], strides = [1, 1]} : vector<2x256xf32> to vector<2x64xf32>
    %142 = vector.extract_strided_slice %140 {offsets = [0, 64], sizes = [2, 64], strides = [1, 1]} : vector<2x256xf32> to vector<2x64xf32>
    %143 = vector.extract_strided_slice %140 {offsets = [0, 128], sizes = [2, 64], strides = [1, 1]} : vector<2x256xf32> to vector<2x64xf32>
    %144 = vector.extract_strided_slice %140 {offsets = [0, 192], sizes = [2, 64], strides = [1, 1]} : vector<2x256xf32> to vector<2x64xf32>
    %145 = arith.mulf %142, %107 : vector<2x64xf32>
    %146 = arith.mulf %141, %143 : vector<2x64xf32>
    %147 = arith.addf %145, %146 : vector<2x64xf32>
    %148 = math.tanh %147 : vector<2x64xf32>
    %149 = arith.mulf %144, %148 : vector<2x64xf32>
    %150 = vector.extract_strided_slice %149 {offsets = [0, 0], sizes = [2, 32], strides = [1, 1]} : vector<2x64xf32> to vector<2x32xf32>
    %151 = arith.truncf %150 : vector<2x32xf32> to vector<2x32xbf16>
    %c2_90 = arith.constant 2 : index
    %c0_91 = arith.constant 0 : index
    %c0_92 = arith.constant 0 : index
    %152 = vector.load %arg6[%c2_90, %c0_91, %c0_92] : memref<4x2x32xbf16, #tpu.memory_space<vmem>>, vector<1x2x32xbf16>
    %153 = vector.shape_cast %152 : vector<1x2x32xbf16> to vector<2x32xbf16>
    %154 = vector.shape_cast %151 : vector<2x32xbf16> to vector<1x2x32xbf16>
    tpu.vector_store %arg6[%c2_90, %c0_91, %c0_92], %154 {strides = array<i32>} : memref<4x2x32xbf16, #tpu.memory_space<vmem>>, vector<1x2x32xbf16>,
    %155 = vector.extract_strided_slice %149 {offsets = [0, 32], sizes = [2, 32], strides = [1, 1]} : vector<2x64xf32> to vector<2x32xf32>
    %156 = arith.truncf %155 : vector<2x32xf32> to vector<2x32xbf16>
    %c1_93 = arith.constant 1 : index
    %c0_94 = arith.constant 0 : index
    %c0_95 = arith.constant 0 : index
    %157 = vector.load %arg7[%c1_93, %c0_94, %c0_95] : memref<4x2x32xbf16, #tpu.memory_space<vmem>>, vector<1x2x32xbf16>
    %158 = vector.shape_cast %157 : vector<1x2x32xbf16> to vector<2x32xbf16>
    %159 = vector.shape_cast %156 : vector<2x32xbf16> to vector<1x2x32xbf16>
    tpu.vector_store %arg7[%c1_93, %c0_94, %c0_95], %159 {strides = array<i32>} : memref<4x2x32xbf16, #tpu.memory_space<vmem>>, vector<1x2x32xbf16>,
    %c0_96 = arith.constant 0 : index
    %c0_97 = arith.constant 0 : index
    %160 = vector.load %arg8[%c0_96, %c0_97] : memref<2x64xf32, #tpu.memory_space<vmem>>, vector<2x64xf32>
    %161 = arith.addf %160, %149 : vector<2x64xf32>
    %c0_98 = arith.constant 0 : index
    %c0_99 = arith.constant 0 : index
    %162 = vector.load %arg8[%c0_98, %c0_99] : memref<2x64xf32, #tpu.memory_space<vmem>>, vector<2x64xf32>
    tpu.vector_store %arg8[%c0_98, %c0_99], %161 {strides = array<i32>} : memref<2x64xf32, #tpu.memory_space<vmem>>, vector<2x64xf32>,
    %c6_100 = arith.constant 6 : index
    %c0_101 = arith.constant 0 : index
    %163 = vector.load %arg10[%c6_100, %c0_101] : memref<8x256xf32, #tpu.memory_space<vmem>>, vector<2x256xf32>
    %164 = arith.truncf %149 : vector<2x64xf32> to vector<2x64xbf16>
    %c0_102 = arith.constant 0 : index
    %c0_103 = arith.constant 0 : index
    %165 = vector.load %arg5[%c0_102, %c0_103] : memref<64x256xbf16, #tpu.memory_space<vmem>>, vector<64x256xbf16>
    %cst_104 = arith.constant dense<0.000000e+00> : vector<2x256xf32>
    %166 = tpu.matmul %164, %165, %cst_104 {dimension_numbers = #tpu.dot_dimension_numbers<[1], [0], [0], [1], [0, 0, 1, 1], [], []>} : vector<2x64xbf16>, vector<64x256xbf16>, vector<2x256xf32> -> vector<2x256xf32>
    %167 = arith.addf %163, %166 : vector<2x256xf32>
    %cst_105 = arith.constant 5.000000e-01 : f32
    %168 = vector.broadcast %cst_105 : f32 to vector<2x256xf32>
    %169 = arith.mulf %168, %167 : vector<2x256xf32>
    %170 = vector.shape_cast %40 : vector<1x256xi1> to vector<1x256xi1>
    %171 = vector.broadcast %170 : vector<1x256xi1> to vector<2x256xi1>
    %172 = arith.select %171, %167, %169 : vector<2x256xi1>, vector<2x256xf32>
    %173 = math.tanh %172 : vector<2x256xf32>
    %cst_106 = arith.constant 5.000000e-01 : f32
    %174 = vector.broadcast %cst_106 : f32 to vector<2x256xf32>
    %175 = arith.mulf %174, %173 : vector<2x256xf32>
    %cst_107 = arith.constant 5.000000e-01 : f32
    %176 = vector.broadcast %cst_107 : f32 to vector<2x256xf32>
    %177 = arith.addf %175, %176 : vector<2x256xf32>
    %178 = vector.shape_cast %40 : vector<1x256xi1> to vector<1x256xi1>
    %179 = vector.broadcast %178 : vector<1x256xi1> to vector<2x256xi1>
    %180 = arith.select %179, %173, %177 : vector<2x256xi1>, vector<2x256xf32>
    %181 = vector.extract_strided_slice %180 {offsets = [0, 0], sizes = [2, 64], strides = [1, 1]} : vector<2x256xf32> to vector<2x64xf32>
    %182 = vector.extract_strided_slice %180 {offsets = [0, 64], sizes = [2, 64], strides = [1, 1]} : vector<2x256xf32> to vector<2x64xf32>
    %183 = vector.extract_strided_slice %180 {offsets = [0, 128], sizes = [2, 64], strides = [1, 1]} : vector<2x256xf32> to vector<2x64xf32>
    %184 = vector.extract_strided_slice %180 {offsets = [0, 192], sizes = [2, 64], strides = [1, 1]} : vector<2x256xf32> to vector<2x64xf32>
    %185 = arith.mulf %182, %147 : vector<2x64xf32>
    %186 = arith.mulf %181, %183 : vector<2x64xf32>
    %187 = arith.addf %185, %186 : vector<2x64xf32>
    %188 = math.tanh %187 : vector<2x64xf32>
    %189 = arith.mulf %184, %188 : vector<2x64xf32>
    %190 = vector.extract_strided_slice %189 {offsets = [0, 0], sizes = [2, 32], strides = [1, 1]} : vector<2x64xf32> to vector<2x32xf32>
    %191 = arith.truncf %190 : vector<2x32xf32> to vector<2x32xbf16>
    %c3_108 = arith.constant 3 : index
    %c0_109 = arith.constant 0 : index
    %c0_110 = arith.constant 0 : index
    %192 = vector.load %arg6[%c3_108, %c0_109, %c0_110] : memref<4x2x32xbf16, #tpu.memory_space<vmem>>, vector<1x2x32xbf16>
    %193 = vector.shape_cast %192 : vector<1x2x32xbf16> to vector<2x32xbf16>
    %194 = vector.shape_cast %191 : vector<2x32xbf16> to vector<1x2x32xbf16>
    tpu.vector_store %arg6[%c3_108, %c0_109, %c0_110], %194 {strides = array<i32>} : memref<4x2x32xbf16, #tpu.memory_space<vmem>>, vector<1x2x32xbf16>,
    %195 = vector.extract_strided_slice %189 {offsets = [0, 32], sizes = [2, 32], strides = [1, 1]} : vector<2x64xf32> to vector<2x32xf32>
    %196 = arith.truncf %195 : vector<2x32xf32> to vector<2x32xbf16>
    %c0_111 = arith.constant 0 : index
    %c0_112 = arith.constant 0 : index
    %c0_113 = arith.constant 0 : index
    %197 = vector.load %arg7[%c0_111, %c0_112, %c0_113] : memref<4x2x32xbf16, #tpu.memory_space<vmem>>, vector<1x2x32xbf16>
    %198 = vector.shape_cast %197 : vector<1x2x32xbf16> to vector<2x32xbf16>
    %199 = vector.shape_cast %196 : vector<2x32xbf16> to vector<1x2x32xbf16>
    tpu.vector_store %arg7[%c0_111, %c0_112, %c0_113], %199 {strides = array<i32>} : memref<4x2x32xbf16, #tpu.memory_space<vmem>>, vector<1x2x32xbf16>,
    %c0_114 = arith.constant 0 : index
    %c0_115 = arith.constant 0 : index
    %200 = vector.load %arg8[%c0_114, %c0_115] : memref<2x64xf32, #tpu.memory_space<vmem>>, vector<2x64xf32>
    %201 = arith.addf %200, %189 : vector<2x64xf32>
    %c0_116 = arith.constant 0 : index
    %c0_117 = arith.constant 0 : index
    %202 = vector.load %arg8[%c0_116, %c0_117] : memref<2x64xf32, #tpu.memory_space<vmem>>, vector<2x64xf32>
    tpu.vector_store %arg8[%c0_116, %c0_117], %201 {strides = array<i32>} : memref<2x64xf32, #tpu.memory_space<vmem>>, vector<2x64xf32>,
    %c0_118 = arith.constant 0 : index
    %c0_119 = arith.constant 0 : index
    %203 = vector.load %arg11[%c0_118, %c0_119] : memref<2x64xf32, #tpu.memory_space<vmem>>, vector<2x64xf32>
    tpu.vector_store %arg11[%c0_118, %c0_119], %189 {strides = array<i32>} : memref<2x64xf32, #tpu.memory_space<vmem>>, vector<2x64xf32>,
    %c0_120 = arith.constant 0 : index
    %c0_121 = arith.constant 0 : index
    %204 = vector.load %arg12[%c0_120, %c0_121] : memref<2x64xf32, #tpu.memory_space<vmem>>, vector<2x64xf32>
    tpu.vector_store %arg12[%c0_120, %c0_121], %187 {strides = array<i32>} : memref<2x64xf32, #tpu.memory_space<vmem>>, vector<2x64xf32>,
    %c1_i32 = arith.constant 1 : i32
    %205 = arith.cmpi eq, %arg0, %c1_i32 : i32
    %206 = arith.extui %205 : i1 to i32
    %c0_i32_122 = arith.constant 0 : i32
    %207 = arith.cmpi ne, %206, %c0_i32_122 : i32
    scf.if %207 {
      %c0_123 = arith.constant 0 : index
      %c0_124 = arith.constant 0 : index
      %208 = vector.load %arg8[%c0_123, %c0_124] : memref<2x64xf32, #tpu.memory_space<vmem>>, vector<2x64xf32>
      %cst_125 = arith.constant 1.250000e-01 : f32
      %209 = vector.broadcast %cst_125 : f32 to vector<2x64xf32>
      %210 = arith.mulf %208, %209 : vector<2x64xf32>
      %c0_126 = arith.constant 0 : index
      %c0_127 = arith.constant 0 : index
      %211 = vector.load %arg8[%c0_126, %c0_127] : memref<2x64xf32, #tpu.memory_space<vmem>>, vector<2x64xf32>
      tpu.vector_store %arg8[%c0_126, %c0_127], %210 {strides = array<i32>} : memref<2x64xf32, #tpu.memory_space<vmem>>, vector<2x64xf32>,
    } else {
    }
    return
  }
  func.func @transform_0(%arg0: i32) -> (i32, i32, i32) {
    %c0_i32 = arith.constant 0 : i32
    %c0_i32_0 = arith.constant 0 : i32
    %c0_i32_1 = arith.constant 0 : i32
    return %arg0, %c0_i32, %c0_i32_0 : i32, i32, i32
  }
  func.func @transform_1(%arg0: i32) -> (i32, i32, i32) {
    %c1_i32 = arith.constant 1 : i32
    %0 = arith.subi %c1_i32, %arg0 : i32
    %c0_i32 = arith.constant 0 : i32
    %c0_i32_0 = arith.constant 0 : i32
    %c0_i32_1 = arith.constant 0 : i32
    return %0, %c0_i32, %c0_i32_0 : i32, i32, i32
  }
  func.func @transform_2(%arg0: i32) -> (i32, i32) {
    %c0_i32 = arith.constant 0 : i32
    %c0_i32_0 = arith.constant 0 : i32
    %c0_i32_1 = arith.constant 0 : i32
    return %c0_i32, %c0_i32_0 : i32, i32
  }
  func.func @transform_3(%arg0: i32) -> (i32, i32) {
    %c0_i32 = arith.constant 0 : i32
    %c0_i32_0 = arith.constant 0 : i32
    %c0_i32_1 = arith.constant 0 : i32
    return %c0_i32, %c0_i32_0 : i32, i32
  }
  func.func @transform_4(%arg0: i32) -> (i32, i32) {
    %c0_i32 = arith.constant 0 : i32
    %c0_i32_0 = arith.constant 0 : i32
    %c0_i32_1 = arith.constant 0 : i32
    return %c0_i32, %c0_i32_0 : i32, i32
  }
  func.func @transform_5(%arg0: i32) -> (i32, i32, i32) {
    %c0_i32 = arith.constant 0 : i32
    %c0_i32_0 = arith.constant 0 : i32
    %c0_i32_1 = arith.constant 0 : i32
    return %arg0, %c0_i32, %c0_i32_0 : i32, i32, i32
  }
  func.func @transform_6(%arg0: i32) -> (i32, i32, i32) {
    %c1_i32 = arith.constant 1 : i32
    %0 = arith.subi %c1_i32, %arg0 : i32
    %c0_i32 = arith.constant 0 : i32
    %c0_i32_0 = arith.constant 0 : i32
    %c0_i32_1 = arith.constant 0 : i32
    return %0, %c0_i32, %c0_i32_0 : i32, i32, i32
  }
  func.func @transform_7(%arg0: i32) -> (i32, i32) {
    %c0_i32 = arith.constant 0 : i32
    %c0_i32_0 = arith.constant 0 : i32
    %c0_i32_1 = arith.constant 0 : i32
    return %c0_i32, %c0_i32_0 : i32, i32
  }
}

</mosaic_0001>

<bundles_post_ra>
// kernel: bilstm_encoder_forward.4
= control target key start
LH: loop header
LB: loop body
LE: loop exit
PB: predicated region body
PF: predicated region fallthrough
CT: control target
= control target key end

     0   :  { %13 = vsyncpa [#allocation7], 0  ;;  %s1502_s24 = smov 0   ;;  %s1761_s0 = inlined_call_operand.vmem [shape: f32[8,2,32], index: 0, kind: input, shape index: {}, may-alias: {0,1}]   ;;  %s1762_s1 = inlined_call_operand.vmem [shape: f32[8,2,32], index: 1, kind: input, shape index: {}, may-alias: {0,1}]   ;;  %s1763_s2 = inlined_call_operand.vmem [shape: bf16[64,256], index: 2, kind: input, shape index: {}]   ;;  %s1764_s3 = inlined_call_operand.vmem [shape: f32[1,256], index: 3, kind: input, shape index: {}]   ;;  %s1765_s4 = inlined_call_operand.vmem [shape: bf16[64,256], index: 4, kind: input, shape index: {}]   ;;  %s1766_s5 = inlined_call_operand.vmem [shape: bf16[8,2,32], index: 5, kind: output, shape index: {0}]   ;;  %s1767_s6 = inlined_call_operand.vmem [shape: bf16[8,2,32], index: 6, kind: output, shape index: {1}]   ;;  %s1768_s7 = inlined_call_operand.hbm [shape: f32[2,64], index: 7, kind: output, shape index: {2}]  }
   0x1 LB: > { %s1508_s25 = sadd.s32 4294967295, %s1454_s24   ;;  %p1282_p0 = scmp.ge.s32.totalorder %s1454_s24, 1  ;;  %s1454_s24 = sphi %s1502_s24, %s19_s24  }
   0x2   : > { %p256_p1 = scmp.lt.s32.totalorder %s1454_s24, 3 }
   0x4   : > { %p257_p2 = pnand %p1282_p0, %p256_p1 }
   0x5   : > { %s1283_s26 = sshll.u32 (!%p257_p2), %s1508_s25, 2  ;;  %s304_s27 = ssub.s32 (!%p257_p2), 1, %s1508_s25 }
   0x6   : > { %260 = sbr.rel (%p257_p2) target bundleno = 2089 (0x829), region = 40  ;;  %p299_p3 = scmp.lt.s32.totalorder (!%p257_p2), %s1283_s26, 7 }
   0x7   : > { %s1285_s28 = sshll.u32 (!%p257_p2), %s304_s27, 2  ;;  %p1289_p5 = scmp.ne.s32.totalorder (!%p257_p2), %s1508_s25, 0 }
   0x8   : > { %p306_p4 = scmp.lt.s32.totalorder (!%p257_p2), %s1285_s28, 7 }
   0xb   : > { %s1770_s26 = smov (!%p299_p3, %s1283_s26), 7  ;;  %s1772_s28 = smov (!%p306_p4, %s1285_s28), 7 }
   0xc   : > { %s1284_s29 = sshll.u32 %s1770_s26, 1  ;;  %s1517_s9 = scalar_lea.vmem %s1766_s5, %s1770_s26 }
   0xd   : > { %s1522_s12 = scalar_lea.vmem %s1761_s0, %s1284_s29  ;;  %s1286_s13 = sshll.u32 %s1772_s28, 1 }
   0xe   : > { %s309_s16 = scalar_lea.vmem %s1762_s1, %s1286_s13  ;;  %s1530_s19 = scalar_lea.vmem %s1767_s6, %s1772_s28 }
   0xf   : > { %328 = sbr.rel (%p1289_p5) target bundleno = 23 (0x17), region = 44 }
  0x14   : > { %vm329_vm0 = vcmask 517120   ;;  %v1456_v0 = vmov 0.0  }
  0x15   : > { %330 = vst.msk [vmem:[#allocation4] sm:$0x3] %vm329_vm0, %v1456_v0  ;;  %331 = vst.msk [vmem:[#allocation5] sm:$0x3] %vm329_vm0, %v1456_v0 }
  0x16   : > { %332 = vst.msk [vmem:[#allocation6] sm:$0x3] %vm329_vm0, %v1456_v0 }
  0x17 PF: > { %v1295_v1 = vld [vmem:[%s309_s16 + $0x2] sm:$0x3]  ;;  %v1293_v2 = vld [vmem:[%s309_s16 + $0x6] sm:$0x3]  ;;  %s1457_s20 = smov 32   ;;  %vm334_vm1 = vcmask 254976   ;;  %v385_v39 = vlaneseq }
  0x18   : > { %363 = vrot.lane.b32.xlu1 %v1295_v1, %s1457_s20  ;;  %348 = vrot.lane.b32.xlu0 %v1293_v2, %s1457_s20  ;;  %v367_v3 = vld [vmem:[%s309_s16] sm:$0x3]  ;;  %v1294_v4 = vld [vmem:[%s309_s16 + $0x4] sm:$0x3]  ;;  %v1458_v9 = vmov 0   ;;  %s1459_s14 = smov 64  }
  0x19   : > { %v1372_v5 = vld [vmem:[%s1763_s2 + $0x34] ss:$8 sps:$4 sm:$0xff]   ;;  %v1374_v6 = vld [vmem:[%s1763_s2 + $0x30] ss:$8 sps:$4 sm:$0xff]   ;;  %v1291_v7 = vld [vmem:[%s1522_s12 + $0x4] sm:$0x3]  ;;  %471 = vmatprep.mubr.bf16.mxu0 %v1458_v9  ;;  %579 = vmatprep.mubr.bf16.mxu1 %v1458_v9 }
  0x1a   : > { %v333_v8 = vld [vmem:[%s1522_s12] sm:$0x3]  ;;  %447 = vmatprep.subr.bf16.mxu0 %v1372_v5  ;;  %341 = vst.msk [vmem:[#allocation2 + $0x4] sm:$0x3] %vm334_vm1, %v1291_v7  ;;  %v1375_v10 = vld [vmem:[%s1763_s2 + $0x24] ss:$8 sps:$4 sm:$0xff]  }
  0x1b   : > { %335 = vst.msk [vmem:[#allocation2] sm:$0x3] %vm334_vm1, %v333_v8  ;;  %v1555_v11 = vld [vmem:[%s1765_s4 + $0x34] ss:$8 sps:$4 sm:$0xff]   ;;  %448 = vmatpush1.bf16.msra.mxu0 %v1374_v6  ;;  %v1379_v12 = vld [vmem:[%s1763_s2 + $0x20] ss:$8 sps:$4 sm:$0xff]  }
  0x1c   : > { %369 = vrot.lane.b32.xlu1 %v367_v3, %s1457_s20  ;;  %356 = vrot.lane.b32.xlu0 %v1294_v4, %s1457_s20  ;;  %v1563_v13 = vld [vmem:[%s1765_s4 + $0x30] ss:$8 sps:$4 sm:$0xff]   ;;  %v1292_v14 = vld [vmem:[%s1522_s12 + $0x6] sm:$0x3]  ;;  %vm435_vm2 = vcmask 523264   ;;  %vm351_vm3 = vcmask 517376  }
  0x1d   : > { %449 = vmatprep.subr.bf16.mxu0 %v1375_v10  ;;  %555 = vmatprep.subr.bf16.mxu1 %v1555_v11  ;;  %344 = vst.msk [vmem:[#allocation2 + $0x6] sm:$0x3] %vm334_vm1, %v1292_v14  ;;  %v1290_v15 = vld [vmem:[%s1522_s12 + $0x2] sm:$0x3]  ;;  %v1381_v16 = vld [vmem:[%s1763_s2 + $0x14] ss:$8 sps:$4 sm:$0xff]  }
  0x1e   : > { %556 = vmatpush1.bf16.msra.mxu1 %v1563_v13  ;;  %338 = vst.msk [vmem:[#allocation2 + $0x2] sm:$0x3] %vm334_vm1, %v1290_v15  ;;  %v1577_v17 = vld [vmem:[%s1765_s4 + $0x24] ss:$8 sps:$4 sm:$0xff]   ;;  %v1385_v18 = vld [vmem:[%s1763_s2 + $0x10] ss:$8 sps:$4 sm:$0xff]  }
  0x1f   : > { %v1585_v19 = vld [vmem:[%s1765_s4 + $0x20] ss:$8 sps:$4 sm:$0xff]   ;;  %450 = vmatpush1.bf16.msra.mxu0 %v1379_v12  ;;  %v1387_v20 = vld [vmem:[%s1763_s2 + $0x4] ss:$8 sps:$4 sm:$0xff]   ;;  %557 = vmatprep.subr.bf16.mxu1 %v1577_v17  ;;  %v1594_v21 = vld [vmem:[%s1765_s4 + $0x14] ss:$8 sps:$4 sm:$0xff]  }
  0x20   : > { %451 = vmatprep.subr.bf16.mxu0 %v1381_v16  ;;  %v1600_v22 = vld [vmem:[%s1765_s4 + $0x10] ss:$8 sps:$4 sm:$0xff]   ;;  %v1606_v23 = vld [vmem:[%s1765_s4 + $0x4] ss:$8 sps:$4 sm:$0xff]   ;;  %v1391_v24 = vld [vmem:[%s1763_s2] ss:$8 sps:$4 sm:$0xff]  }
  0x21   : > { %v492_v25 = vld [vmem:[#allocation5] sm:$0x3]  ;;  %v1616_v26 = vld [vmem:[%s1765_s4] ss:$8 sps:$4 sm:$0xff]   ;;  %v491_v27 = vld [vmem:[#allocation4] sm:$0x3] }
  0x22   : > { %558 = vmatpush1.bf16.msra.mxu1 %v1585_v19  ;;  %607 = vrot.lane.b32.xlu0 %v492_v25, %s1459_s14  ;;  %v495_v28 = vpack.c.bf16 %v491_v27, %v491_v27  ;;  %v1641_v40 = vshrl.u32 %v385_v39, 7  ;;  %v383_v42 = vld [vmem:[%s1764_s3] sm:$0x3]  ;;  %v483_v51 = vand.u32 127, %v385_v39  ;;  %vm651_vm5 = vcmask 517120   ;;  %p1347_p6 = scmp.ne.s32.totalorder %s1508_s25, 1 }
  0x23   : > { %559 = vmatprep.subr.bf16.mxu1 %v1594_v21  ;;  %452 = vmatpush1.bf16.msra.mxu0 %v1385_v18  ;;  %vm638_vm6 = vcmask 253952   ;;  %vm1147_vm7 = vcmask 523270  }
  0x24   : > { %453 = vmatprep.subr.bf16.mxu0 %v1387_v20  ;;  %v387_v41 = vsub.s32 0, %v1641_v40  ;;  %v391_v43 = vsub.s32 1, %v1641_v40  ;;  %v1648_v53 = vadd.s32 128, %v483_v51 }
  0x26   : > { %560 = vmatpush1.bf16.msra.mxu1 %v1600_v22  ;;  %v388_v44 = vrot.slane %v383_v42, %v387_v41  ;;  %v392_v45 = vrot.slane %v383_v42, %v391_v43  ;;  %vm488_vm4 = vcmp.lt.s32.totalorder %v1648_v53, 192 }
  0x27   : > { %561 = vmatprep.subr.bf16.mxu1 %v1606_v23  ;;  %454 = vmatpush1.bf16.msra.mxu0 %v1391_v24 }
  0x28   : > { %716 = vmatprep.subr.bf16.mxu0 %v1555_v11 }
  0x2a   : > { %562 = vmatpush1.bf16.msra.mxu1 %v1616_v26 }
  0x2b   : > { %880 = vmatprep.subr.bf16.mxu1 %v1555_v11 }
  0x2d   : > { %1313 = vmatmul.mubr.msk.bf16.vlgmr.msra.gmra.mxu1 %vm435_vm2, %v495_v28 }
  0x2e   : > { %881 = vmatpush1.bf16.msra.mxu1 %v1563_v13  ;;  %904 = vmatprep.mubr.bf16.mxu1 %v1458_v9 }
  0x2f   : > { %882 = vmatprep.subr.bf16.mxu1 %v1577_v17 }
  0x32   : > { %883 = vmatpush1.bf16.msra.mxu1 %v1585_v19 }
  0x33   : > { %884 = vmatprep.subr.bf16.mxu1 %v1594_v21 }
  0x36   : > { %885 = vmatpush1.bf16.msra.mxu1 %v1600_v22 }
  0x37   : > { %886 = vmatprep.subr.bf16.mxu1 %v1606_v23 }
  0x3a   : > { %887 = vmatpush1.bf16.msra.mxu1 %v1616_v26 }
  0x8a   : > { %v364_v29 = vpop.permute.xlu1 %363  ;;  %v349_v30 = vpop.permute.xlu0 %348 }
  0x8b   : > { %366 = vst.msk [vmem:[#allocation2 + $0x4] sm:$0x3] %vm351_vm3, %v364_v29  ;;  %352 = vst.msk [vmem:[#allocation2] sm:$0x3] %vm351_vm3, %v349_v30 }
  0x8e   : > { %v370_v31 = vpop.permute.xlu1 %369  ;;  %v357_v32 = vpop.permute.xlu0 %356 }
  0x8f   : > { %372 = vst.msk [vmem:[#allocation2 + $0x6] sm:$0x3] %vm351_vm3, %v370_v31  ;;  %359 = vst.msk [vmem:[#allocation2 + $0x2] sm:$0x3] %vm351_vm3, %v357_v32 }
  0x94   : > { %v608_v5 = vpop.permute.xlu0 %607 }
  0x96   : > { %v373_v33 = vld [vmem:[#allocation2] sm:$0xff] }
  0x97   : > { %v374_v34 = vpack.c.bf16 %v373_v33, %v373_v33 }
  0x99   : > { %1304 = vmatmul.mubr.msk.bf16.vlgmr.msra.gmra.mxu0 %vm435_vm2, %v374_v34 }
  0x9a   : > { %717 = vmatpush1.bf16.msra.mxu0 %v1563_v13  ;;  %740 = vmatprep.mubr.bf16.mxu0 %v1458_v9 }
  0x9b   : > { %718 = vmatprep.subr.bf16.mxu0 %v1577_v17 }
  0x9e   : > { %719 = vmatpush1.bf16.msra.mxu0 %v1585_v19 }
  0x9f   : > { %720 = vmatprep.subr.bf16.mxu0 %v1594_v21 }
  0xa2   : > { %721 = vmatpush1.bf16.msra.mxu0 %v1600_v22 }
  0xa3   : > { %722 = vmatprep.subr.bf16.mxu0 %v1606_v23 }
  0xa6   : > { %723 = vmatpush1.bf16.msra.mxu0 %v1616_v26 }
  0xa7   : > { %1044 = vmatprep.subr.bf16.mxu0 %v1555_v11 }
  0xed   : > { %v581_v35 = vpop.f32.mrf.mxu1 }
  0xef   : > { %v583_v36 = vpop.f32.mrf.mxu1 }
  0xf1   : > { %v585_v37 = vpop.f32.mrf.mxu1 }
  0xf3   : > { %v586_v38 = vpop.f32.mrf.mxu1 }
 0x159   : > { %v473_v46 = vpop.f32.mrf.mxu0 }
 0x15a   : > { %v474_v47 = vadd.f32 %v473_v46, %v388_v44 }
 0x15b   : > { %v475_v48 = vpop.f32.mrf.mxu0 }
 0x15c   : > { %480 = vst [vmem:[#allocation3] sm:$0xff] %v474_v47  ;;  %v476_v49 = vadd.f32 %v475_v48, %v392_v45 }
 0x15d   : > { %v477_v50 = vpop.f32.mrf.mxu0 }
 0x15e   : > { %481 = vst [vmem:[#allocation3 + $0x8] sm:$0xff] %v476_v49 }
 0x15f   : > { %v478_v52 = vpop.f32.mrf.mxu0 }
 0x163   : > { %v493_v54 = vld [vmem:[#allocation3] sm:$0x3]  ;;  %v653_v18 = vld [vmem:[#allocation3] sm:$0xc]  ;;  %v816_v46 = vld [vmem:[#allocation3] sm:$0x30] }
 0x164   : > { %v588_v55 = vadd.f32 %v581_v35, %v493_v54 }
 0x165   : > { %v494_v56 = vld [vmem:[#allocation3 + $0x8] sm:$0x3]  ;;  %v654_v25 = vld [vmem:[#allocation3 + $0x8] sm:$0xc]  ;;  %v817_v50 = vld [vmem:[#allocation3 + $0x8] sm:$0x30] }
 0x166   : > { %v590_v57 = vmul.f32 0.5, %v588_v55  ;;  %v589_v58 = vadd.f32 %v583_v36, %v494_v56 }
 0x168   : > { %1396 = vtanh.f32 %v590_v57  ;;  %v591_v59 = vmul.f32 0.5, %v589_v58 }
 0x16a   : > { %v597_v60 = vsel %vm488_vm4, %v589_v58, %v591_v59 }
 0x16b   : > { %1398 = vtanh.f32 %v597_v60 }
 0x175   : > { %v1397_v61 = vpop.eup %1396 }
 0x176   : > { %v600_v63 = vmul.f32 0.5, %v1397_v61 }
 0x178   : > { %v1399_v62 = vpop.eup %1398  ;;  %v602_v2 = vadd.f32 0.5, %v600_v63 }
 0x179   : > { %v601_v0 = vmul.f32 0.5, %v1399_v62 }
 0x17a   : > { %v610_v6 = vmul.f32 %v608_v5, %v602_v2 }
 0x17b   : > { %v603_v1 = vadd.f32 0.5, %v601_v0 }
 0x17d   : > { %v605_v3 = vsel %vm488_vm4, %v1399_v62, %v603_v1 }
 0x17e   : > { %v611_v4 = vmul.f32 %v605_v3, %v602_v2 }
 0x180   : > { %613 = vrot.lane.b32.xlu1 %v611_v4, %s1459_s14 }
 0x1f2   : > { %v614_v7 = vpop.permute.xlu1 %613 }
 0x1f3   : > { %v616_v8 = vadd.f32 %v614_v7, %v610_v6  ;;  %v1460_v7 = vmov 1966171168  }
 0x1f5   : > { %1400 = vtanh.f32 %v616_v8  ;;  %v770_v29 = vrot.slane %v616_v8, 6  ;;  %v622_v8 = vunpack.c.l.s4 %v1460_v7 }
 0x202   : > { %v1401_v10 = vpop.eup %1400 }
 0x203   : > { %v1656_v11 = vmul.f32 %v1401_v10, %v605_v3 }
 0x205   : > { %v1660_v12 = vpack.c.bf16 %v1656_v11, %v1656_v11 }
 0x207   : > { %663 = vrot.lane.b32.xlu0 %v1660_v12, %s1459_s14 }
 0x279   : > { %v664_v14 = vpop.permute.xlu0 %663 }
 0x27a   : > { %1323 = vmatmul.mubr.msk.bf16.vlgmr.msra.gmra.mxu0 %vm435_vm2, %v664_v14 }
 0x27b   : > { %1045 = vmatpush1.bf16.msra.mxu0 %v1563_v13  ;;  %1068 = vmatprep.mubr.bf16.mxu0 %v1458_v9 }
 0x27c   : > { %1046 = vmatprep.subr.bf16.mxu0 %v1577_v17 }
 0x27f   : > { %1047 = vmatpush1.bf16.msra.mxu0 %v1585_v19 }
 0x280   : > { %1048 = vmatprep.subr.bf16.mxu0 %v1594_v21 }
 0x283   : > { %1049 = vmatpush1.bf16.msra.mxu0 %v1600_v22 }
 0x284   : > { %1050 = vmatprep.subr.bf16.mxu0 %v1606_v23 }
 0x287   : > { %1051 = vmatpush1.bf16.msra.mxu0 %v1616_v26 }
 0x33a   : > { %v742_v15 = vpop.f32.mrf.mxu0 }
 0x33b   : > { %v751_v16 = vrot.slane %v742_v15, 6  ;;  %v623_v15 = vunpack.c.0.s8 %v622_v8 }
 0x33c   : > { %v744_v20 = vpop.f32.mrf.mxu0 }
 0x33d   : > { %v755_v24 = vadd.f32 %v751_v16, %v653_v18  ;;  %v752_v13 = vrot.slane %v744_v20, 6  ;;  %v1691_v18 = vsub.s32 %v623_v15, %v1641_v40 }
 0x33e   : > { %v746_v9 = vpop.f32.mrf.mxu0 }
 0x33f   : > { %v757_v27 = vmul.f32 0.5, %v755_v24  ;;  %v756_v17 = vadd.f32 %v752_v13, %v654_v25  ;;  %v627_v24 = vrot.slane %v1660_v12, %v1691_v18 }
 0x340   : > { %v747_v28 = vpop.f32.mrf.mxu0 }
 0x341   : > { %1402 = vtanh.f32 %v757_v27  ;;  %v758_v19 = vmul.f32 0.5, %v756_v17  ;;  %v634_v25 = vrot.slane %v627_v24, %v1691_v18  ;;  %v645_v28 = vld [vmem:[#allocation6] sm:$0x3] }
 0x343   : > { %v760_v21 = vsel %vm488_vm4, %v756_v17, %v758_v19 }
 0x344   : > { %1404 = vtanh.f32 %v760_v21 }
 0x34e   : > { %v1403_v22 = vpop.eup %1402 }
 0x34f   : > { %v763_v23 = vmul.f32 0.5, %v1403_v22 }
 0x351   : > { %v1405_v26 = vpop.eup %1404  ;;  %v765_v30 = vadd.f32 0.5, %v763_v23 }
 0x352   : > { %v764_v31 = vmul.f32 0.5, %v1405_v26 }
 0x353   : > { %v772_v32 = vmul.f32 %v770_v29, %v765_v30 }
 0x354   : > { %v766_v33 = vadd.f32 0.5, %v764_v31  ;;  %v980_v31 = vld [vmem:[#allocation3] sm:$0xc0] }
 0x356   : > { %v768_v34 = vsel %vm488_vm4, %v1405_v26, %v766_v33 }
 0x357   : > { %v773_v35 = vmul.f32 %v768_v34, %v765_v30 }
 0x359   : > { %775 = vrot.lane.b32.xlu1 %v773_v35, %s1459_s14  ;;  %v981_v35 = vld [vmem:[#allocation3 + $0x8] sm:$0xc0] }
 0x3cb   : > { %v776_v36 = vpop.permute.xlu1 %775 }
 0x3cc   : > { %v778_v37 = vadd.f32 %v776_v36, %v772_v32 }
 0x3ce   : > { %1406 = vtanh.f32 %v778_v37  ;;  %v934_v61 = vrot.slane %v778_v37, 6 }
 0x3db   : > { %v1407_v38 = vpop.eup %1406 }
 0x3dc   : > { %v1678_v39 = vmul.f32 %v1407_v38, %v768_v34 }
 0x3de   : > { %v781_v41 = vpack.c.bf16 %v1678_v39, %v1678_v39 }
 0x3e0   : > { %v826_v42 = vrot.slane %v781_v41, 1  ;;  %v789_v13 = vrot.slane %v781_v41, %v1691_v18 }
 0x3e2   : > { %827 = vrot.lane.b32.xlu0 %v826_v42, %s1459_s14  ;;  %v790_v9 = vcombine.high %v789_v13, %v789_v13 }
 0x3e4   : > { %v797_v40 = vrot.slane %v790_v9, %v1691_v18 }
 0x454   : > { %v828_v43 = vpop.permute.xlu0 %827 }
 0x455   : > { %1334 = vmatmul.mubr.msk.bf16.vlgmr.msra.gmra.mxu1 %vm435_vm2, %v828_v43 }
 0x515   : > { %v906_v44 = vpop.f32.mrf.mxu1 }
 0x516   : > { %v915_v45 = vrot.slane %v906_v44, 4 }
 0x517   : > { %v908_v47 = vpop.f32.mrf.mxu1 }
 0x518   : > { %v919_v48 = vadd.f32 %v915_v45, %v816_v46  ;;  %v916_v49 = vrot.slane %v908_v47, 4 }
 0x519   : > { %v910_v51 = vpop.f32.mrf.mxu1 }
 0x51a   : > { %v921_v52 = vmul.f32 0.5, %v919_v48  ;;  %v920_v54 = vadd.f32 %v916_v49, %v817_v50 }
 0x51b   : > { %v911_v55 = vpop.f32.mrf.mxu1 }
 0x51c   : > { %1408 = vtanh.f32 %v921_v52  ;;  %v922_v56 = vmul.f32 0.5, %v920_v54  ;;  %v810_v55 = vrot.slane %v1678_v39, 2 }
 0x51e   : > { %v924_v57 = vsel %vm488_vm4, %v920_v54, %v922_v56 }
 0x51f   : > { %1410 = vtanh.f32 %v924_v57 }
 0x529   : > { %v1409_v58 = vpop.eup %1408 }
 0x52a   : > { %v927_v59 = vmul.f32 0.5, %v1409_v58 }
 0x52c   : > { %v1411_v60 = vpop.eup %1410  ;;  %v929_v62 = vadd.f32 0.5, %v927_v59 }
 0x52d   : > { %v928_v63 = vmul.f32 0.5, %v1411_v60 }
 0x52e   : > { %v936_v0 = vmul.f32 %v934_v61, %v929_v62 }
 0x52f   : > { %v930_v1 = vadd.f32 0.5, %v928_v63 }
 0x531   : > { %v932_v2 = vsel %vm488_vm4, %v1411_v60, %v930_v1 }
 0x532   : > { %v937_v3 = vmul.f32 %v932_v2, %v929_v62 }
 0x534   : > { %939 = vrot.lane.b32.xlu1 %v937_v3, %s1459_s14 }
 0x5a6   : > { %v940_v4 = vpop.permute.xlu1 %939 }
 0x5a7   : > { %v942_v5 = vadd.f32 %v940_v4, %v936_v0 }
 0x5a9   : > { %1412 = vtanh.f32 %v942_v5  ;;  %v1098_v47 = vrot.slane %v942_v5, 6 }
 0x5b6   : > { %v1413_v6 = vpop.eup %1412 }
 0x5b7   : > { %v944_v10 = vmul.f32 %v1413_v6, %v932_v2 }
 0x5b9   : > { %v945_v14 = vpack.c.bf16 %v944_v10, %v944_v10  ;;  %v974_v20 = vrot.slane %v944_v10, 4 }
 0x5bb   : > { %v990_v16 = vrot.slane %v945_v14, 2  ;;  %v953_v27 = vrot.slane %v945_v14, %v1691_v18 }
 0x5bd   : > { %991 = vrot.lane.b32.xlu0 %v990_v16, %s1459_s14 }
 0x5c1   : > { %647 = vrot.lane.b32.xlu0 %v1656_v11, %s1459_s14  ;;  %v960_v11 = vrot.slane %v953_v27, %v1691_v18 }
 0x5c3   : > { %v961_v12 = vcombine.high %v960_v11, %v960_v11 }
 0x5c5   : > { %975 = vrot.lane.b32.xlu0 %v974_v20, %s1459_s14 }
 0x5c9   : > { %640 = vrot.lane.b32.xlu0 %v634_v25, %s1457_s20 }
 0x5cd   : > { %803 = vrot.lane.b32.xlu0 %v797_v40, %s1457_s20 }
 0x5d1   : > { %962 = vrot.lane.b32.xlu0 %v961_v12, %s1459_s14 }
 0x62f   : > { %v992_v17 = vpop.permute.xlu0 %991 }
 0x630   : > { %1345 = vmatmul.mubr.msk.bf16.vlgmr.msra.gmra.mxu0 %vm435_vm2, %v992_v17 }
 0x633   : > { %v648_v19 = vpop.permute.xlu0 %647 }
 0x634   : > { %v650_v21 = vadd.f32 %v648_v19, %v645_v28 }
 0x636   : > { %652 = vst.msk [vmem:[#allocation6] sm:$0x3] %vm651_vm5, %v650_v21 }
 0x637   : > { %v976_v22 = vpop.permute.xlu0 %975 }
 0x63b   : > { %v641_v23 = vpop.permute.xlu0 %640 }
 0x63c   : > { %1314 = vst.msk [vmem:[%s1530_s19 + $0x3] sm:$0x1] %vm638_vm6, %v641_v23 }
 0x63d   : > { %v808_v53 = vld [vmem:[#allocation6] sm:$0x3] }
 0x63f   : > { %v804_v26 = vpop.permute.xlu0 %803 }
 0x640   : > { %1325 = vst.msk [vmem:[%s1530_s19 + $0x2] sm:$0x1] %vm638_vm6, %v804_v26 }
 0x643   : > { %v963_v61 = vpop.permute.xlu0 %962 }
 0x644   : > { %1335 = vst.msk [vmem:[%s1517_s9 + $0x2] sm:$0x1] %vm638_vm6, %v963_v61 }
 0x6f0   : > { %v1070_v29 = vpop.f32.mrf.mxu0 }
 0x6f1   : > { %v1079_v30 = vrot.slane %v1070_v29, 2 }
 0x6f2   : > { %v1072_v32 = vpop.f32.mrf.mxu0 }
 0x6f3   : > { %v1083_v33 = vadd.f32 %v1079_v30, %v980_v31  ;;  %v1080_v34 = vrot.slane %v1072_v32, 2 }
 0x6f4   : > { %v1074_v36 = vpop.f32.mrf.mxu0 }
 0x6f5   : > { %v1085_v37 = vmul.f32 0.5, %v1083_v33  ;;  %v1084_v38 = vadd.f32 %v1080_v34, %v981_v35 }
 0x6f6   : > { %v1075_v41 = vpop.f32.mrf.mxu0 }
 0x6f7   : > { %1414 = vtanh.f32 %v1085_v37  ;;  %v1086_v42 = vmul.f32 0.5, %v1084_v38 }
 0x6f9   : > { %v1088_v43 = vsel %vm488_vm4, %v1084_v38, %v1086_v42 }
 0x6fa   : > { %1416 = vtanh.f32 %v1088_v43 }
 0x704   : > { %v1415_v44 = vpop.eup %1414 }
 0x705   : > { %v1091_v45 = vmul.f32 0.5, %v1415_v44 }
 0x707   : > { %v1417_v46 = vpop.eup %1416  ;;  %v1093_v48 = vadd.f32 0.5, %v1091_v45 }
 0x708   : > { %v1092_v49 = vmul.f32 0.5, %v1417_v46 }
 0x709   : > { %v1100_v50 = vmul.f32 %v1098_v47, %v1093_v48 }
 0x70a   : > { %v1094_v51 = vadd.f32 0.5, %v1092_v49 }
 0x70c   : > { %v1096_v52 = vsel %vm488_vm4, %v1417_v46, %v1094_v51 }
 0x70d   : > { %v1101_v54 = vmul.f32 %v1096_v52, %v1093_v48 }
 0x70f   : > { %1103 = vrot.lane.b32.xlu1 %v1101_v54, %s1459_s14 }
 0x713   : > { %811 = vrot.lane.b32.xlu1 %v810_v55, %s1459_s14 }
 0x717   : > { %635 = vrot.lane.b32.xlu1 %v634_v25, %s1459_s14 }
 0x71b   : > { %798 = vrot.lane.b32.xlu1 %v797_v40, %s1459_s14 }
 0x71f   : > { %967 = vrot.lane.b32.xlu1 %v961_v12, %s1457_s20 }
 0x781   : > { %v1104_v56 = vpop.permute.xlu1 %1103 }
 0x782   : > { %v1106_v57 = vadd.f32 %v1104_v56, %v1100_v50 }
 0x784   : > { %1418 = vtanh.f32 %v1106_v57 }
 0x785   : > { %v812_v58 = vpop.permute.xlu1 %811 }
 0x786   : > { %v814_v59 = vadd.f32 %v812_v58, %v808_v53 }
 0x788   : > { %815 = vst.msk [vmem:[#allocation6] sm:$0x3] %vm651_vm5, %v814_v59 }
 0x789   : > { %v636_v39 = vpop.permute.xlu1 %635 }
 0x78a   : > { %639 = vst.msk [vmem:[%s1517_s9] sm:$0x1] %vm638_vm6, %v636_v39 }
 0x78d   : > { %v799_v60 = vpop.permute.xlu1 %798 }
 0x78e   : > { %1324 = vst.msk [vmem:[%s1517_s9 + $0x1] sm:$0x1] %vm638_vm6, %v799_v60 }
 0x78f   : > { %v972_v62 = vld [vmem:[#allocation6] sm:$0x3] }
 0x790   : > { %v978_v63 = vadd.f32 %v976_v22, %v972_v62 }
 0x791   : > { %v1419_v0 = vpop.eup %1418  ;;  %v968_v1 = vpop.permute.xlu1 %967 }
 0x792   : > { %979 = vst.msk [vmem:[#allocation6] sm:$0x3] %vm651_vm5, %v978_v63  ;;  %v1108_v2 = vmul.f32 %v1419_v0, %v1096_v52 }
 0x793   : > { %1336 = vst.msk [vmem:[%s1530_s19 + $0x1] sm:$0x1] %vm638_vm6, %v968_v1 }
 0x794   : > { %v1138_v3 = vrot.slane %v1108_v2, 6  ;;  %v1109_v4 = vpack.c.bf16 %v1108_v2, %v1108_v2 }
 0x796   : > { %1139 = vrot.lane.b32.xlu1 %v1138_v3, %s1459_s14  ;;  %v1117_v5 = vrot.slane %v1109_v4, %v1691_v18 }
 0x798   : > { %v1118_v6 = vcombine.high %v1117_v5, %v1117_v5 }
 0x799   : > { %v1136_v10 = vld [vmem:[#allocation6] sm:$0x3] }
 0x79a   : > { %v1125_v7 = vrot.slane %v1118_v6, %v1691_v18 }
 0x79c   : > { %v1126_v8 = vcombine.high %v1125_v7, %v1125_v7 }
 0x79e   : > { %1127 = vrot.lane.b32.xlu0 %v1126_v8, %s1459_s14  ;;  %1132 = vrot.lane.b32.xlu1 %v1126_v8, %s1457_s20 }
 0x7a2   : > { %1144 = vrot.lane.b32.xlu0 %v1108_v2, %s1459_s14  ;;  %1150 = vrot.lane.b32.xlu1 %v1106_v57, %s1459_s14 }
 0x808   : > { %v1140_v14 = vpop.permute.xlu1 %1139 }
 0x809   : > { %v1142_v15 = vadd.f32 %v1140_v14, %v1136_v10 }
 0x80b   : > { %1143 = vst.msk [vmem:[#allocation6] sm:$0x3] %vm651_vm5, %v1142_v15 }
 0x810   : > { %v1128_v16 = vpop.permute.xlu0 %1127  ;;  %v1133_v20 = vpop.permute.xlu1 %1132 }
 0x811   : > { %1346 = vst.msk [vmem:[%s1517_s9 + $0x3] sm:$0x1] %vm638_vm6, %v1128_v16  ;;  %1135 = vst.msk [vmem:[%s1530_s19] sm:$0x1] %vm638_vm6, %v1133_v20  ;;  %1157 = sbr.rel (%p1347_p6) target bundleno = 2074 (0x81a), region = 48 }
 0x814   : > { %v1145_v18 = vpop.permute.xlu0 %1144  ;;  %v1151_v24 = vpop.permute.xlu1 %1150 }
 0x815   : > { %1148 = vst.msk [vmem:[#allocation4 - $0x6] sm:$0xc0] %vm1147_vm7, %v1145_v18  ;;  %1153 = vst.msk [vmem:[#allocation5 - $0x6] sm:$0xc0] %vm1147_vm7, %v1151_v24 }
 0x816   : > { %v1158_v13 = vld [vmem:[#allocation6] sm:$0x3] }
 0x817   : > { %v1159_v25 = vmul.f32 0.125, %v1158_v13 }
 0x819   : > { %1160 = vst.msk [vmem:[#allocation6] sm:$0x3] %vm651_vm5, %v1159_v25 }
 0x81a PF: > { %p1356_p7 = scmp.eq.s32.totalorder %s1508_s25, 1  ;;  %s1461_s20 = smov [#allocation6]  }
 0x81b   : > { %s1186_s9 = sshll.u32 %s1461_s20, 4  ;;  %s1187_s9 = int_to_ptr.vmem [resolvable:$true] %s1186_s9 }
 0x81c   : > { %s1420_s19 = scalar_lea.vmem %s1187_s9, 32  ;;  %p1427_p11 = scmp.lt.s32.totalorder %s1187_s9, %s1187_s9 }
 0x81d   : > { %p1421_p8 = scmp.ne.s32.totalorder %s1187_s9, %s1420_s19  ;;  %p1428_p12 = scmp.lt.s32.totalorder %s1420_s19, %s1420_s19 }
 0x81f   : > { %p1422_p9 = pnand %p1421_p8, %p1356_p7  ;;  %p1429_p13 = por %p1428_p12, %p1427_p11 }
 0x821   : > { %p1423_p10 = pneg %p1422_p9 }
 0x823   : > { %p1430_p0 = pnand %p1429_p13, %p1423_p10 }
 0x825   : > { %1433 = shalt.err (!%p1430_p0)
}
 0x826   : > { %1353 = dma.vmem_to_hbm [thread:$0]  (%p1356_p7), %s1187_s9, 32, %s1768_s7, [#allocation7]  }
 0x827   : > { %1449 = dma.done.wait (%p1356_p7), [#allocation7], 32  }
 0x828   : > { %1451 = vsyncadd (%p1356_p7), [#allocation7], 4294967264 }
 0x829 PF: > { %s19_s24 = sadd.s32 1, %s1454_s24  }
 0x82a   : > { %p16_p1 = scmp.ge.s32.totalorder %s19_s24, 4  }
 0x82c   :  { %18 = sbr.rel (!%p16_p1) target bundleno = 1 (0x1), region = 114 }
 0x831   :  { %1214 = vsyncpa [#allocation7], 1 }
 0x832   :  { %1216 = vsyncpa [#allocation7 + $0x1], 1 }

// kernel: bilstm_encoder_forward.7
= control target key start
LH: loop header
LB: loop body
LE: loop exit
PB: predicated region body
PF: predicated region fallthrough
CT: control target
= control target key end

     0   :  { %s2582_s0 = inlined_call_operand.vmem [shape: bf16[8,2,32], index: 0, kind: input, shape index: {}, may-alias: {0,2}]   ;;  %s2583_s1 = inlined_call_operand.vmem [shape: bf16[8,2,32], index: 1, kind: input, shape index: {}, may-alias: {1,3}]   ;;  %s2584_s2 = inlined_call_operand.vmem [shape: bf16[8,2,32], index: 2, kind: input, shape index: {}, may-alias: {0,2}]   ;;  %s2585_s3 = inlined_call_operand.vmem [shape: bf16[8,2,32], index: 3, kind: input, shape index: {}, may-alias: {1,3}]   ;;  %s2586_s4 = inlined_call_operand.vmem [shape: bf16[128,256], index: 4, kind: input, shape index: {}]   ;;  %s2587_s5 = inlined_call_operand.vmem [shape: f32[1,256], index: 5, kind: input, shape index: {}]   ;;  %s2588_s6 = inlined_call_operand.vmem [shape: bf16[64,256], index: 6, kind: input, shape index: {}]   ;;  %s2589_s7 = inlined_call_operand.hbm [shape: bf16[8,2,32], index: 7, kind: output, shape index: {0}]   ;;  %s2590_s8 = inlined_call_operand.hbm [shape: bf16[8,2,32], index: 8, kind: output, shape index: {1}]   ;;  %s2591_s9 = inlined_call_operand.hbm [shape: f32[2,64], index: 9, kind: output, shape index: {2}]  }
   0x1   :  { %2606 = sst [smem:[#allocation24_spill]] %s2591_s9 }
   0x2   :  { %15 = vsyncpa [#allocation7], 0 }
   0x3   :  { %17 = vsyncpa [#allocation7 + $0x1], 0 }
   0x4   :  { %18 = vsyncpa [#allocation9], 0 }
   0x5   :  { %20 = vsyncpa [#allocation9 + $0x1], 0  ;;  %s2101_s30 = smov 0   ;;  %s2103_s10 = smov 0  }
   0x6   :  { %s2105_s11 = smov 0   ;;  %s2107_s12 = smov 0  }
   0x7   :  { %s2109_s13 = smov 0   ;;  %s2111_s14 = smov 0  }
   0x8   :  { %s2113_s15 = smov 0  }
   0x9 LB: > { %2607 = sst [smem:[#allocation14_spill]] %s2017_s10  ;;  %s2137_s16 = sadd.s32 4294967295, %s2037_s15   ;;  %s2037_s15 = sphi %s2113_s15, %s2634_s15   ;;  %s2033_s14 = sphi %s2111_s14, %s2639_s14   ;;  %s2029_s13 = sphi %s2109_s13, %s2641_s13   ;;  %s2025_s12 = sphi %s2107_s12, %s2640_s12   ;;  %s2021_s11 = sphi %s2105_s11, %s2637_s11   ;;  %s2017_s10 = sphi %s2103_s10, %s2636_s10   ;;  %s2013_s30 = sphi %s2101_s30, %s2635_s30  }
   0xa   : > { %2608 = sst [smem:[#allocation15_spill]] %s2021_s11  ;;  %s2592_s17 = sadd.s32 4294967294, %s2037_s15  }
   0xb   : > { %2609 = sst [smem:[#allocation16_spill]] %s2025_s12  ;;  %s2141_s18 = sadd.s32 1, %s2037_s15  }
   0xc   : > { %2610 = sst [smem:[#allocation17_spill]] %s2033_s14  ;;  %s204_s19 = sadd.s32 1, %s2033_s14 }
   0xd   : > { %2611 = sst [smem:[#allocation18_spill]] %s2037_s15  ;;  %s201_s20 = ssub.s32 %s2037_s15, %s2141_s18 }
   0xe   : > { %2612 = sst [smem:[#allocation19_spill]] %s2141_s18  ;;  %p214_p0 = scmp.ne.s32.totalorder %s2033_s14, %s2029_s13 }
   0xf   : > { %p202_p1 = scmp.eq.s32.totalorder %s201_s20, 0  ;;  %p2605_p2 = scmp.eq.s32.totalorder %s2137_s16, 1 }
  0x10   : > { %p220_p3 = scmp.ne.s32.totalorder %s2029_s13, %s2025_s12  ;;  %p2153_p4 = scmp.eq.s32.totalorder %s2592_s17, 1 }
  0x11   : > { %s2158_s22 = scalar_select %p202_p1, %s2033_s14, %s204_s19  }
  0x12   : > { %p2162_p5 = por %p2605_p2, %p214_p0  ;;  %p2168_p6 = por %p2153_p4, %p220_p3 }
  0x13   : > { %2614 = sst [smem:[#allocation20_spill]] %s2158_s22  ;;  %s227_s25 = ssub.s32 1, %s2037_s15 }
  0x14   : > { %s2616_s24 = scalar_select %p2168_p6, 1, 0 }
  0x15   : > { %s228_s26 = ssub.s32 1, %s2141_s18  ;;  %s232_s28 = sadd.s32 1, %s2021_s11 }
  0x16   : > { %2617 = sst [smem:[#allocation21_spill]] %s2616_s24  ;;  %s229_s27 = ssub.s32 %s227_s25, %s228_s26 }
  0x17   : > { %p230_p7 = scmp.eq.s32.totalorder %s229_s27, 0  ;;  %p242_p8 = scmp.ne.s32.totalorder %s2021_s11, %s2017_s10 }
  0x18   : > { %p248_p9 = scmp.ne.s32.totalorder %s2017_s10, %s2013_s30  ;;  %p1630_p10 = scmp.ge.s32.totalorder %s2037_s15, 1 }
  0x19   : > { %s2181_s29 = scalar_select %p230_p7, %s2021_s11, %s232_s28  }
  0x1a   : > { %p2185_p11 = por %p242_p8, %p2605_p2  ;;  %p2191_p12 = por %p248_p9, %p2153_p4 }
  0x1b   : > { %2618 = sst [smem:[#allocation22_spill]] %s2181_s29  ;;  %p333_p13 = scmp.lt.s32.totalorder %s2037_s15, 3 }
  0x1c   : > { %s2620_s20 = scalar_select %p2191_p12, 1, 0 }
  0x1d   : > { %p334_p0 = pnand %p1630_p10, %p333_p13 }
  0x1e   : > { %2621 = sst [smem:[#allocation23_spill]] %s2620_s20  ;;  %s2599_s30 = sand.u32 (!%p334_p0), 1, %s2029_s13  }
  0x1f   : > { %337 = sbr.rel (%p334_p0) target bundleno = 2188 (0x88c), region = 48  ;;  %s382_s25 = sand.u32 (!%p334_p0), 1, %s2017_s10  }
  0x20   : > { %s1631_s26 = sshll.u32 (!%p334_p0), %s2599_s30, 2  ;;  %s1632_s27 = sshll.u32 (!%p334_p0), %s382_s25, 2 }
  0x21   : > { %s1633_s28 = sshll.u32 (!%p334_p0), %s2137_s16, 2  ;;  %s2602_s21 = ssub.s32 (!%p334_p0), 1, %s2137_s16 }
  0x22   : > { %p388_p1 = scmp.lt.s32.totalorder (!%p334_p0), %s1633_s28, 7  ;;  %s1635_s17 = sshll.u32 (!%p334_p0), %s2602_s21, 2 }
  0x23   : > { %p399_p3 = scmp.lt.s32.totalorder (!%p334_p0), %s1635_s17, 7  ;;  %s2220_s15 = scalar_lea.vmem (!%p334_p0), [#allocation6], %s1631_s26 }
  0x24   : > { %s2643_s28 = smov (!%p388_p1, %s1633_s28), 7  ;;  %s2222_s9 = scalar_lea.vmem [#allocation8], %s1632_s27 }
  0x25   : > { %s2645_s17 = smov (!%p399_p3, %s1635_s17), 7  ;;  %s2207_s29 = scalar_lea.vmem %s2582_s0, %s2643_s28 }
  0x26   : > { %s395_s10 = scalar_lea.vmem %s2583_s1, %s2643_s28  ;;  %s401_s25 = scalar_lea.vmem %s2584_s2, %s2645_s17 }
  0x27   : > { %s2218_s21 = scalar_lea.vmem %s2585_s3, %s2645_s17  ;;  %p1637_p4 = scmp.ne.s32.totalorder %s2137_s16, 0 }
  0x29   : > { %418 = sbr.rel (%p1637_p4) target bundleno = 49 (0x31), region = 52 }
  0x2e   : > { %vm419_vm0 = vcmask 517120   ;;  %v2039_v0 = vmov 0.0  }
  0x2f   : > { %420 = vst.msk [vmem:[#allocation4] sm:$0x3] %vm419_vm0, %v2039_v0  ;;  %421 = vst.msk [vmem:[#allocation5] sm:$0x3] %vm419_vm0, %v2039_v0 }
  0x30   : > { %422 = vst.msk [vmem:[#allocation10] sm:$0x3] %vm419_vm0, %v2039_v0 }
  0x31 PF: > { %v445_v1 = vlaneseq  ;;  %v1644_v2 = vld [vmem:[%s401_s25 + $0x3] sm:$0x1]  ;;  %v2040_v3 = vmov 1983009808   ;;  %v1645_v5 = vld [vmem:[%s401_s25 + $0x2] sm:$0x1] }
  0x32   : > { %v443_v4 = vunpack.c.l.s4 %v2040_v3  ;;  %v439_v6 = vld [vmem:[%s395_s10] sm:$0x1]  ;;  %v1641_v7 = vld [vmem:[%s395_s10 + $0x1] sm:$0x1]  ;;  %v501_v9 = vunpack.c.l.bf16 %v1644_v2  ;;  %v517_v13 = vunpack.c.l.bf16 %v1645_v5  ;;  %v1642_v16 = vld [vmem:[%s395_s10 + $0x2] sm:$0x1] }
  0x33   : > { %v2226_v8 = vshrl.u32 %v445_v1, 7  ;;  %v1646_v10 = vld [vmem:[%s401_s25 + $0x1] sm:$0x1]  ;;  %v545_v11 = vld [vmem:[%s401_s25] sm:$0x1]  ;;  %v440_v14 = vunpack.c.l.bf16 %v439_v6  ;;  %v456_v15 = vunpack.c.l.bf16 %v1641_v7  ;;  %v471_v21 = vunpack.c.l.bf16 %v1642_v16  ;;  %s2041_s26 = smov 64  }
  0x34   : > { %v444_v12 = vunpack.c.0.s8 %v443_v4  ;;  %v1643_v17 = vld [vmem:[%s395_s10 + $0x3] sm:$0x1]  ;;  %v1649_v18 = vld [vmem:[%s2218_s21 + $0x1] sm:$0x1]  ;;  %v532_v19 = vunpack.c.l.bf16 %v1646_v10  ;;  %v546_v20 = vunpack.c.l.bf16 %v545_v11  ;;  %v605_v23 = vld [vmem:[%s2218_s21] sm:$0x1] }
  0x35   : > { %v486_v22 = vunpack.c.l.bf16 %v1643_v17  ;;  %v1647_v24 = vld [vmem:[%s2218_s21 + $0x3] sm:$0x1]  ;;  %v1648_v25 = vld [vmem:[%s2218_s21 + $0x2] sm:$0x1]  ;;  %v1835_v27 = vld [vmem:[%s2586_s4 + $0x74] ss:$8 sps:$4 sm:$0xff]   ;;  %v592_v28 = vunpack.c.l.bf16 %v1649_v18  ;;  %v606_v29 = vunpack.c.l.bf16 %v605_v23 }
  0x36   : > { %v447_v26 = vsub.s32 %v444_v12, %v2226_v8  ;;  %v561_v30 = vunpack.c.l.bf16 %v1647_v24  ;;  %v577_v31 = vunpack.c.l.bf16 %v1648_v25  ;;  %v1837_v32 = vld [vmem:[%s2586_s4 + $0x70] ss:$8 sps:$4 sm:$0xff]   ;;  %729 = vmatprep.subr.bf16.mxu0 %v1835_v27  ;;  %v1838_v37 = vld [vmem:[%s2586_s4 + $0x64] ss:$8 sps:$4 sm:$0xff]   ;;  %v1840_v42 = vld [vmem:[%s2586_s4 + $0x60] ss:$8 sps:$4 sm:$0xff]  }
  0x37   : > { %730 = vmatpush1.bf16.msra.mxu0 %v1837_v32  ;;  %v1841_v43 = vld [vmem:[%s2586_s4 + $0x54] ss:$8 sps:$4 sm:$0xff]   ;;  %v423_v46 = vld [vmem:[%s2207_s29] sm:$0x1]  ;;  %vm425_vm1 = vcmask 254976   ;;  %s2042_s27 = smov 32  }
  0x38   : > { %v509_v33 = vrot.slane %v501_v9, %v447_v26  ;;  %v525_v34 = vrot.slane %v517_v13, %v447_v26  ;;  %v448_v35 = vrot.slane %v440_v14, %v447_v26  ;;  %v464_v36 = vrot.slane %v456_v15, %v447_v26  ;;  %731 = vmatprep.subr.bf16.mxu0 %v1838_v37  ;;  %v1638_v47 = vld [vmem:[%s2207_s29 + $0x1] sm:$0x1]  ;;  %v1639_v56 = vld [vmem:[%s2207_s29 + $0x2] sm:$0x1]  ;;  %v1640_v57 = vld [vmem:[%s2207_s29 + $0x3] sm:$0x1] }
  0x39   : > { %v540_v38 = vrot.slane %v532_v19, %v447_v26  ;;  %v554_v39 = vrot.slane %v546_v20, %v447_v26  ;;  %v479_v40 = vrot.slane %v471_v21, %v447_v26  ;;  %v494_v41 = vrot.slane %v486_v22, %v447_v26  ;;  %v1843_v58 = vld [vmem:[%s2586_s4 + $0x50] ss:$8 sps:$4 sm:$0xff]   ;;  %v1844_v61 = vld [vmem:[%s2586_s4 + $0x44] ss:$8 sps:$4 sm:$0xff]   ;;  %v1846_v2 = vld [vmem:[%s2586_s4 + $0x40] ss:$8 sps:$4 sm:$0xff]  }
  0x3a   : > { %v1815_v44 = vpack.i.bf16 %v525_v34, %v509_v33  ;;  %v1805_v45 = vpack.i.bf16 %v464_v36, %v448_v35  ;;  %v600_v50 = vrot.slane %v592_v28, %v447_v26  ;;  %v614_v51 = vrot.slane %v606_v29, %v447_v26  ;;  %v1852_v3 = vld [vmem:[%s2588_s6 + $0x34] ss:$8 sps:$4 sm:$0xff]   ;;  %v2277_v4 = vld [vmem:[%s2588_s6 + $0x30] ss:$8 sps:$4 sm:$0xff]   ;;  %v2286_v6 = vld [vmem:[%s2588_s6 + $0x24] ss:$8 sps:$4 sm:$0xff]  }
  0x3b   : > { %v1820_v48 = vpack.i.bf16 %v554_v39, %v540_v38  ;;  %v1810_v49 = vpack.i.bf16 %v494_v41, %v479_v40  ;;  %v569_v52 = vrot.slane %v561_v30, %v447_v26  ;;  %v585_v53 = vrot.slane %v577_v31, %v447_v26  ;;  %732 = vmatpush1.bf16.msra.mxu0 %v1840_v42  ;;  %v1847_v5 = vld [vmem:[%s2586_s4 + $0x34] ss:$8 sps:$4 sm:$0xff]   ;;  %v2291_v7 = vld [vmem:[%s2588_s6 + $0x20] ss:$8 sps:$4 sm:$0xff]   ;;  %s2044_s25 = smov 96   ;;  %p1708_p7 = scmp.ne.s32.totalorder %s2137_s16, 1 }
  0x3c   : > { %1816 = vrot.lane.b32.xlu1 %v1815_v44, %s2041_s26  ;;  %1806 = vrot.lane.b32.xlu0 %v1805_v45, %s2042_s27  ;;  %v424_v54 = vunpack.c.l.bf16 %v423_v46  ;;  %v429_v55 = vunpack.c.l.bf16 %v1638_v47  ;;  %v433_v59 = vunpack.c.l.bf16 %v1639_v56  ;;  %v437_v60 = vunpack.c.l.bf16 %v1640_v57  ;;  %v1849_v9 = vld [vmem:[%s2586_s4 + $0x30] ss:$8 sps:$4 sm:$0xff]   ;;  %v1850_v10 = vld [vmem:[%s2586_s4 + $0x24] ss:$8 sps:$4 sm:$0xff]  }
  0x3d   : > { %733 = vmatprep.subr.bf16.mxu0 %v1841_v43  ;;  %v2043_v62 = vmov 0   ;;  %v1830_v63 = vpack.i.bf16 %v614_v51, %v600_v50  ;;  %v1825_v0 = vpack.i.bf16 %v585_v53, %v569_v52  ;;  %846 = vmatprep.subr.bf16.mxu1 %v1852_v3  ;;  %v2303_v11 = vld [vmem:[%s2588_s6 + $0x14] ss:$8 sps:$4 sm:$0xff]   ;;  %v2309_v12 = vld [vmem:[%s2588_s6 + $0x10] ss:$8 sps:$4 sm:$0xff]   ;;  %vm834_vm2 = vcmask 523264  }
  0x3e   : > { %426 = vst.msk [vmem:[#allocation2] sm:$0x3] %vm425_vm1, %v424_v54  ;;  %430 = vst.msk [vmem:[#allocation2 + $0x2] sm:$0x3] %vm425_vm1, %v429_v55  ;;  %761 = vmatprep.mubr.bf16.mxu0 %v2043_v62  ;;  %870 = vmatprep.mubr.bf16.mxu1 %v2043_v62  ;;  %v2315_v13 = vld [vmem:[%s2588_s6 + $0x4] ss:$8 sps:$4 sm:$0xff]  }
  0x3f   : > { %434 = vst.msk [vmem:[#allocation2 + $0x4] sm:$0x3] %vm425_vm1, %v433_v59  ;;  %438 = vst.msk [vmem:[#allocation2 + $0x6] sm:$0x3] %vm425_vm1, %v437_v60  ;;  %734 = vmatpush1.bf16.msra.mxu0 %v1843_v58  ;;  %847 = vmatpush1.bf16.msra.mxu1 %v2277_v4  ;;  %v782_v14 = vld [vmem:[#allocation5] sm:$0x3] }
  0x40   : > { %1821 = vrot.lane.b32.xlu1 %v1820_v48, %s2041_s26  ;;  %1811 = vrot.lane.b32.xlu0 %v1810_v49, %s2042_s27  ;;  %v1854_v15 = vld [vmem:[%s2586_s4 + $0x20] ss:$8 sps:$4 sm:$0xff]   ;;  %v1856_v16 = vld [vmem:[%s2586_s4 + $0x14] ss:$8 sps:$4 sm:$0xff]   ;;  %v781_v18 = vld [vmem:[#allocation4] sm:$0x3] }
  0x41   : > { %735 = vmatprep.subr.bf16.mxu0 %v1844_v61  ;;  %848 = vmatprep.subr.bf16.mxu1 %v2286_v6  ;;  %v2328_v17 = vld [vmem:[%s2588_s6] ss:$8 sps:$4 sm:$0xff]   ;;  %v1860_v19 = vld [vmem:[%s2586_s4 + $0x10] ss:$8 sps:$4 sm:$0xff]   ;;  %v1862_v20 = vld [vmem:[%s2586_s4 + $0x4] ss:$8 sps:$4 sm:$0xff]   ;;  %v785_v21 = vpack.c.bf16 %v781_v18, %v781_v18 }
  0x42   : > { %v1866_v22 = vld [vmem:[%s2586_s4] ss:$8 sps:$4 sm:$0xff]   ;;  %vm452_vm3 = vcmask 517376   ;;  %vm513_vm4 = vcmask 779776   ;;  %vm573_vm5 = vcmask 1042176   ;;  %v641_v47 = vsub.s32 0, %v2226_v8 }
  0x43   : > { %736 = vmatpush1.bf16.msra.mxu0 %v1846_v2  ;;  %849 = vmatpush1.bf16.msra.mxu1 %v2291_v7  ;;  %v637_v48 = vld [vmem:[%s2587_s5] sm:$0x3]  ;;  %v645_v49 = vsub.s32 1, %v2226_v8  ;;  %v773_v58 = vand.u32 127, %v445_v1  ;;  %vm942_vm7 = vcmask 517120   ;;  %vm929_vm8 = vcmask 253952  }
  0x44   : > { %1831 = vrot.lane.b32.xlu1 %v1830_v63, %s2044_s25  ;;  %1826 = vrot.lane.b32.xlu0 %v1825_v0, %s2044_s25  ;;  %v642_v50 = vrot.slane %v637_v48, %v641_v47  ;;  %vm1438_vm9 = vcmask 523270  }
  0x45   : > { %737 = vmatprep.subr.bf16.mxu0 %v1847_v5  ;;  %850 = vmatprep.subr.bf16.mxu1 %v2303_v11  ;;  %v646_v51 = vrot.slane %v637_v48, %v645_v49  ;;  %v2372_v60 = vadd.s32 128, %v773_v58 }
  0x47   : > { %738 = vmatpush1.bf16.msra.mxu0 %v1849_v9  ;;  %851 = vmatpush1.bf16.msra.mxu1 %v2309_v12  ;;  %vm778_vm6 = vcmp.lt.s32.totalorder %v2372_v60, 192 }
  0x48   : > { %898 = vrot.lane.b32.xlu0 %v782_v14, %s2041_s26  ;;  %739 = vmatprep.subr.bf16.mxu0 %v1850_v10 }
  0x49   : > { %852 = vmatprep.subr.bf16.mxu1 %v2315_v13 }
  0x4b   : > { %740 = vmatpush1.bf16.msra.mxu0 %v1854_v15  ;;  %853 = vmatpush1.bf16.msra.mxu1 %v2328_v17 }
  0x4c   : > { %741 = vmatprep.subr.bf16.mxu0 %v1856_v16  ;;  %1007 = vmatprep.subr.bf16.mxu1 %v1852_v3 }
  0x4e   : > { %1674 = vmatmul.mubr.msk.bf16.vlgmr.msra.gmra.mxu1 %vm834_vm2, %v785_v21 }
  0x4f   : > { %742 = vmatpush1.bf16.msra.mxu0 %v1860_v19  ;;  %1008 = vmatpush1.bf16.msra.mxu1 %v2277_v4 }
  0x50   : > { %743 = vmatprep.subr.bf16.mxu0 %v1862_v20  ;;  %1031 = vmatprep.mubr.bf16.mxu1 %v2043_v62 }
  0x51   : > { %1009 = vmatprep.subr.bf16.mxu1 %v2286_v6 }
  0x53   : > { %744 = vmatpush1.bf16.msra.mxu0 %v1866_v22  ;;  %1010 = vmatpush1.bf16.msra.mxu1 %v2291_v7 }
  0x54   : > { %1171 = vmatprep.subr.bf16.mxu0 %v1852_v3  ;;  %1011 = vmatprep.subr.bf16.mxu1 %v2303_v11 }
  0x57   : > { %1012 = vmatpush1.bf16.msra.mxu1 %v2309_v12 }
  0x58   : > { %1013 = vmatprep.subr.bf16.mxu1 %v2315_v13 }
  0x5b   : > { %1014 = vmatpush1.bf16.msra.mxu1 %v2328_v17 }
  0x5c   : > { %1335 = vmatprep.subr.bf16.mxu1 %v1852_v3 }
  0xae   : > { %v1817_v23 = vpop.permute.xlu1 %1816  ;;  %v1807_v24 = vpop.permute.xlu0 %1806 }
  0xaf   : > { %v1819_v25 = vunpack.i.h.bf16 %v1817_v23  ;;  %v1818_v26 = vunpack.i.l.bf16 %v1817_v23  ;;  %v1809_v27 = vunpack.i.h.bf16 %v1807_v24  ;;  %v1808_v28 = vunpack.i.l.bf16 %v1807_v24 }
  0xb1   : > { %453 = vst.msk [vmem:[#allocation2] sm:$0x3] %vm452_vm3, %v1808_v28  ;;  %468 = vst.msk [vmem:[#allocation2 + $0x2] sm:$0x3] %vm452_vm3, %v1809_v27 }
  0xb2   : > { %v1822_v29 = vpop.permute.xlu1 %1821  ;;  %v1812_v30 = vpop.permute.xlu0 %1811  ;;  %514 = vst.msk [vmem:[#allocation2] sm:$0x3] %vm513_vm4, %v1818_v26  ;;  %529 = vst.msk [vmem:[#allocation2 + $0x2] sm:$0x3] %vm513_vm4, %v1819_v25 }
  0xb3   : > { %v1824_v31 = vunpack.i.h.bf16 %v1822_v29  ;;  %v1823_v32 = vunpack.i.l.bf16 %v1822_v29  ;;  %v1814_v33 = vunpack.i.h.bf16 %v1812_v30  ;;  %v1813_v34 = vunpack.i.l.bf16 %v1812_v30 }
  0xb5   : > { %483 = vst.msk [vmem:[#allocation2 + $0x4] sm:$0x3] %vm452_vm3, %v1813_v34  ;;  %498 = vst.msk [vmem:[#allocation2 + $0x6] sm:$0x3] %vm452_vm3, %v1814_v33 }
  0xb6   : > { %v1832_v35 = vpop.permute.xlu1 %1831  ;;  %544 = vst.msk [vmem:[#allocation2 + $0x4] sm:$0x3] %vm513_vm4, %v1823_v32  ;;  %558 = vst.msk [vmem:[#allocation2 + $0x6] sm:$0x3] %vm513_vm4, %v1824_v31  ;;  %v1827_v36 = vpop.permute.xlu0 %1826 }
  0xb7   : > { %v1834_v37 = vunpack.i.h.bf16 %v1832_v35  ;;  %v1833_v38 = vunpack.i.l.bf16 %v1832_v35  ;;  %v1829_v39 = vunpack.i.h.bf16 %v1827_v36  ;;  %v1828_v40 = vunpack.i.l.bf16 %v1827_v36 }
  0xb9   : > { %604 = vst.msk [vmem:[#allocation2 + $0x4] sm:$0x3] %vm573_vm5, %v1833_v38  ;;  %618 = vst.msk [vmem:[#allocation2 + $0x6] sm:$0x3] %vm573_vm5, %v1834_v37 }
  0xba   : > { %574 = vst.msk [vmem:[#allocation2] sm:$0x3] %vm573_vm5, %v1828_v40  ;;  %589 = vst.msk [vmem:[#allocation2 + $0x2] sm:$0x3] %vm573_vm5, %v1829_v39  ;;  %v899_v20 = vpop.permute.xlu0 %898 }
  0xc1   : > { %v619_v41 = vld [vmem:[#allocation2] sm:$0xff] }
  0xc2   : > { %v620_v42 = vpack.c.bf16 %v619_v41, %v619_v41 }
  0xc4   : > { %762 = vmatmul.mubr.bf16.vlgmr.msra.gmra.mxu0 %v620_v42 }
  0xc5   : > { %1172 = vmatpush1.bf16.msra.mxu0 %v2277_v4  ;;  %1195 = vmatprep.mubr.bf16.mxu0 %v2043_v62 }
  0xc6   : > { %1173 = vmatprep.subr.bf16.mxu0 %v2286_v6 }
  0xc9   : > { %1174 = vmatpush1.bf16.msra.mxu0 %v2291_v7 }
  0xca   : > { %1175 = vmatprep.subr.bf16.mxu0 %v2303_v11 }
  0xcd   : > { %1176 = vmatpush1.bf16.msra.mxu0 %v2309_v12 }
  0xce   : > { %1177 = vmatprep.subr.bf16.mxu0 %v2315_v13 }
  0xd1   : > { %1178 = vmatpush1.bf16.msra.mxu0 %v2328_v17 }
 0x10e   : > { %v872_v43 = vpop.f32.mrf.mxu1 }
 0x110   : > { %v874_v44 = vpop.f32.mrf.mxu1 }
 0x112   : > { %v876_v45 = vpop.f32.mrf.mxu1 }
 0x114   : > { %v877_v46 = vpop.f32.mrf.mxu1 }
 0x184   : > { %v763_v52 = vpop.f32.mrf.mxu0 }
 0x185   : > { %v764_v53 = vadd.f32 %v763_v52, %v642_v50 }
 0x186   : > { %v765_v54 = vpop.f32.mrf.mxu0 }
 0x187   : > { %770 = vst [vmem:[#allocation3] sm:$0xff] %v764_v53  ;;  %v766_v55 = vadd.f32 %v765_v54, %v646_v51 }
 0x188   : > { %v767_v56 = vpop.f32.mrf.mxu0 }
 0x189   : > { %771 = vst [vmem:[#allocation3 + $0x8] sm:$0xff] %v766_v55 }
 0x18a   : > { %v768_v57 = vpop.f32.mrf.mxu0 }
 0x18e   : > { %v783_v59 = vld [vmem:[#allocation3] sm:$0x3]  ;;  %v944_v30 = vld [vmem:[#allocation3] sm:$0xc]  ;;  %v1107_v52 = vld [vmem:[#allocation3] sm:$0x30] }
 0x18f   : > { %v879_v61 = vadd.f32 %v872_v43, %v783_v59 }
 0x190   : > { %v784_v63 = vld [vmem:[#allocation3 + $0x8] sm:$0x3]  ;;  %v945_v33 = vld [vmem:[#allocation3 + $0x8] sm:$0xc]  ;;  %v1108_v56 = vld [vmem:[#allocation3 + $0x8] sm:$0x30] }
 0x191   : > { %v881_v0 = vmul.f32 0.5, %v879_v61  ;;  %v880_v2 = vadd.f32 %v874_v44, %v784_v63 }
 0x193   : > { %1871 = vtanh.f32 %v881_v0  ;;  %v882_v3 = vmul.f32 0.5, %v880_v2 }
 0x195   : > { %v888_v5 = vsel %vm778_vm6, %v880_v2, %v882_v3 }
 0x196   : > { %1873 = vtanh.f32 %v888_v5 }
 0x1a0   : > { %v1872_v9 = vpop.eup %1871 }
 0x1a1   : > { %v891_v14 = vmul.f32 0.5, %v1872_v9 }
 0x1a3   : > { %v1874_v10 = vpop.eup %1873  ;;  %v893_v16 = vadd.f32 0.5, %v891_v14 }
 0x1a4   : > { %v892_v15 = vmul.f32 0.5, %v1874_v10 }
 0x1a5   : > { %v901_v21 = vmul.f32 %v899_v20, %v893_v16 }
 0x1a6   : > { %v894_v1 = vadd.f32 0.5, %v892_v15 }
 0x1a8   : > { %v896_v18 = vsel %vm778_vm6, %v1874_v10, %v894_v1 }
 0x1a9   : > { %v902_v19 = vmul.f32 %v896_v18, %v893_v16 }
 0x1ab   : > { %904 = vrot.lane.b32.xlu1 %v902_v19, %s2041_s26 }
 0x21d   : > { %v905_v22 = vpop.permute.xlu1 %904 }
 0x21e   : > { %v907_v23 = vadd.f32 %v905_v22, %v901_v21 }
 0x220   : > { %1875 = vtanh.f32 %v907_v23  ;;  %v1061_v36 = vrot.slane %v907_v23, 6  ;;  %v2045_v23 = vmov 1966171168  }
 0x22d   : > { %v1876_v24 = vpop.eup %1875 }
 0x22e   : > { %v2380_v25 = vmul.f32 %v1876_v24, %v896_v18  ;;  %v913_v24 = vunpack.c.l.s4 %v2045_v23 }
 0x230   : > { %v2384_v26 = vpack.c.bf16 %v2380_v25, %v2380_v25 }
 0x232   : > { %954 = vrot.lane.b32.xlu0 %v2384_v26, %s2041_s26 }
 0x2a4   : > { %v955_v27 = vpop.permute.xlu0 %954 }
 0x2a5   : > { %1684 = vmatmul.mubr.msk.bf16.vlgmr.msra.gmra.mxu1 %vm834_vm2, %v955_v27 }
 0x2a6   : > { %1336 = vmatpush1.bf16.msra.mxu1 %v2277_v4  ;;  %1359 = vmatprep.mubr.bf16.mxu1 %v2043_v62 }
 0x2a7   : > { %1337 = vmatprep.subr.bf16.mxu1 %v2286_v6 }
 0x2aa   : > { %1338 = vmatpush1.bf16.msra.mxu1 %v2291_v7 }
 0x2ab   : > { %1339 = vmatprep.subr.bf16.mxu1 %v2303_v11 }
 0x2ae   : > { %1340 = vmatpush1.bf16.msra.mxu1 %v2309_v12 }
 0x2af   : > { %1341 = vmatprep.subr.bf16.mxu1 %v2315_v13 }
 0x2b2   : > { %1342 = vmatpush1.bf16.msra.mxu1 %v2328_v17 }
 0x365   : > { %v1033_v28 = vpop.f32.mrf.mxu1 }
 0x366   : > { %v1042_v29 = vrot.slane %v1033_v28, 6 }
 0x367   : > { %v1035_v31 = vpop.f32.mrf.mxu1 }
 0x368   : > { %v1046_v32 = vadd.f32 %v1042_v29, %v944_v30  ;;  %v1043_v4 = vrot.slane %v1035_v31, 6  ;;  %v914_v29 = vunpack.c.0.s8 %v913_v24 }
 0x369   : > { %v1037_v62 = vpop.f32.mrf.mxu1 }
 0x36a   : > { %v1048_v34 = vmul.f32 0.5, %v1046_v32  ;;  %v1047_v6 = vadd.f32 %v1043_v4, %v945_v33  ;;  %v2415_v30 = vsub.s32 %v914_v29, %v2226_v8 }
 0x36b   : > { %v1038_v35 = vpop.f32.mrf.mxu1 }
 0x36c   : > { %1877 = vtanh.f32 %v1048_v34  ;;  %v1049_v7 = vmul.f32 0.5, %v1047_v6  ;;  %v918_v32 = vrot.slane %v2384_v26, %v2415_v30  ;;  %v936_v35 = vld [vmem:[#allocation10] sm:$0x3] }
 0x36e   : > { %v1051_v11 = vsel %vm778_vm6, %v1047_v6, %v1049_v7  ;;  %v925_v33 = vrot.slane %v918_v32, %v2415_v30 }
 0x36f   : > { %1879 = vtanh.f32 %v1051_v11 }
 0x379   : > { %v1878_v12 = vpop.eup %1877 }
 0x37a   : > { %v1054_v13 = vmul.f32 0.5, %v1878_v12 }
 0x37c   : > { %v1880_v17 = vpop.eup %1879  ;;  %v1056_v37 = vadd.f32 0.5, %v1054_v13 }
 0x37d   : > { %v1055_v38 = vmul.f32 0.5, %v1880_v17 }
 0x37e   : > { %v1063_v39 = vmul.f32 %v1061_v36, %v1056_v37 }
 0x37f   : > { %v1057_v40 = vadd.f32 0.5, %v1055_v38 }
 0x381   : > { %v1059_v41 = vsel %vm778_vm6, %v1880_v17, %v1057_v40 }
 0x382   : > { %v1064_v42 = vmul.f32 %v1059_v41, %v1056_v37 }
 0x384   : > { %1066 = vrot.lane.b32.xlu1 %v1064_v42, %s2041_s26 }
 0x3f6   : > { %v1067_v43 = vpop.permute.xlu1 %1066 }
 0x3f7   : > { %v1069_v44 = vadd.f32 %v1067_v43, %v1063_v39  ;;  %v1271_v39 = vld [vmem:[#allocation3] sm:$0xc0]  ;;  %v1272_v43 = vld [vmem:[#allocation3 + $0x8] sm:$0xc0] }
 0x3f9   : > { %1881 = vtanh.f32 %v1069_v44  ;;  %v1225_v9 = vrot.slane %v1069_v44, 6 }
 0x406   : > { %v1882_v45 = vpop.eup %1881 }
 0x407   : > { %v2402_v46 = vmul.f32 %v1882_v45, %v1059_v41 }
 0x409   : > { %v1072_v47 = vpack.c.bf16 %v2402_v46, %v2402_v46 }
 0x40b   : > { %v1117_v48 = vrot.slane %v1072_v47, 1  ;;  %v1080_v4 = vrot.slane %v1072_v47, %v2415_v30 }
 0x40d   : > { %1118 = vrot.lane.b32.xlu0 %v1117_v48, %s2041_s26  ;;  %v1081_v62 = vcombine.high %v1080_v4, %v1080_v4 }
 0x40f   : > { %v1088_v8 = vrot.slane %v1081_v62, %v2415_v30 }
 0x47f   : > { %v1119_v49 = vpop.permute.xlu0 %1118 }
 0x480   : > { %1695 = vmatmul.mubr.msk.bf16.vlgmr.msra.gmra.mxu0 %vm834_vm2, %v1119_v49 }
 0x540   : > { %v1197_v50 = vpop.f32.mrf.mxu0 }
 0x541   : > { %v1206_v51 = vrot.slane %v1197_v50, 4 }
 0x542   : > { %v1199_v53 = vpop.f32.mrf.mxu0 }
 0x543   : > { %v1210_v54 = vadd.f32 %v1206_v51, %v1107_v52  ;;  %v1207_v55 = vrot.slane %v1199_v53, 4 }
 0x544   : > { %v1201_v57 = vpop.f32.mrf.mxu0 }
 0x545   : > { %v1212_v58 = vmul.f32 0.5, %v1210_v54  ;;  %v1211_v59 = vadd.f32 %v1207_v55, %v1108_v56 }
 0x546   : > { %v1202_v61 = vpop.f32.mrf.mxu0 }
 0x547   : > { %1883 = vtanh.f32 %v1212_v58  ;;  %v1213_v63 = vmul.f32 0.5, %v1211_v59 }
 0x549   : > { %v1215_v0 = vsel %vm778_vm6, %v1211_v59, %v1213_v63  ;;  %v1101_v63 = vrot.slane %v2402_v46, 2 }
 0x54a   : > { %1885 = vtanh.f32 %v1215_v0 }
 0x554   : > { %v1884_v2 = vpop.eup %1883 }
 0x555   : > { %v1218_v3 = vmul.f32 0.5, %v1884_v2 }
 0x557   : > { %v1886_v5 = vpop.eup %1885  ;;  %v1220_v10 = vadd.f32 0.5, %v1218_v3 }
 0x558   : > { %v1219_v14 = vmul.f32 0.5, %v1886_v5 }
 0x559   : > { %v1227_v15 = vmul.f32 %v1225_v9, %v1220_v10 }
 0x55a   : > { %v1221_v1 = vadd.f32 0.5, %v1219_v14 }
 0x55c   : > { %v1223_v16 = vsel %vm778_vm6, %v1886_v5, %v1221_v1 }
 0x55d   : > { %v1228_v18 = vmul.f32 %v1223_v16, %v1220_v10 }
 0x55f   : > { %1230 = vrot.lane.b32.xlu1 %v1228_v18, %s2041_s26 }
 0x5d1   : > { %v1231_v19 = vpop.permute.xlu1 %1230 }
 0x5d2   : > { %v1233_v20 = vadd.f32 %v1231_v19, %v1227_v15 }
 0x5d4   : > { %1887 = vtanh.f32 %v1233_v20  ;;  %v1389_v54 = vrot.slane %v1233_v20, 6 }
 0x5e1   : > { %v1888_v21 = vpop.eup %1887 }
 0x5e2   : > { %v1235_v22 = vmul.f32 %v1888_v21, %v1223_v16 }
 0x5e4   : > { %v1236_v27 = vpack.c.bf16 %v1235_v22, %v1235_v22  ;;  %v1265_v31 = vrot.slane %v1235_v22, 4 }
 0x5e6   : > { %v1281_v28 = vrot.slane %v1236_v27, 2  ;;  %v1244_v34 = vrot.slane %v1236_v27, %v2415_v30 }
 0x5e8   : > { %1282 = vrot.lane.b32.xlu0 %v1281_v28, %s2041_s26 }
 0x5ec   : > { %938 = vrot.lane.b32.xlu0 %v2380_v25, %s2041_s26  ;;  %v1251_v25 = vrot.slane %v1244_v34, %v2415_v30 }
 0x5ee   : > { %v1252_v26 = vcombine.high %v1251_v25, %v1251_v25 }
 0x5f0   : > { %1266 = vrot.lane.b32.xlu0 %v1265_v31, %s2041_s26 }
 0x5f4   : > { %926 = vrot.lane.b32.xlu0 %v925_v33, %s2041_s26 }
 0x5f8   : > { %1089 = vrot.lane.b32.xlu0 %v1088_v8, %s2041_s26 }
 0x5fc   : > { %1253 = vrot.lane.b32.xlu0 %v1252_v26, %s2041_s26 }
 0x65a   : > { %v1283_v6 = vpop.permute.xlu0 %1282 }
 0x65b   : > { %1706 = vmatmul.mubr.msk.bf16.vlgmr.msra.gmra.mxu1 %vm834_vm2, %v1283_v6 }
 0x65e   : > { %v939_v7 = vpop.permute.xlu0 %938 }
 0x65f   : > { %v941_v11 = vadd.f32 %v939_v7, %v936_v35 }
 0x661   : > { %943 = vst.msk [vmem:[#allocation10] sm:$0x3] %vm942_vm7, %v941_v11 }
 0x662   : > { %v1267_v12 = vpop.permute.xlu0 %1266 }
 0x666   : > { %v927_v13 = vpop.permute.xlu0 %926 }
 0x667   : > { %930 = vst.msk [vmem:[%s2220_s15] sm:$0x1] %vm929_vm8, %v927_v13 }
 0x668   : > { %v1099_v60 = vld [vmem:[#allocation10] sm:$0x3] }
 0x66a   : > { %v1090_v17 = vpop.permute.xlu0 %1089 }
 0x66b   : > { %1685 = vst.msk [vmem:[%s2220_s15 + $0x1] sm:$0x1] %vm929_vm8, %v1090_v17 }
 0x66e   : > { %v1254_v36 = vpop.permute.xlu0 %1253 }
 0x66f   : > { %1696 = vst.msk [vmem:[%s2220_s15 + $0x2] sm:$0x1] %vm929_vm8, %v1254_v36 }
 0x71b   : > { %v1361_v37 = vpop.f32.mrf.mxu1 }
 0x71c   : > { %v1370_v38 = vrot.slane %v1361_v37, 2 }
 0x71d   : > { %v1363_v40 = vpop.f32.mrf.mxu1 }
 0x71e   : > { %v1374_v41 = vadd.f32 %v1370_v38, %v1271_v39  ;;  %v1371_v42 = vrot.slane %v1363_v40, 2 }
 0x71f   : > { %v1365_v44 = vpop.f32.mrf.mxu1 }
 0x720   : > { %v1376_v45 = vmul.f32 0.5, %v1374_v41  ;;  %v1375_v47 = vadd.f32 %v1371_v42, %v1272_v43 }
 0x721   : > { %v1366_v48 = vpop.f32.mrf.mxu1 }
 0x722   : > { %1889 = vtanh.f32 %v1376_v45  ;;  %v1377_v49 = vmul.f32 0.5, %v1375_v47 }
 0x724   : > { %v1379_v50 = vsel %vm778_vm6, %v1375_v47, %v1377_v49 }
 0x725   : > { %1891 = vtanh.f32 %v1379_v50 }
 0x72f   : > { %v1890_v51 = vpop.eup %1889 }
 0x730   : > { %v1382_v52 = vmul.f32 0.5, %v1890_v51 }
 0x732   : > { %v1892_v53 = vpop.eup %1891  ;;  %v1384_v55 = vadd.f32 0.5, %v1382_v52 }
 0x733   : > { %v1383_v56 = vmul.f32 0.5, %v1892_v53 }
 0x734   : > { %v1391_v57 = vmul.f32 %v1389_v54, %v1384_v55 }
 0x735   : > { %v1385_v58 = vadd.f32 0.5, %v1383_v56 }
 0x737   : > { %v1387_v59 = vsel %vm778_vm6, %v1892_v53, %v1385_v58 }
 0x738   : > { %v1392_v61 = vmul.f32 %v1387_v59, %v1384_v55 }
 0x73a   : > { %1394 = vrot.lane.b32.xlu1 %v1392_v61, %s2041_s26 }
 0x73e   : > { %1102 = vrot.lane.b32.xlu1 %v1101_v63, %s2041_s26 }
 0x742   : > { %931 = vrot.lane.b32.xlu1 %v925_v33, %s2042_s27 }
 0x746   : > { %1094 = vrot.lane.b32.xlu1 %v1088_v8, %s2042_s27 }
 0x74a   : > { %1258 = vrot.lane.b32.xlu1 %v1252_v26, %s2042_s27 }
 0x7ac   : > { %v1395_v0 = vpop.permute.xlu1 %1394 }
 0x7ad   : > { %v1397_v2 = vadd.f32 %v1395_v0, %v1391_v57 }
 0x7af   : > { %1893 = vtanh.f32 %v1397_v2 }
 0x7b0   : > { %v1103_v3 = vpop.permute.xlu1 %1102 }
 0x7b1   : > { %v1105_v5 = vadd.f32 %v1103_v3, %v1099_v60 }
 0x7b3   : > { %1106 = vst.msk [vmem:[#allocation10] sm:$0x3] %vm942_vm7, %v1105_v5 }
 0x7b4   : > { %v932_v9 = vpop.permute.xlu1 %931 }
 0x7b5   : > { %1675 = vst.msk [vmem:[%s2222_s9 + $0x3] sm:$0x1] %vm929_vm8, %v932_v9 }
 0x7b8   : > { %v1095_v46 = vpop.permute.xlu1 %1094 }
 0x7b9   : > { %1686 = vst.msk [vmem:[%s2222_s9 + $0x2] sm:$0x1] %vm929_vm8, %v1095_v46 }
 0x7ba   : > { %v1263_v10 = vld [vmem:[#allocation10] sm:$0x3] }
 0x7bb   : > { %v1269_v14 = vadd.f32 %v1267_v12, %v1263_v10 }
 0x7bc   : > { %v1894_v15 = vpop.eup %1893  ;;  %v1259_v1 = vpop.permute.xlu1 %1258 }
 0x7bd   : > { %1270 = vst.msk [vmem:[#allocation10] sm:$0x3] %vm942_vm7, %v1269_v14  ;;  %v1399_v16 = vmul.f32 %v1894_v15, %v1387_v59 }
 0x7be   : > { %1697 = vst.msk [vmem:[%s2222_s9 + $0x1] sm:$0x1] %vm929_vm8, %v1259_v1 }
 0x7bf   : > { %v1429_v18 = vrot.slane %v1399_v16, 6  ;;  %v1400_v19 = vpack.c.bf16 %v1399_v16, %v1399_v16 }
 0x7c1   : > { %1430 = vrot.lane.b32.xlu1 %v1429_v18, %s2041_s26  ;;  %v1408_v20 = vrot.slane %v1400_v19, %v2415_v30 }
 0x7c3   : > { %v1409_v21 = vcombine.high %v1408_v20, %v1408_v20 }
 0x7c4   : > { %v1427_v24 = vld [vmem:[#allocation10] sm:$0x3] }
 0x7c5   : > { %v1416_v22 = vrot.slane %v1409_v21, %v2415_v30 }
 0x7c7   : > { %v1417_v23 = vcombine.high %v1416_v22, %v1416_v22 }
 0x7c9   : > { %1423 = vrot.lane.b32.xlu1 %v1417_v23, %s2042_s27  ;;  %1418 = vrot.lane.b32.xlu0 %v1417_v23, %s2041_s26 }
 0x7cd   : > { %1441 = vrot.lane.b32.xlu1 %v1397_v2, %s2041_s26  ;;  %1435 = vrot.lane.b32.xlu0 %v1399_v16, %s2041_s26 }
 0x833   : > { %v1431_v27 = vpop.permute.xlu1 %1430 }
 0x834   : > { %v1433_v28 = vadd.f32 %v1431_v27, %v1427_v24 }
 0x836   : > { %1434 = vst.msk [vmem:[#allocation10] sm:$0x3] %vm942_vm7, %v1433_v28 }
 0x83b   : > { %v1424_v29 = vpop.permute.xlu1 %1423  ;;  %v1419_v31 = vpop.permute.xlu0 %1418 }
 0x83c   : > { %1426 = vst.msk [vmem:[%s2222_s9] sm:$0x1] %vm929_vm8, %v1424_v29  ;;  %1707 = vst.msk [vmem:[%s2220_s15 + $0x3] sm:$0x1] %vm929_vm8, %v1419_v31  ;;  %1448 = sbr.rel (%p1708_p7) target bundleno = 2117 (0x845), region = 56 }
 0x83f   : > { %v1442_v30 = vpop.permute.xlu1 %1441  ;;  %v1436_v32 = vpop.permute.xlu0 %1435 }
 0x840   : > { %1444 = vst.msk [vmem:[#allocation5 - $0x6] sm:$0xc0] %vm1438_vm9, %v1442_v30  ;;  %1439 = vst.msk [vmem:[#allocation4 - $0x6] sm:$0xc0] %vm1438_vm9, %v1436_v32 }
 0x841   : > { %v1449_v4 = vld [vmem:[#allocation10] sm:$0x3] }
 0x842   : > { %v1450_v33 = vmul.f32 0.125, %v1449_v4 }
 0x844   : > { %1451 = vst.msk [vmem:[#allocation10] sm:$0x3] %vm942_vm7, %v1450_v33 }
 0x845 PF: > { %s1457_s26 = sand.u32 1, %s2137_s16   ;;  %s2622_s27 = ssub.s32 1, %s2137_s16 }
 0x846   : > { %s1720_s30 = sshll.u32 %s2622_s27, 6  ;;  %s1488_s28 = sshll.u32 %s2222_s9, 4  ;;  %s2479_s28 = int_to_ptr.vmem [resolvable:$true] %s1488_s28 }
 0x847   : > { %s2477_s11 = scalar_lea.hbm %s2590_s8, %s1720_s30  ;;  %s2481_s29 = scalar_lea.sflag [#allocation9], %s1457_s26 }
 0x848   : > { %s1895_s12 = scalar_lea.vmem %s2479_s28, 64  ;;  %s2046_s14 = smov [#allocation8]  }
 0x849   : > { %p1896_p8 = scmp.ne.s32.totalorder %s2479_s28, %s1895_s12  ;;  %s1899_s10 = sshll.u32 %s2046_s14, 4  ;;  %s1900_s10 = int_to_ptr.vmem [resolvable:$false] %s1899_s10 }
 0x84a   : > { %s1901_s9 = scalar_lea.vmem %s1900_s10, 128  ;;  %p1902_p13 = scmp.lt.s32.totalorder %s2479_s28, %s1900_s10 }
 0x84b   : > { %p1897_p9 = pnand %p1896_p8, %p2185_p11  ;;  %p1903_p0 = scmp.lt.s32.totalorder %s1901_s9, %s1895_s12 }
 0x84d   : > { %p1898_p10 = pneg %p1897_p9  ;;  %p1904_p1 = por %p1903_p0, %p1902_p13 }
 0x84f   : > { %p1905_p3 = pnand %p1904_p1, %p1898_p10 }
 0x851   : > { %1908 = shalt.err (!%p1905_p3)
}
 0x852   : > { %s1909_s17 = scalar_lea.hbm %s2477_s11, 64  ;;  %s1913_s24 = scalar_lea.hbm %s2590_s8, 128 }
 0x853   : > { %p1910_p4 = scmp.ne.s32.totalorder %s2477_s11, %s1909_s17  ;;  %p1914_p8 = scmp.lt.s32.totalorder %s2477_s11, %s2590_s8 }
 0x854   : > { %p1915_p9 = scmp.lt.s32.totalorder %s1913_s24, %s1909_s17 }
 0x855   : > { %p1911_p7 = pnand %p1910_p4, %p2185_p11 }
 0x856   : > { %p1916_p10 = por %p1915_p9, %p1914_p8 }
 0x857   : > { %p1912_p2 = pneg %p1911_p7 }
 0x859   : > { %p1917_p13 = pnand %p1916_p10, %p1912_p2 }
 0x85b   : > { %1920 = shalt.err (!%p1917_p13)
}
 0x85c   : > { %s2047_s27 = smov 16   ;;  %s2048_s30 = smov 1  }
 0x85d   : > { %1722 = dma.vmem_to_hbm [thread:$0]  (%p2185_p11), %s2479_s28, 64, %s2477_s11, %s2481_s29, %s2047_s27, %s2047_s27, %s2048_s30  }
 0x85e   : > { %s1719_s21 = sshll.u32 %s2137_s16, 6  ;;  %s1471_s10 = sshll.u32 %s2220_s15, 4  ;;  %s2514_s10 = int_to_ptr.vmem [resolvable:$true] %s1471_s10 }
 0x85f   : > { %s2511_s14 = scalar_lea.hbm %s2589_s7, %s1719_s21  ;;  %s2623_s9 = sand.u32 1, %s2029_s13  }
 0x860   : > { %s1453_s17 = scalar_lea.sflag [#allocation7], %s2623_s9  ;;  %s1921_s18 = scalar_lea.vmem %s2514_s10, 64 }
 0x861   : > { %p1922_p2 = scmp.ne.s32.totalorder %s2514_s10, %s1921_s18  ;;  %s2049_s19 = smov [#allocation6]  }
 0x862   : > { %s1925_s28 = sshll.u32 %s2049_s19, 4  ;;  %s1926_s28 = int_to_ptr.vmem [resolvable:$false] %s1925_s28 }
 0x863   : > { %p1923_p0 = pnand %p1922_p2, %p2162_p5  ;;  %s1927_s11 = scalar_lea.vmem %s1926_s28, 128 }
 0x864   : > { %p1928_p11 = scmp.lt.s32.totalorder %s2514_s10, %s1926_s28  ;;  %p1929_p3 = scmp.lt.s32.totalorder %s1927_s11, %s1921_s18 }
 0x865   : > { %p1924_p1 = pneg %p1923_p0 }
 0x866   : > { %p1930_p4 = por %p1929_p3, %p1928_p11 }
 0x868   : > { %p1931_p7 = pnand %p1930_p4, %p1924_p1 }
 0x86a   : > { %1934 = shalt.err (!%p1931_p7)
}
 0x86b   : > { %s1935_s15 = scalar_lea.hbm %s2511_s14, 64  ;;  %s1939_s24 = scalar_lea.hbm %s2589_s7, 128 }
 0x86c   : > { %p1936_p8 = scmp.ne.s32.totalorder %s2511_s14, %s1935_s15  ;;  %p1940_p13 = scmp.lt.s32.totalorder %s2511_s14, %s2589_s7 }
 0x86d   : > { %p1941_p2 = scmp.lt.s32.totalorder %s1939_s24, %s1935_s15 }
 0x86e   : > { %p1937_p9 = pnand %p1936_p8, %p2162_p5 }
 0x86f   : > { %p1942_p0 = por %p1941_p2, %p1940_p13 }
 0x870   : > { %p1938_p10 = pneg %p1937_p9 }
 0x872   : > { %p1943_p1 = pnand %p1942_p0, %p1938_p10 }
 0x874   : > { %1946 = shalt.err (!%p1943_p1)
}
 0x875   : > { %1721 = dma.vmem_to_hbm [thread:$0]  (%p2162_p5), %s2514_s10, 64, %s2511_s14, %s1453_s17, %s2047_s27, %s2047_s27, %s2048_s30  }
 0x876   : > { %s2050_s21 = smov [#allocation10]   ;;  %p2624_p3 = scmp.eq.s32.totalorder %s2137_s16, 1 }
 0x877   : > { %s1502_s25 = sshll.u32 %s2050_s21, 4  ;;  %s1503_s25 = int_to_ptr.vmem [resolvable:$true] %s1502_s25 }
 0x878   : > { %s1947_s12 = scalar_lea.vmem %s1503_s25, 32  ;;  %p1954_p8 = scmp.lt.s32.totalorder %s1503_s25, %s1503_s25 }
 0x879   : > { %p1948_p11 = scmp.ne.s32.totalorder %s1503_s25, %s1947_s12  ;;  %p1955_p9 = scmp.lt.s32.totalorder %s1947_s12, %s1947_s12 }
 0x87b   : > { %p1949_p4 = pnand %p1948_p11, %p2624_p3  ;;  %p1956_p10 = por %p1955_p9, %p1954_p8 }
 0x87d   : > { %p1950_p7 = pneg %p1949_p4 }
 0x87f   : > { %p1957_p13 = pnand %p1956_p10, %p1950_p7 }
 0x881   : > { %1960 = shalt.err (!%p1957_p13)
}
 0x882   : > { %p2625_p2 = pmov %p2624_p3  ;;  %s2626_s18 = sld [smem:[#allocation24_spill]] }
 0x884   : > { %p2627_p5 = pmov %p2625_p2 }
 0x888   : > { %1724 = dma.vmem_to_hbm [thread:$0]  (%p2625_p2), %s1503_s25, 32, %s2626_s18, [#allocation9]  }
 0x889   : > { %2000 = dma.done.wait (%p2627_p5), [#allocation9], 32   ;;  %p2628_p0 = pmov %p2625_p2 }
 0x88b   : > { %2002 = vsyncadd (%p2628_p0), [#allocation9], 4294967264 }
 0x88c PF: > { %s2629_s27 = sld [smem:[#allocation18_spill]] }
 0x88d   : > { %s2630_s30 = sld [smem:[#allocation16_spill]] }
 0x892   : > { %p1738_p1 = scmp.ge.s32.totalorder %s2629_s27, 2 }
 0x893   : > { %s1518_s10 = sand.u32 1, %s2630_s30  }
 0x894   : > { %p1730_p11 = pnand %p1738_p1, %p2168_p6  ;;  %s1519_s17 = scalar_lea.sflag [#allocation7], %s1518_s10 }
 0x896   : > { %p1731_p3 = pneg %p1730_p11 }
 0x898   : > { %2004 = dma.done.wait (%p1731_p3), %s1519_s17, 64  }
 0x899   : > { %2006 = vsyncadd (%p1731_p3), %s1519_s17, 4294967232  ;;  %s2632_s19 = sadd.s32 4294967294, %s2629_s27   ;;  %p1733_p4 = pnand %p1738_p1, %p2191_p12 }
 0x89a   : > { %s1527_s11 = sand.u32 1, %s2632_s19  }
 0x89b   : > { %p1734_p7 = pneg %p1733_p4  ;;  %s1528_s16 = scalar_lea.sflag [#allocation9], %s1527_s11 }
 0x89d   : > { %2008 = dma.done.wait (%p1734_p7), %s1528_s16, 64  }
 0x89e   : > { %2010 = vsyncadd (%p1734_p7), %s1528_s16, 4294967232  ;;  %s2634_s15 = sld [smem:[#allocation19_spill]]  ;;  %s2640_s12 = smov %s2029_s13 }
 0x89f   : > { %s2635_s30 = sld [smem:[#allocation14_spill]] }
 0x8a0   : > { %s2636_s10 = sld [smem:[#allocation15_spill]] }
 0x8a1   : > { %s2637_s11 = sld [smem:[#allocation22_spill]] }
 0x8a2   : > { %s2638_s29 = sld [smem:[#allocation17_spill]] }
 0x8a3   : > { %s2639_s14 = sld [smem:[#allocation20_spill]] }
 0x8a4   : > { %p23_p6 = scmp.ge.s32.totalorder %s2634_s15, 4  }
 0x8a6   :  { %25 = sbr.rel (!%p23_p6) target bundleno = 9 (0x9), region = 143 }
 0x8a8   : > { %s2641_s13 = smov %s2638_s29 }
 0x8ab   :  { %1533 = vsyncpa [#allocation7], 1 }
 0x8ac   :  { %1535 = vsyncpa [#allocation7 + $0x1], 1 }
 0x8ad   :  { %1536 = vsyncpa [#allocation9], 1 }
 0x8ae   :  { %1538 = vsyncpa [#allocation9 + $0x1], 1 }

// kernel: bilstm_encoder_forward.5
= control target key start
LH: loop header
LB: loop body
LE: loop exit
PB: predicated region body
PF: predicated region fallthrough
CT: control target
= control target key end

     0   :  { %15 = vsyncpa [#allocation7], 0  ;;  %s1877_s30 = smov 0   ;;  %s2176_s0 = inlined_call_operand.vmem [shape: bf16[8,2,32], index: 0, kind: input, shape index: {}, may-alias: {0,2}]   ;;  %s2177_s1 = inlined_call_operand.vmem [shape: bf16[8,2,32], index: 1, kind: input, shape index: {}, may-alias: {1,3}]   ;;  %s2178_s2 = inlined_call_operand.vmem [shape: bf16[8,2,32], index: 2, kind: input, shape index: {}, may-alias: {0,2}]   ;;  %s2179_s3 = inlined_call_operand.vmem [shape: bf16[8,2,32], index: 3, kind: input, shape index: {}, may-alias: {1,3}]   ;;  %s2180_s4 = inlined_call_operand.vmem [shape: bf16[128,256], index: 4, kind: input, shape index: {}]   ;;  %s2181_s5 = inlined_call_operand.vmem [shape: f32[1,256], index: 5, kind: input, shape index: {}]   ;;  %s2182_s6 = inlined_call_operand.vmem [shape: bf16[64,256], index: 6, kind: input, shape index: {}]   ;;  %s2183_s7 = inlined_call_operand.vmem [shape: bf16[8,2,32], index: 7, kind: output, shape index: {0}]   ;;  %s2184_s8 = inlined_call_operand.vmem [shape: bf16[8,2,32], index: 8, kind: output, shape index: {1}]   ;;  %s2185_s9 = inlined_call_operand.hbm [shape: f32[2,64], index: 9, kind: output, shape index: {2}]  }
   0x1 LB: > { %s1883_s10 = sadd.s32 4294967295, %s1817_s30   ;;  %p1588_p0 = scmp.ge.s32.totalorder %s1817_s30, 1  ;;  %s1817_s30 = sphi %s1877_s30, %s21_s30  }
   0x2   : > { %p328_p1 = scmp.lt.s32.totalorder %s1817_s30, 3 }
   0x4   : > { %p329_p2 = pnand %p1588_p0, %p328_p1 }
   0x5   : > { %s1589_s11 = sshll.u32 (!%p329_p2), %s1883_s10, 2  ;;  %s391_s12 = ssub.s32 (!%p329_p2), 1, %s1883_s10 }
   0x6   : > { %332 = sbr.rel (%p329_p2) target bundleno = 2106 (0x83a), region = 48  ;;  %p382_p3 = scmp.lt.s32.totalorder (!%p329_p2), %s1589_s11, 7 }
   0x7   : > { %s1591_s13 = sshll.u32 (!%p329_p2), %s391_s12, 2  ;;  %p1595_p5 = scmp.ne.s32.totalorder (!%p329_p2), %s1883_s10, 0 }
   0x8   : > { %p393_p4 = scmp.lt.s32.totalorder (!%p329_p2), %s1591_s13, 7 }
   0xb   : > { %s2187_s11 = smov (!%p382_p3, %s1589_s11), 7  ;;  %s2189_s13 = smov (!%p393_p4, %s1591_s13), 7 }
   0xc   : > { %s1892_s16 = scalar_lea.vmem %s2176_s0, %s2187_s11  ;;  %s389_s19 = scalar_lea.vmem %s2177_s1, %s2187_s11 }
   0xd   : > { %s395_s22 = scalar_lea.vmem %s2178_s2, %s2189_s13  ;;  %s1903_s25 = scalar_lea.vmem %s2179_s3, %s2189_s13 }
   0xe   : > { %s1908_s28 = scalar_lea.vmem %s2183_s7, %s2187_s11  ;;  %s1913_s14 = scalar_lea.vmem %s2184_s8, %s2189_s13 }
   0xf   : > { %421 = sbr.rel (%p1595_p5) target bundleno = 23 (0x17), region = 52 }
  0x14   : > { %vm422_vm0 = vcmask 517120   ;;  %v1819_v0 = vmov 0.0  }
  0x15   : > { %423 = vst.msk [vmem:[#allocation4] sm:$0x3] %vm422_vm0, %v1819_v0  ;;  %424 = vst.msk [vmem:[#allocation5] sm:$0x3] %vm422_vm0, %v1819_v0 }
  0x16   : > { %425 = vst.msk [vmem:[#allocation6] sm:$0x3] %vm422_vm0, %v1819_v0 }
  0x17 PF: > { %v448_v1 = vlaneseq  ;;  %v1602_v2 = vld [vmem:[%s395_s22 + $0x3] sm:$0x1]  ;;  %v1820_v3 = vmov 1983009808   ;;  %v1603_v5 = vld [vmem:[%s395_s22 + $0x2] sm:$0x1] }
  0x18   : > { %v446_v4 = vunpack.c.l.s4 %v1820_v3  ;;  %v442_v6 = vld [vmem:[%s389_s19] sm:$0x1]  ;;  %v1599_v7 = vld [vmem:[%s389_s19 + $0x1] sm:$0x1]  ;;  %v504_v9 = vunpack.c.l.bf16 %v1602_v2  ;;  %v520_v13 = vunpack.c.l.bf16 %v1603_v5  ;;  %v1600_v16 = vld [vmem:[%s389_s19 + $0x2] sm:$0x1] }
  0x19   : > { %v1917_v8 = vshrl.u32 %v448_v1, 7  ;;  %v1604_v10 = vld [vmem:[%s395_s22 + $0x1] sm:$0x1]  ;;  %v548_v11 = vld [vmem:[%s395_s22] sm:$0x1]  ;;  %v443_v14 = vunpack.c.l.bf16 %v442_v6  ;;  %v459_v15 = vunpack.c.l.bf16 %v1599_v7  ;;  %v474_v21 = vunpack.c.l.bf16 %v1600_v16  ;;  %s1821_s24 = smov 64  }
  0x1a   : > { %v447_v12 = vunpack.c.0.s8 %v446_v4  ;;  %v1601_v17 = vld [vmem:[%s389_s19 + $0x3] sm:$0x1]  ;;  %v1607_v18 = vld [vmem:[%s1903_s25 + $0x1] sm:$0x1]  ;;  %v535_v19 = vunpack.c.l.bf16 %v1604_v10  ;;  %v549_v20 = vunpack.c.l.bf16 %v548_v11  ;;  %v608_v23 = vld [vmem:[%s1903_s25] sm:$0x1] }
  0x1b   : > { %v489_v22 = vunpack.c.l.bf16 %v1601_v17  ;;  %v1605_v24 = vld [vmem:[%s1903_s25 + $0x3] sm:$0x1]  ;;  %v1606_v25 = vld [vmem:[%s1903_s25 + $0x2] sm:$0x1]  ;;  %v1723_v27 = vld [vmem:[%s2180_s4 + $0x74] ss:$8 sps:$4 sm:$0xff]   ;;  %v595_v28 = vunpack.c.l.bf16 %v1607_v18  ;;  %v609_v29 = vunpack.c.l.bf16 %v608_v23 }
  0x1c   : > { %v450_v26 = vsub.s32 %v447_v12, %v1917_v8  ;;  %v564_v30 = vunpack.c.l.bf16 %v1605_v24  ;;  %v580_v31 = vunpack.c.l.bf16 %v1606_v25  ;;  %v1725_v32 = vld [vmem:[%s2180_s4 + $0x70] ss:$8 sps:$4 sm:$0xff]   ;;  %732 = vmatprep.subr.bf16.mxu0 %v1723_v27  ;;  %v1726_v37 = vld [vmem:[%s2180_s4 + $0x64] ss:$8 sps:$4 sm:$0xff]   ;;  %v1728_v42 = vld [vmem:[%s2180_s4 + $0x60] ss:$8 sps:$4 sm:$0xff]  }
  0x1d   : > { %733 = vmatpush1.bf16.msra.mxu0 %v1725_v32  ;;  %v1729_v43 = vld [vmem:[%s2180_s4 + $0x54] ss:$8 sps:$4 sm:$0xff]   ;;  %v426_v46 = vld [vmem:[%s1892_s16] sm:$0x1]  ;;  %vm428_vm1 = vcmask 254976   ;;  %s1822_s25 = smov 32  }
  0x1e   : > { %v512_v33 = vrot.slane %v504_v9, %v450_v26  ;;  %v528_v34 = vrot.slane %v520_v13, %v450_v26  ;;  %v451_v35 = vrot.slane %v443_v14, %v450_v26  ;;  %v467_v36 = vrot.slane %v459_v15, %v450_v26  ;;  %734 = vmatprep.subr.bf16.mxu0 %v1726_v37  ;;  %v1596_v47 = vld [vmem:[%s1892_s16 + $0x1] sm:$0x1]  ;;  %v1597_v56 = vld [vmem:[%s1892_s16 + $0x2] sm:$0x1]  ;;  %v1598_v57 = vld [vmem:[%s1892_s16 + $0x3] sm:$0x1] }
  0x1f   : > { %v543_v38 = vrot.slane %v535_v19, %v450_v26  ;;  %v557_v39 = vrot.slane %v549_v20, %v450_v26  ;;  %v482_v40 = vrot.slane %v474_v21, %v450_v26  ;;  %v497_v41 = vrot.slane %v489_v22, %v450_v26  ;;  %v1731_v58 = vld [vmem:[%s2180_s4 + $0x50] ss:$8 sps:$4 sm:$0xff]   ;;  %v1732_v61 = vld [vmem:[%s2180_s4 + $0x44] ss:$8 sps:$4 sm:$0xff]   ;;  %v1734_v2 = vld [vmem:[%s2180_s4 + $0x40] ss:$8 sps:$4 sm:$0xff]  }
  0x20   : > { %v1703_v44 = vpack.i.bf16 %v528_v34, %v512_v33  ;;  %v1693_v45 = vpack.i.bf16 %v467_v36, %v451_v35  ;;  %v603_v50 = vrot.slane %v595_v28, %v450_v26  ;;  %v617_v51 = vrot.slane %v609_v29, %v450_v26  ;;  %v1740_v3 = vld [vmem:[%s2182_s6 + $0x34] ss:$8 sps:$4 sm:$0xff]   ;;  %v1968_v4 = vld [vmem:[%s2182_s6 + $0x30] ss:$8 sps:$4 sm:$0xff]   ;;  %v1977_v6 = vld [vmem:[%s2182_s6 + $0x24] ss:$8 sps:$4 sm:$0xff]  }
  0x21   : > { %v1708_v48 = vpack.i.bf16 %v557_v39, %v543_v38  ;;  %v1698_v49 = vpack.i.bf16 %v497_v41, %v482_v40  ;;  %v572_v52 = vrot.slane %v564_v30, %v450_v26  ;;  %v588_v53 = vrot.slane %v580_v31, %v450_v26  ;;  %735 = vmatpush1.bf16.msra.mxu0 %v1728_v42  ;;  %v1735_v5 = vld [vmem:[%s2180_s4 + $0x34] ss:$8 sps:$4 sm:$0xff]   ;;  %v1982_v7 = vld [vmem:[%s2182_s6 + $0x20] ss:$8 sps:$4 sm:$0xff]   ;;  %s1824_s27 = smov 96   ;;  %p1666_p6 = scmp.ne.s32.totalorder %s1883_s10, 1 }
  0x22   : > { %1704 = vrot.lane.b32.xlu1 %v1703_v44, %s1821_s24  ;;  %1694 = vrot.lane.b32.xlu0 %v1693_v45, %s1822_s25  ;;  %v427_v54 = vunpack.c.l.bf16 %v426_v46  ;;  %v432_v55 = vunpack.c.l.bf16 %v1596_v47  ;;  %v436_v59 = vunpack.c.l.bf16 %v1597_v56  ;;  %v440_v60 = vunpack.c.l.bf16 %v1598_v57  ;;  %v1737_v9 = vld [vmem:[%s2180_s4 + $0x30] ss:$8 sps:$4 sm:$0xff]   ;;  %v1738_v10 = vld [vmem:[%s2180_s4 + $0x24] ss:$8 sps:$4 sm:$0xff]  }
  0x23   : > { %736 = vmatprep.subr.bf16.mxu0 %v1729_v43  ;;  %v1823_v62 = vmov 0   ;;  %v1718_v63 = vpack.i.bf16 %v617_v51, %v603_v50  ;;  %v1713_v0 = vpack.i.bf16 %v588_v53, %v572_v52  ;;  %849 = vmatprep.subr.bf16.mxu1 %v1740_v3  ;;  %v1994_v11 = vld [vmem:[%s2182_s6 + $0x14] ss:$8 sps:$4 sm:$0xff]   ;;  %v2000_v12 = vld [vmem:[%s2182_s6 + $0x10] ss:$8 sps:$4 sm:$0xff]   ;;  %vm837_vm2 = vcmask 523264  }
  0x24   : > { %429 = vst.msk [vmem:[#allocation2] sm:$0x3] %vm428_vm1, %v427_v54  ;;  %433 = vst.msk [vmem:[#allocation2 + $0x2] sm:$0x3] %vm428_vm1, %v432_v55  ;;  %764 = vmatprep.mubr.bf16.mxu0 %v1823_v62  ;;  %873 = vmatprep.mubr.bf16.mxu1 %v1823_v62  ;;  %v2006_v13 = vld [vmem:[%s2182_s6 + $0x4] ss:$8 sps:$4 sm:$0xff]  }
  0x25   : > { %437 = vst.msk [vmem:[#allocation2 + $0x4] sm:$0x3] %vm428_vm1, %v436_v59  ;;  %441 = vst.msk [vmem:[#allocation2 + $0x6] sm:$0x3] %vm428_vm1, %v440_v60  ;;  %737 = vmatpush1.bf16.msra.mxu0 %v1731_v58  ;;  %850 = vmatpush1.bf16.msra.mxu1 %v1968_v4  ;;  %v785_v14 = vld [vmem:[#allocation5] sm:$0x3] }
  0x26   : > { %1709 = vrot.lane.b32.xlu1 %v1708_v48, %s1821_s24  ;;  %1699 = vrot.lane.b32.xlu0 %v1698_v49, %s1822_s25  ;;  %v1742_v15 = vld [vmem:[%s2180_s4 + $0x20] ss:$8 sps:$4 sm:$0xff]   ;;  %v1744_v16 = vld [vmem:[%s2180_s4 + $0x14] ss:$8 sps:$4 sm:$0xff]   ;;  %v784_v18 = vld [vmem:[#allocation4] sm:$0x3] }
  0x27   : > { %738 = vmatprep.subr.bf16.mxu0 %v1732_v61  ;;  %851 = vmatprep.subr.bf16.mxu1 %v1977_v6  ;;  %v2019_v17 = vld [vmem:[%s2182_s6] ss:$8 sps:$4 sm:$0xff]   ;;  %v1748_v19 = vld [vmem:[%s2180_s4 + $0x10] ss:$8 sps:$4 sm:$0xff]   ;;  %v1750_v20 = vld [vmem:[%s2180_s4 + $0x4] ss:$8 sps:$4 sm:$0xff]   ;;  %v788_v21 = vpack.c.bf16 %v784_v18, %v784_v18 }
  0x28   : > { %v1754_v22 = vld [vmem:[%s2180_s4] ss:$8 sps:$4 sm:$0xff]   ;;  %vm455_vm3 = vcmask 517376   ;;  %vm516_vm4 = vcmask 779776   ;;  %vm576_vm5 = vcmask 1042176   ;;  %v644_v47 = vsub.s32 0, %v1917_v8 }
  0x29   : > { %739 = vmatpush1.bf16.msra.mxu0 %v1734_v2  ;;  %852 = vmatpush1.bf16.msra.mxu1 %v1982_v7  ;;  %v640_v48 = vld [vmem:[%s2181_s5] sm:$0x3]  ;;  %v648_v49 = vsub.s32 1, %v1917_v8  ;;  %v776_v58 = vand.u32 127, %v448_v1  ;;  %vm945_vm7 = vcmask 517120   ;;  %vm932_vm8 = vcmask 253952  }
  0x2a   : > { %1719 = vrot.lane.b32.xlu1 %v1718_v63, %s1824_s27  ;;  %1714 = vrot.lane.b32.xlu0 %v1713_v0, %s1824_s27  ;;  %v645_v50 = vrot.slane %v640_v48, %v644_v47  ;;  %vm1441_vm9 = vcmask 523270  }
  0x2b   : > { %740 = vmatprep.subr.bf16.mxu0 %v1735_v5  ;;  %853 = vmatprep.subr.bf16.mxu1 %v1994_v11  ;;  %v649_v51 = vrot.slane %v640_v48, %v648_v49  ;;  %v2063_v60 = vadd.s32 128, %v776_v58 }
  0x2d   : > { %741 = vmatpush1.bf16.msra.mxu0 %v1737_v9  ;;  %854 = vmatpush1.bf16.msra.mxu1 %v2000_v12  ;;  %vm781_vm6 = vcmp.lt.s32.totalorder %v2063_v60, 192 }
  0x2e   : > { %901 = vrot.lane.b32.xlu0 %v785_v14, %s1821_s24  ;;  %742 = vmatprep.subr.bf16.mxu0 %v1738_v10 }
  0x2f   : > { %855 = vmatprep.subr.bf16.mxu1 %v2006_v13 }
  0x31   : > { %743 = vmatpush1.bf16.msra.mxu0 %v1742_v15  ;;  %856 = vmatpush1.bf16.msra.mxu1 %v2019_v17 }
  0x32   : > { %744 = vmatprep.subr.bf16.mxu0 %v1744_v16  ;;  %1010 = vmatprep.subr.bf16.mxu1 %v1740_v3 }
  0x34   : > { %1632 = vmatmul.mubr.msk.bf16.vlgmr.msra.gmra.mxu1 %vm837_vm2, %v788_v21 }
  0x35   : > { %745 = vmatpush1.bf16.msra.mxu0 %v1748_v19  ;;  %1011 = vmatpush1.bf16.msra.mxu1 %v1968_v4 }
  0x36   : > { %746 = vmatprep.subr.bf16.mxu0 %v1750_v20  ;;  %1034 = vmatprep.mubr.bf16.mxu1 %v1823_v62 }
  0x37   : > { %1012 = vmatprep.subr.bf16.mxu1 %v1977_v6 }
  0x39   : > { %747 = vmatpush1.bf16.msra.mxu0 %v1754_v22  ;;  %1013 = vmatpush1.bf16.msra.mxu1 %v1982_v7 }
  0x3a   : > { %1174 = vmatprep.subr.bf16.mxu0 %v1740_v3  ;;  %1014 = vmatprep.subr.bf16.mxu1 %v1994_v11 }
  0x3d   : > { %1015 = vmatpush1.bf16.msra.mxu1 %v2000_v12 }
  0x3e   : > { %1016 = vmatprep.subr.bf16.mxu1 %v2006_v13 }
  0x41   : > { %1017 = vmatpush1.bf16.msra.mxu1 %v2019_v17 }
  0x42   : > { %1338 = vmatprep.subr.bf16.mxu1 %v1740_v3 }
  0x94   : > { %v1705_v23 = vpop.permute.xlu1 %1704  ;;  %v1695_v24 = vpop.permute.xlu0 %1694 }
  0x95   : > { %v1707_v25 = vunpack.i.h.bf16 %v1705_v23  ;;  %v1706_v26 = vunpack.i.l.bf16 %v1705_v23  ;;  %v1697_v27 = vunpack.i.h.bf16 %v1695_v24  ;;  %v1696_v28 = vunpack.i.l.bf16 %v1695_v24 }
  0x97   : > { %456 = vst.msk [vmem:[#allocation2] sm:$0x3] %vm455_vm3, %v1696_v28  ;;  %471 = vst.msk [vmem:[#allocation2 + $0x2] sm:$0x3] %vm455_vm3, %v1697_v27 }
  0x98   : > { %v1710_v29 = vpop.permute.xlu1 %1709  ;;  %v1700_v30 = vpop.permute.xlu0 %1699  ;;  %517 = vst.msk [vmem:[#allocation2] sm:$0x3] %vm516_vm4, %v1706_v26  ;;  %532 = vst.msk [vmem:[#allocation2 + $0x2] sm:$0x3] %vm516_vm4, %v1707_v25 }
  0x99   : > { %v1712_v31 = vunpack.i.h.bf16 %v1710_v29  ;;  %v1711_v32 = vunpack.i.l.bf16 %v1710_v29  ;;  %v1702_v33 = vunpack.i.h.bf16 %v1700_v30  ;;  %v1701_v34 = vunpack.i.l.bf16 %v1700_v30 }
  0x9b   : > { %486 = vst.msk [vmem:[#allocation2 + $0x4] sm:$0x3] %vm455_vm3, %v1701_v34  ;;  %501 = vst.msk [vmem:[#allocation2 + $0x6] sm:$0x3] %vm455_vm3, %v1702_v33 }
  0x9c   : > { %v1720_v35 = vpop.permute.xlu1 %1719  ;;  %547 = vst.msk [vmem:[#allocation2 + $0x4] sm:$0x3] %vm516_vm4, %v1711_v32  ;;  %561 = vst.msk [vmem:[#allocation2 + $0x6] sm:$0x3] %vm516_vm4, %v1712_v31  ;;  %v1715_v36 = vpop.permute.xlu0 %1714 }
  0x9d   : > { %v1722_v37 = vunpack.i.h.bf16 %v1720_v35  ;;  %v1721_v38 = vunpack.i.l.bf16 %v1720_v35  ;;  %v1717_v39 = vunpack.i.h.bf16 %v1715_v36  ;;  %v1716_v40 = vunpack.i.l.bf16 %v1715_v36 }
  0x9f   : > { %607 = vst.msk [vmem:[#allocation2 + $0x4] sm:$0x3] %vm576_vm5, %v1721_v38  ;;  %621 = vst.msk [vmem:[#allocation2 + $0x6] sm:$0x3] %vm576_vm5, %v1722_v37 }
  0xa0   : > { %577 = vst.msk [vmem:[#allocation2] sm:$0x3] %vm576_vm5, %v1716_v40  ;;  %592 = vst.msk [vmem:[#allocation2 + $0x2] sm:$0x3] %vm576_vm5, %v1717_v39  ;;  %v902_v20 = vpop.permute.xlu0 %901 }
  0xa7   : > { %v622_v41 = vld [vmem:[#allocation2] sm:$0xff] }
  0xa8   : > { %v623_v42 = vpack.c.bf16 %v622_v41, %v622_v41 }
  0xaa   : > { %765 = vmatmul.mubr.bf16.vlgmr.msra.gmra.mxu0 %v623_v42 }
  0xab   : > { %1175 = vmatpush1.bf16.msra.mxu0 %v1968_v4  ;;  %1198 = vmatprep.mubr.bf16.mxu0 %v1823_v62 }
  0xac   : > { %1176 = vmatprep.subr.bf16.mxu0 %v1977_v6 }
  0xaf   : > { %1177 = vmatpush1.bf16.msra.mxu0 %v1982_v7 }
  0xb0   : > { %1178 = vmatprep.subr.bf16.mxu0 %v1994_v11 }
  0xb3   : > { %1179 = vmatpush1.bf16.msra.mxu0 %v2000_v12 }
  0xb4   : > { %1180 = vmatprep.subr.bf16.mxu0 %v2006_v13 }
  0xb7   : > { %1181 = vmatpush1.bf16.msra.mxu0 %v2019_v17 }
  0xf4   : > { %v875_v43 = vpop.f32.mrf.mxu1 }
  0xf6   : > { %v877_v44 = vpop.f32.mrf.mxu1 }
  0xf8   : > { %v879_v45 = vpop.f32.mrf.mxu1 }
  0xfa   : > { %v880_v46 = vpop.f32.mrf.mxu1 }
 0x16a   : > { %v766_v52 = vpop.f32.mrf.mxu0 }
 0x16b   : > { %v767_v53 = vadd.f32 %v766_v52, %v645_v50 }
 0x16c   : > { %v768_v54 = vpop.f32.mrf.mxu0 }
 0x16d   : > { %773 = vst [vmem:[#allocation3] sm:$0xff] %v767_v53  ;;  %v769_v55 = vadd.f32 %v768_v54, %v649_v51 }
 0x16e   : > { %v770_v56 = vpop.f32.mrf.mxu0 }
 0x16f   : > { %774 = vst [vmem:[#allocation3 + $0x8] sm:$0xff] %v769_v55 }
 0x170   : > { %v771_v57 = vpop.f32.mrf.mxu0 }
 0x174   : > { %v786_v59 = vld [vmem:[#allocation3] sm:$0x3]  ;;  %v947_v30 = vld [vmem:[#allocation3] sm:$0xc]  ;;  %v1110_v52 = vld [vmem:[#allocation3] sm:$0x30] }
 0x175   : > { %v882_v61 = vadd.f32 %v875_v43, %v786_v59 }
 0x176   : > { %v787_v63 = vld [vmem:[#allocation3 + $0x8] sm:$0x3]  ;;  %v948_v33 = vld [vmem:[#allocation3 + $0x8] sm:$0xc]  ;;  %v1111_v56 = vld [vmem:[#allocation3 + $0x8] sm:$0x30] }
 0x177   : > { %v884_v0 = vmul.f32 0.5, %v882_v61  ;;  %v883_v2 = vadd.f32 %v877_v44, %v787_v63 }
 0x179   : > { %1759 = vtanh.f32 %v884_v0  ;;  %v885_v3 = vmul.f32 0.5, %v883_v2 }
 0x17b   : > { %v891_v5 = vsel %vm781_vm6, %v883_v2, %v885_v3 }
 0x17c   : > { %1761 = vtanh.f32 %v891_v5 }
 0x186   : > { %v1760_v9 = vpop.eup %1759 }
 0x187   : > { %v894_v14 = vmul.f32 0.5, %v1760_v9 }
 0x189   : > { %v1762_v10 = vpop.eup %1761  ;;  %v896_v16 = vadd.f32 0.5, %v894_v14 }
 0x18a   : > { %v895_v15 = vmul.f32 0.5, %v1762_v10 }
 0x18b   : > { %v904_v21 = vmul.f32 %v902_v20, %v896_v16 }
 0x18c   : > { %v897_v1 = vadd.f32 0.5, %v895_v15 }
 0x18e   : > { %v899_v18 = vsel %vm781_vm6, %v1762_v10, %v897_v1 }
 0x18f   : > { %v905_v19 = vmul.f32 %v899_v18, %v896_v16 }
 0x191   : > { %907 = vrot.lane.b32.xlu1 %v905_v19, %s1821_s24 }
 0x203   : > { %v908_v22 = vpop.permute.xlu1 %907 }
 0x204   : > { %v910_v23 = vadd.f32 %v908_v22, %v904_v21 }
 0x206   : > { %1763 = vtanh.f32 %v910_v23  ;;  %v1064_v36 = vrot.slane %v910_v23, 6  ;;  %v1825_v23 = vmov 1966171168  }
 0x213   : > { %v1764_v24 = vpop.eup %1763 }
 0x214   : > { %v2071_v25 = vmul.f32 %v1764_v24, %v899_v18  ;;  %v916_v24 = vunpack.c.l.s4 %v1825_v23 }
 0x216   : > { %v2075_v26 = vpack.c.bf16 %v2071_v25, %v2071_v25 }
 0x218   : > { %957 = vrot.lane.b32.xlu0 %v2075_v26, %s1821_s24 }
 0x28a   : > { %v958_v27 = vpop.permute.xlu0 %957 }
 0x28b   : > { %1642 = vmatmul.mubr.msk.bf16.vlgmr.msra.gmra.mxu1 %vm837_vm2, %v958_v27 }
 0x28c   : > { %1339 = vmatpush1.bf16.msra.mxu1 %v1968_v4  ;;  %1362 = vmatprep.mubr.bf16.mxu1 %v1823_v62 }
 0x28d   : > { %1340 = vmatprep.subr.bf16.mxu1 %v1977_v6 }
 0x290   : > { %1341 = vmatpush1.bf16.msra.mxu1 %v1982_v7 }
 0x291   : > { %1342 = vmatprep.subr.bf16.mxu1 %v1994_v11 }
 0x294   : > { %1343 = vmatpush1.bf16.msra.mxu1 %v2000_v12 }
 0x295   : > { %1344 = vmatprep.subr.bf16.mxu1 %v2006_v13 }
 0x298   : > { %1345 = vmatpush1.bf16.msra.mxu1 %v2019_v17 }
 0x34b   : > { %v1036_v28 = vpop.f32.mrf.mxu1 }
 0x34c   : > { %v1045_v29 = vrot.slane %v1036_v28, 6 }
 0x34d   : > { %v1038_v31 = vpop.f32.mrf.mxu1 }
 0x34e   : > { %v1049_v32 = vadd.f32 %v1045_v29, %v947_v30  ;;  %v1046_v4 = vrot.slane %v1038_v31, 6  ;;  %v917_v29 = vunpack.c.0.s8 %v916_v24 }
 0x34f   : > { %v1040_v62 = vpop.f32.mrf.mxu1 }
 0x350   : > { %v1051_v34 = vmul.f32 0.5, %v1049_v32  ;;  %v1050_v6 = vadd.f32 %v1046_v4, %v948_v33  ;;  %v2106_v30 = vsub.s32 %v917_v29, %v1917_v8 }
 0x351   : > { %v1041_v35 = vpop.f32.mrf.mxu1 }
 0x352   : > { %1765 = vtanh.f32 %v1051_v34  ;;  %v1052_v7 = vmul.f32 0.5, %v1050_v6  ;;  %v921_v32 = vrot.slane %v2075_v26, %v2106_v30  ;;  %v939_v35 = vld [vmem:[#allocation6] sm:$0x3] }
 0x354   : > { %v1054_v11 = vsel %vm781_vm6, %v1050_v6, %v1052_v7  ;;  %v928_v33 = vrot.slane %v921_v32, %v2106_v30 }
 0x355   : > { %1767 = vtanh.f32 %v1054_v11 }
 0x35f   : > { %v1766_v12 = vpop.eup %1765 }
 0x360   : > { %v1057_v13 = vmul.f32 0.5, %v1766_v12 }
 0x362   : > { %v1768_v17 = vpop.eup %1767  ;;  %v1059_v37 = vadd.f32 0.5, %v1057_v13 }
 0x363   : > { %v1058_v38 = vmul.f32 0.5, %v1768_v17 }
 0x364   : > { %v1066_v39 = vmul.f32 %v1064_v36, %v1059_v37 }
 0x365   : > { %v1060_v40 = vadd.f32 0.5, %v1058_v38  ;;  %v1274_v38 = vld [vmem:[#allocation3] sm:$0xc0] }
 0x367   : > { %v1062_v41 = vsel %vm781_vm6, %v1768_v17, %v1060_v40 }
 0x368   : > { %v1067_v42 = vmul.f32 %v1062_v41, %v1059_v37 }
 0x36a   : > { %1069 = vrot.lane.b32.xlu1 %v1067_v42, %s1821_s24  ;;  %v1275_v42 = vld [vmem:[#allocation3 + $0x8] sm:$0xc0] }
 0x3dc   : > { %v1070_v43 = vpop.permute.xlu1 %1069 }
 0x3dd   : > { %v1072_v44 = vadd.f32 %v1070_v43, %v1066_v39 }
 0x3df   : > { %1769 = vtanh.f32 %v1072_v44  ;;  %v1228_v9 = vrot.slane %v1072_v44, 6 }
 0x3ec   : > { %v1770_v45 = vpop.eup %1769 }
 0x3ed   : > { %v2093_v46 = vmul.f32 %v1770_v45, %v1062_v41 }
 0x3ef   : > { %v1075_v47 = vpack.c.bf16 %v2093_v46, %v2093_v46 }
 0x3f1   : > { %v1120_v48 = vrot.slane %v1075_v47, 1  ;;  %v1083_v4 = vrot.slane %v1075_v47, %v2106_v30 }
 0x3f3   : > { %1121 = vrot.lane.b32.xlu0 %v1120_v48, %s1821_s24  ;;  %v1084_v62 = vcombine.high %v1083_v4, %v1083_v4 }
 0x3f5   : > { %v1091_v8 = vrot.slane %v1084_v62, %v2106_v30 }
 0x465   : > { %v1122_v49 = vpop.permute.xlu0 %1121 }
 0x466   : > { %1653 = vmatmul.mubr.msk.bf16.vlgmr.msra.gmra.mxu0 %vm837_vm2, %v1122_v49 }
 0x526   : > { %v1200_v50 = vpop.f32.mrf.mxu0 }
 0x527   : > { %v1209_v51 = vrot.slane %v1200_v50, 4 }
 0x528   : > { %v1202_v53 = vpop.f32.mrf.mxu0 }
 0x529   : > { %v1213_v54 = vadd.f32 %v1209_v51, %v1110_v52  ;;  %v1210_v55 = vrot.slane %v1202_v53, 4 }
 0x52a   : > { %v1204_v57 = vpop.f32.mrf.mxu0 }
 0x52b   : > { %v1215_v58 = vmul.f32 0.5, %v1213_v54  ;;  %v1214_v59 = vadd.f32 %v1210_v55, %v1111_v56 }
 0x52c   : > { %v1205_v61 = vpop.f32.mrf.mxu0 }
 0x52d   : > { %1771 = vtanh.f32 %v1215_v58  ;;  %v1216_v63 = vmul.f32 0.5, %v1214_v59  ;;  %v1104_v61 = vrot.slane %v2093_v46, 2 }
 0x52f   : > { %v1218_v0 = vsel %vm781_vm6, %v1214_v59, %v1216_v63 }
 0x530   : > { %1773 = vtanh.f32 %v1218_v0 }
 0x53a   : > { %v1772_v2 = vpop.eup %1771 }
 0x53b   : > { %v1221_v3 = vmul.f32 0.5, %v1772_v2 }
 0x53d   : > { %v1774_v5 = vpop.eup %1773  ;;  %v1223_v10 = vadd.f32 0.5, %v1221_v3 }
 0x53e   : > { %v1222_v14 = vmul.f32 0.5, %v1774_v5 }
 0x53f   : > { %v1230_v15 = vmul.f32 %v1228_v9, %v1223_v10 }
 0x540   : > { %v1224_v1 = vadd.f32 0.5, %v1222_v14 }
 0x542   : > { %v1226_v16 = vsel %vm781_vm6, %v1774_v5, %v1224_v1 }
 0x543   : > { %v1231_v18 = vmul.f32 %v1226_v16, %v1223_v10 }
 0x545   : > { %1233 = vrot.lane.b32.xlu1 %v1231_v18, %s1821_s24 }
 0x5b7   : > { %v1234_v19 = vpop.permute.xlu1 %1233 }
 0x5b8   : > { %v1236_v20 = vadd.f32 %v1234_v19, %v1230_v15 }
 0x5ba   : > { %1775 = vtanh.f32 %v1236_v20  ;;  %v1392_v53 = vrot.slane %v1236_v20, 6 }
 0x5c7   : > { %v1776_v21 = vpop.eup %1775 }
 0x5c8   : > { %v1238_v22 = vmul.f32 %v1776_v21, %v1226_v16 }
 0x5ca   : > { %v1239_v27 = vpack.c.bf16 %v1238_v22, %v1238_v22  ;;  %v1268_v31 = vrot.slane %v1238_v22, 4 }
 0x5cc   : > { %v1284_v28 = vrot.slane %v1239_v27, 2  ;;  %v1247_v34 = vrot.slane %v1239_v27, %v2106_v30 }
 0x5ce   : > { %1285 = vrot.lane.b32.xlu0 %v1284_v28, %s1821_s24 }
 0x5d2   : > { %941 = vrot.lane.b32.xlu0 %v2071_v25, %s1821_s24  ;;  %v1254_v25 = vrot.slane %v1247_v34, %v2106_v30 }
 0x5d4   : > { %v1255_v26 = vcombine.high %v1254_v25, %v1254_v25 }
 0x5d6   : > { %1269 = vrot.lane.b32.xlu0 %v1268_v31, %s1821_s24 }
 0x5da   : > { %934 = vrot.lane.b32.xlu0 %v928_v33, %s1822_s25 }
 0x5de   : > { %1097 = vrot.lane.b32.xlu0 %v1091_v8, %s1822_s25 }
 0x5e2   : > { %1256 = vrot.lane.b32.xlu0 %v1255_v26, %s1821_s24 }
 0x640   : > { %v1286_v6 = vpop.permute.xlu0 %1285 }
 0x641   : > { %1664 = vmatmul.mubr.msk.bf16.vlgmr.msra.gmra.mxu1 %vm837_vm2, %v1286_v6 }
 0x644   : > { %v942_v7 = vpop.permute.xlu0 %941 }
 0x645   : > { %v944_v11 = vadd.f32 %v942_v7, %v939_v35 }
 0x647   : > { %946 = vst.msk [vmem:[#allocation6] sm:$0x3] %vm945_vm7, %v944_v11 }
 0x648   : > { %v1270_v12 = vpop.permute.xlu0 %1269 }
 0x64c   : > { %v935_v13 = vpop.permute.xlu0 %934 }
 0x64d   : > { %1633 = vst.msk [vmem:[%s1913_s14 + $0x3] sm:$0x1] %vm932_vm8, %v935_v13 }
 0x64e   : > { %v1102_v60 = vld [vmem:[#allocation6] sm:$0x3] }
 0x650   : > { %v1098_v17 = vpop.permute.xlu0 %1097 }
 0x651   : > { %1644 = vst.msk [vmem:[%s1913_s14 + $0x2] sm:$0x1] %vm932_vm8, %v1098_v17 }
 0x654   : > { %v1257_v9 = vpop.permute.xlu0 %1256 }
 0x655   : > { %1654 = vst.msk [vmem:[%s1908_s28 + $0x2] sm:$0x1] %vm932_vm8, %v1257_v9 }
 0x701   : > { %v1364_v36 = vpop.f32.mrf.mxu1 }
 0x702   : > { %v1373_v37 = vrot.slane %v1364_v36, 2 }
 0x703   : > { %v1366_v39 = vpop.f32.mrf.mxu1 }
 0x704   : > { %v1377_v40 = vadd.f32 %v1373_v37, %v1274_v38  ;;  %v1374_v41 = vrot.slane %v1366_v39, 2 }
 0x705   : > { %v1368_v43 = vpop.f32.mrf.mxu1 }
 0x706   : > { %v1379_v44 = vmul.f32 0.5, %v1377_v40  ;;  %v1378_v45 = vadd.f32 %v1374_v41, %v1275_v42 }
 0x707   : > { %v1369_v47 = vpop.f32.mrf.mxu1 }
 0x708   : > { %1777 = vtanh.f32 %v1379_v44  ;;  %v1380_v48 = vmul.f32 0.5, %v1378_v45 }
 0x70a   : > { %v1382_v49 = vsel %vm781_vm6, %v1378_v45, %v1380_v48 }
 0x70b   : > { %1779 = vtanh.f32 %v1382_v49 }
 0x715   : > { %v1778_v50 = vpop.eup %1777 }
 0x716   : > { %v1385_v51 = vmul.f32 0.5, %v1778_v50 }
 0x718   : > { %v1780_v52 = vpop.eup %1779  ;;  %v1387_v54 = vadd.f32 0.5, %v1385_v51 }
 0x719   : > { %v1386_v55 = vmul.f32 0.5, %v1780_v52 }
 0x71a   : > { %v1394_v56 = vmul.f32 %v1392_v53, %v1387_v54 }
 0x71b   : > { %v1388_v57 = vadd.f32 0.5, %v1386_v55 }
 0x71d   : > { %v1390_v58 = vsel %vm781_vm6, %v1780_v52, %v1388_v57 }
 0x71e   : > { %v1395_v59 = vmul.f32 %v1390_v58, %v1387_v54 }
 0x720   : > { %1397 = vrot.lane.b32.xlu1 %v1395_v59, %s1821_s24 }
 0x724   : > { %1105 = vrot.lane.b32.xlu1 %v1104_v61, %s1821_s24 }
 0x728   : > { %929 = vrot.lane.b32.xlu1 %v928_v33, %s1821_s24 }
 0x72c   : > { %1092 = vrot.lane.b32.xlu1 %v1091_v8, %s1821_s24 }
 0x730   : > { %1261 = vrot.lane.b32.xlu1 %v1255_v26, %s1822_s25 }
 0x792   : > { %v1398_v63 = vpop.permute.xlu1 %1397 }
 0x793   : > { %v1400_v0 = vadd.f32 %v1398_v63, %v1394_v56 }
 0x795   : > { %1781 = vtanh.f32 %v1400_v0 }
 0x796   : > { %v1106_v2 = vpop.permute.xlu1 %1105 }
 0x797   : > { %v1108_v3 = vadd.f32 %v1106_v2, %v1102_v60 }
 0x799   : > { %1109 = vst.msk [vmem:[#allocation6] sm:$0x3] %vm945_vm7, %v1108_v3 }
 0x79a   : > { %v930_v46 = vpop.permute.xlu1 %929 }
 0x79b   : > { %933 = vst.msk [vmem:[%s1908_s28] sm:$0x1] %vm932_vm8, %v930_v46 }
 0x79e   : > { %v1093_v5 = vpop.permute.xlu1 %1092 }
 0x79f   : > { %1643 = vst.msk [vmem:[%s1908_s28 + $0x1] sm:$0x1] %vm932_vm8, %v1093_v5 }
 0x7a0   : > { %v1266_v10 = vld [vmem:[#allocation6] sm:$0x3] }
 0x7a1   : > { %v1272_v14 = vadd.f32 %v1270_v12, %v1266_v10 }
 0x7a2   : > { %v1782_v15 = vpop.eup %1781  ;;  %v1262_v1 = vpop.permute.xlu1 %1261 }
 0x7a3   : > { %1273 = vst.msk [vmem:[#allocation6] sm:$0x3] %vm945_vm7, %v1272_v14  ;;  %v1402_v16 = vmul.f32 %v1782_v15, %v1390_v58 }
 0x7a4   : > { %1655 = vst.msk [vmem:[%s1913_s14 + $0x1] sm:$0x1] %vm932_vm8, %v1262_v1 }
 0x7a5   : > { %v1432_v18 = vrot.slane %v1402_v16, 6  ;;  %v1403_v19 = vpack.c.bf16 %v1402_v16, %v1402_v16 }
 0x7a7   : > { %1433 = vrot.lane.b32.xlu1 %v1432_v18, %s1821_s24  ;;  %v1411_v20 = vrot.slane %v1403_v19, %v2106_v30 }
 0x7a9   : > { %v1412_v21 = vcombine.high %v1411_v20, %v1411_v20 }
 0x7aa   : > { %v1430_v24 = vld [vmem:[#allocation6] sm:$0x3] }
 0x7ab   : > { %v1419_v22 = vrot.slane %v1412_v21, %v2106_v30 }
 0x7ad   : > { %v1420_v23 = vcombine.high %v1419_v22, %v1419_v22 }
 0x7af   : > { %1421 = vrot.lane.b32.xlu0 %v1420_v23, %s1821_s24  ;;  %1426 = vrot.lane.b32.xlu1 %v1420_v23, %s1822_s25 }
 0x7b3   : > { %1438 = vrot.lane.b32.xlu0 %v1402_v16, %s1821_s24  ;;  %1444 = vrot.lane.b32.xlu1 %v1400_v0, %s1821_s24 }
 0x819   : > { %v1434_v27 = vpop.permute.xlu1 %1433 }
 0x81a   : > { %v1436_v28 = vadd.f32 %v1434_v27, %v1430_v24 }
 0x81c   : > { %1437 = vst.msk [vmem:[#allocation6] sm:$0x3] %vm945_vm7, %v1436_v28 }
 0x821   : > { %v1422_v29 = vpop.permute.xlu0 %1421  ;;  %v1427_v31 = vpop.permute.xlu1 %1426 }
 0x822   : > { %1665 = vst.msk [vmem:[%s1908_s28 + $0x3] sm:$0x1] %vm932_vm8, %v1422_v29  ;;  %1429 = vst.msk [vmem:[%s1913_s14] sm:$0x1] %vm932_vm8, %v1427_v31  ;;  %1451 = sbr.rel (%p1666_p6) target bundleno = 2091 (0x82b), region = 56 }
 0x825   : > { %v1439_v30 = vpop.permute.xlu0 %1438  ;;  %v1445_v32 = vpop.permute.xlu1 %1444 }
 0x826   : > { %1442 = vst.msk [vmem:[#allocation4 - $0x6] sm:$0xc0] %vm1441_vm9, %v1439_v30  ;;  %1447 = vst.msk [vmem:[#allocation5 - $0x6] sm:$0xc0] %vm1441_vm9, %v1445_v32 }
 0x827   : > { %v1452_v4 = vld [vmem:[#allocation6] sm:$0x3] }
 0x828   : > { %v1453_v33 = vmul.f32 0.125, %v1452_v4 }
 0x82a   : > { %1454 = vst.msk [vmem:[#allocation6] sm:$0x3] %vm945_vm7, %v1453_v33 }
 0x82b PF: > { %p1675_p7 = scmp.eq.s32.totalorder %s1883_s10, 1  ;;  %s1826_s24 = smov [#allocation6]  }
 0x82c   : > { %s1480_s28 = sshll.u32 %s1826_s24, 4  ;;  %s1481_s28 = int_to_ptr.vmem [resolvable:$true] %s1480_s28 }
 0x82d   : > { %s1783_s14 = scalar_lea.vmem %s1481_s28, 32  ;;  %p1790_p11 = scmp.lt.s32.totalorder %s1481_s28, %s1481_s28 }
 0x82e   : > { %p1784_p8 = scmp.ne.s32.totalorder %s1481_s28, %s1783_s14  ;;  %p1791_p12 = scmp.lt.s32.totalorder %s1783_s14, %s1783_s14 }
 0x830   : > { %p1785_p9 = pnand %p1784_p8, %p1675_p7  ;;  %p1792_p13 = por %p1791_p12, %p1790_p11 }
 0x832   : > { %p1786_p10 = pneg %p1785_p9 }
 0x834   : > { %p1793_p0 = pnand %p1792_p13, %p1786_p10 }
 0x836   : > { %1796 = shalt.err (!%p1793_p0)
}
 0x837   : > { %1672 = dma.vmem_to_hbm [thread:$0]  (%p1675_p7), %s1481_s28, 32, %s2185_s9, [#allocation7]  }
 0x838   : > { %1812 = dma.done.wait (%p1675_p7), [#allocation7], 32  }
 0x839   : > { %1814 = vsyncadd (%p1675_p7), [#allocation7], 4294967264 }
 0x83a PF: > { %s21_s30 = sadd.s32 1, %s1817_s30  }
 0x83b   : > { %p18_p1 = scmp.ge.s32.totalorder %s21_s30, 4  }
 0x83d   :  { %20 = sbr.rel (!%p18_p1) target bundleno = 1 (0x1), region = 134 }
 0x842   :  { %1508 = vsyncpa [#allocation7], 1 }
 0x843   :  { %1510 = vsyncpa [#allocation7 + $0x1], 1 }

</bundles_post_ra>
